<compile_context>
chip_gen: v5e
topology: v5e:2x2
jax: 0.10.0
libtpu: 0.0.40
codegen_flags: <defaults>
</compile_context>

<pallas_src>
import functools

import jax
import jax.numpy as jnp
from jax.experimental import pallas as pl
from jax.experimental.pallas import tpu as pltpu


def _round_up(x: int, m: int) -> int:
    return (x + m - 1) // m * m


def _pad2d(x, rows: int, cols: int):
    return jnp.pad(x, ((0, rows - x.shape[0]), (0, cols - x.shape[1])))


def _nbytes(x) -> int:
    return int(x.size) * jnp.dtype(x.dtype).itemsize


# --------------------------------------------------------------------------- kernel
def _shap_mpnn_kernel(depth,
                      V_ref, E2_ref, A2_ref, S2_hbm_ref, B_hbm_ref,
                      Wi_v_ref, Wi_e_ref, Wh_ref, Wo_v_ref, Wo_m_ref, bo_ref,
                      W1_ref, b1_ref, W2_ref, b2_ref,
                      out_ref,
                      s2_vmem, b_vmem, dma_sem):
    f32, bf16 = jnp.float32, jnp.bfloat16

    def mm(a, b):  # bf16 x bf16 MXU matmul with f32 accumulation
        return jnp.dot(a, b, preferred_element_type=f32)

    # Start streaming the finalize-side inputs from HBM while compute runs.
    cp_s2 = pltpu.make_async_copy(S2_hbm_ref, s2_vmem, dma_sem.at[0])
    cp_b = pltpu.make_async_copy(B_hbm_ref, b_vmem, dma_sem.at[1])
    cp_s2.start()
    cp_b.start()

    V = V_ref[...]          # (Np, d_vp)   node features            (bf16)
    E2 = E2_ref[...]        # (2Pp, d_ep)  stacked [fwd; bwd] edges  (bf16)
    A2 = A2_ref[...]        # (2Pp, Np)    stacked src one-hots      (bf16)

    Wi_v, Wi_e, Wh = Wi_v_ref[...], Wi_e_ref[...], Wh_ref[...]
    Wo_v, Wo_m = Wo_v_ref[...], Wo_m_ref[...]
    W1, W2 = W1_ref[...], W2_ref[...]

    d_vp = V.shape[1]
    d_hp = Wh.shape[0]
    Pp = s2_vmem.shape[1] // 2        # static: padded number of bond pairs

    # --- BondMessagePassing.initialize: H0[e] = W_i([V[src(e)] ; E[e]]) (no bias) ---
    if d_hp <= d_vp:
        # Reassociated: project V once (Np rows), then gather the projection.
        PV = mm(V, Wi_v).astype(bf16)                   # (Np, d_hp)
        H0 = mm(A2, PV) + mm(E2, Wi_e)                  # (2Pp, d_hp) f32
    else:
        VX = mm(A2, V).astype(bf16)                     # (2Pp, d_vp)
        H0 = mm(VX, Wi_v) + mm(E2, Wi_e)
    H0b = H0.astype(bf16)          # persistent residual kept in bf16 (VMEM saving)
    H = jnp.maximum(H0, 0.0)       # tau = ReLU, (2Pp, d_hp) f32

    # Scatter matrix is needed from the first message-passing step onwards.
    cp_s2.wait()
    S2 = s2_vmem[...]                                   # (Np, 2Pp) bf16 = [Sw | Su]
    Sp = S2[:, :Pp] + S2[:, Pp:]                        # (Np, Pp)  bond-pair incidence

    # --- message passing: depth-1 iterations, undirected=True, dropout=0 ---------
    for _ in range(1, depth):
        # Undirected symmetrization H[e] <- (H[e] + H[rev e]) / 2 is one
        # element-wise average of the two row-halves (rev(e) = other half).
        Hs = 0.5 * (H[:Pp] + H[Pp:])                    # (Pp, d_hp) f32
        H2s = jnp.concatenate([Hs, Hs], axis=0)         # symmetrized stacked states
        # Per-node sum of incoming symmetrized messages (contracts over bond pairs).
        M_node = mm(Sp, Hs.astype(bf16))                # (Np, d_hp) f32
        # M[e] = sum_{e': dst(e')=src(e)} H[e'] - H[rev e]; after symmetrization
        # H[rev e] == H2s[e] -> plain subtraction, single stacked gather matmul.
        M2 = mm(A2, M_node.astype(bf16)) - H2s          # (2Pp, d_hp)
        H = jnp.maximum(H0b.astype(f32) + mm(M2.astype(bf16), Wh), 0.0)

    # --- finalize: H_v = relu(W_o([V ; sum_{dst(e)=v} H[e]]) + b_o) ---------------
    M_v = mm(S2, H.astype(bf16))                        # (Np, d_hp)
    H_v = jnp.maximum(mm(V, Wo_v) + mm(M_v.astype(bf16), Wo_m) + bo_ref[...], 0.0)

    # --- NormAggregation: per-molecule sum / 100 ----------------------------------
    cp_b.wait()
    H_mol = mm(b_vmem[...], H_v.astype(bf16)) * (1.0 / 100.0)   # (Mp, d_hp)

    # --- RegressionFFN: Linear -> ReLU -> Linear, output_transform = Identity -----
    Z = jnp.maximum(mm(H_mol.astype(bf16), W1) + b1_ref[...], 0.0)
    out_ref[...] = mm(Z.astype(bf16), W2) + b2_ref[...]


# --------------------------------------------------------------- wrapper-side helpers
def preprocess_graph(bmg, *, n_mols):
    """Build lane-dense, pair-stacked incidence/feature tensors once per batch.

    Must be called outside jit (it host-asserts the chemprop edge layout
    rev_edge_index[e] == e ^ 1, i.e. both directions of a bond are consecutive).
    """
    V = bmg["V"].astype(jnp.float32)                  # (n_nodes, d_v)
    E = bmg["E"].astype(jnp.float32)                  # (n_edges, d_e)
    edge_index = bmg["edge_index"]                    # (2, n_edges) int32 [src; dst]
    rev = bmg["rev_edge_index"]                       # (n_edges,)   int32
    mol_batch = bmg["batch"]                          # (n_nodes,)   int32

    n_nodes, d_v = V.shape
    n_edges, d_e = E.shape
    assert n_edges % 2 == 0, "directed edges must come in (forward, backward) pairs"
    assert bool(jnp.all(rev == (jnp.arange(n_edges, dtype=rev.dtype) ^ 1))), \
        "expected chemprop edge layout: rev_edge_index[e] == e ^ 1"
    n_pairs = n_edges // 2

    Np = _round_up(n_nodes, 128)      # lane dim of A2/B, sublane dim of V/S2
    Pp = _round_up(n_pairs, 128)      # half the stacked edge-row dim
    d_vp = _round_up(d_v, 128)
    d_ep = _round_up(d_e, 128)
    Mp = _round_up(max(n_mols, 1), 8)

    u = edge_index[0, 0::2]           # src of forward edge of each pair
    w = edge_index[0, 1::2]           # src of backward edge (= dst of forward edge)

    bf = jnp.bfloat16
    Au = _pad2d(jax.nn.one_hot(u, Np, dtype=bf), Pp, Np)          # (Pp, Np)
    Aw = _pad2d(jax.nn.one_hot(w, Np, dtype=bf), Pp, Np)          # (Pp, Np)
    A2 = jnp.concatenate([Au, Aw], axis=0)                        # (2Pp, Np) gather
    S2 = jnp.concatenate([Aw, Au], axis=0).T                      # (Np, 2Pp) = [Sw|Su]
    B = _pad2d(jax.nn.one_hot(mol_batch, Mp, dtype=bf).T, Mp, Np)  # (Mp, Np)

    Vp = _pad2d(V, Np, d_vp).astype(bf)
    E2 = jnp.concatenate([_pad2d(E[0::2], Pp, d_ep),
                          _pad2d(E[1::2], Pp, d_ep)], axis=0).astype(bf)   # (2Pp, d_ep)

    return dict(V=Vp, E2=E2, A2=A2, S2=S2, B=B,
                n_nodes=n_nodes, n_pairs=n_pairs, n_mols=n_mols)


def pad_params(params, d_v, d_e, d_h, output_dim):
    """Zero-pad weights to lane-dense (multiple-of-128) shapes; bf16 for MXU, f32 biases."""
    d_vp, d_ep = _round_up(d_v, 128), _round_up(d_e, 128)
    d_hp, d_op = _round_up(d_h, 128), _round_up(output_dim, 128)
    bf, f32 = jnp.bfloat16, jnp.float32
    return dict(
        Wi_v=_pad2d(params["Wi_v"], d_vp, d_hp).astype(bf),
        Wi_e=_pad2d(params["Wi_e"], d_ep, d_hp).astype(bf),
        Wh=_pad2d(params["Wh"], d_hp, d_hp).astype(bf),
        Wo_v=_pad2d(params["Wo_v"], d_vp, d_hp).astype(bf),
        Wo_m=_pad2d(params["Wo_m"], d_hp, d_hp).astype(bf),
        bo=_pad2d(params["bo"], 1, d_hp).astype(f32),
        W1=_pad2d(params["W1"], d_hp, d_hp).astype(bf),
        b1=_pad2d(params["b1"], 1, d_hp).astype(f32),
        W2=_pad2d(params["W2"], d_hp, d_op).astype(bf),
        b2=_pad2d(params["b2"], 1, d_op).astype(f32),
    )


def _vmem_capacity_bytes() -> int:
    try:
        info = pltpu.get_tpu_info()
        cap = int(getattr(info, "vmem_capacity_bytes", 0) or 0)
        if cap > 0:
            return cap
    except Exception:
        pass
    return 64 * 1024 * 1024   # conservative default (v7x per-TC VMEM)


def shap_mpnn_forward(graph, padded_params, *, depth, output_dim):
    Np, d_vp = graph["V"].shape
    P2 = graph["A2"].shape[0]          # 2 * Pp
    Pp = P2 // 2
    Mp = graph["B"].shape[0]
    d_hp = padded_params["Wh"].shape[0]
    d_op = padded_params["W2"].shape[1]
    n_mols = graph["n_mols"]

    vmem_inputs = (graph["V"], graph["E2"], graph["A2"])
    any_inputs = (graph["S2"], graph["B"])               # streamed in-kernel via DMA
    weights = (padded_params["Wi_v"], padded_params["Wi_e"], padded_params["Wh"],
               padded_params["Wo_v"], padded_params["Wo_m"], padded_params["bo"],
               padded_params["W1"], padded_params["b1"], padded_params["W2"],
               padded_params["b2"])
    inputs = vmem_inputs + any_inputs + weights

    in_specs = ([pl.BlockSpec(memory_space=pltpu.MemorySpace.VMEM)] * len(vmem_inputs)
                + [pl.BlockSpec(memory_space=pl.ANY)] * len(any_inputs)
                + [pl.BlockSpec(memory_space=pltpu.MemorySpace.VMEM)] * len(weights))

    scratch_shapes = [
        pltpu.VMEM((Np, P2), jnp.bfloat16),              # S2 landing buffer
        pltpu.VMEM((Mp, Np), jnp.bfloat16),              # B landing buffer
        pltpu.SemaphoreType.DMA((2,)),
    ]

    # Generation-aware VMEM budget: VMEM-resident inputs + DMA landing buffers +
    # f32/bf16 activation estimate, ~1.3x headroom, clamped to ~85% of this chip's
    # physical VMEM (v7x: 64 MiB; v5e/v6e: 128 MiB).
    vmem_in_bytes = sum(_nbytes(x) for x in vmem_inputs + weights)
    scratch_bytes = sum(_nbytes(x) for x in any_inputs)
    act_bytes = (4 * (8 * Pp * d_hp + 4 * Np * d_hp + 2 * Mp * d_hp + Mp * d_op)
                 + 2 * (4 * Pp * d_hp + 2 * Np * d_hp + Np * Pp))
    need = vmem_in_bytes + scratch_bytes + act_bytes + 4 * Mp * d_op
    cap = _vmem_capacity_bytes()
    vmem_limit = int(min(max(int(1.3 * need), 32 * 1024 * 1024), int(0.85 * cap)))

    # TODO(synk): add an edge-tiled grid (dimension_semantics=("parallel",...)) so
    # v7x's two TensorCores split the (2Pp) row dimension and BlockSpec pipelining
    # kicks in for graphs larger than one VMEM-resident block.
    out_pad = pl.pallas_call(
        functools.partial(_shap_mpnn_kernel, depth),
        out_shape=jax.ShapeDtypeStruct((Mp, d_op), jnp.float32),
        in_specs=in_specs,
        out_specs=pl.BlockSpec(memory_space=pltpu.MemorySpace.VMEM),
        scratch_shapes=scratch_shapes,
        compiler_params=pltpu.CompilerParams(vmem_limit_bytes=vmem_limit),
    )(*inputs)
    return out_pad[:n_mols, :output_dim]


# ------------------------------------------------------------------- pure-JAX reference
def shap_mpnn_reference(batch, params, *, depth, n_mols):
    bmg = batch["batch_mol_graph"]
    V = bmg["V"].astype(jnp.float32)
    E = bmg["E"].astype(jnp.float32)
    src, dst = bmg["edge_index"][0], bmg["edge_index"][1]
    rev = bmg["rev_edge_index"]
    mol = bmg["batch"]
    n_nodes = V.shape[0]

    H0 = V[src] @ params["Wi_v"] + E @ params["Wi_e"]
    H = jnp.maximum(H0, 0.0)
    for _ in range(1, depth):
        H = 0.5 * (H + H[rev])
        M_node = jax.ops.segment_sum(H, dst, num_segments=n_nodes)
        M = M_node[src] - H[rev]
        H = jnp.maximum(H0 + M @ params["Wh"], 0.0)
    M_v = jax.ops.segment_sum(H, dst, num_segments=n_nodes)
    H_v = jnp.maximum(V @ params["Wo_v"] + M_v @ params["Wo_m"] + params["bo"], 0.0)
    H_mol = jax.ops.segment_sum(H_v, mol, num_segments=n_mols) / 100.0
    Z = jnp.maximum(H_mol @ params["W1"] + params["b1"], 0.0)
    return Z @ params["W2"] + params["b2"]


def init_params(key, d_v, d_e, d_h, output_dim):
    ks = jax.random.split(key, 10)
    s = 0.1
    return {
        # W_i : Linear(d_v + d_e, d_h, bias=False), split along the input concat
        "Wi_v": s * jax.random.normal(ks[0], (d_v, d_h), jnp.float32),
        "Wi_e": s * jax.random.normal(ks[1], (d_e, d_h), jnp.float32),
        # W_h : Linear(d_h, d_h, bias=False)
        "Wh": s * jax.random.normal(ks[2], (d_h, d_h), jnp.float32),
        # W_o : Linear(d_v + d_h, d_h, bias=True), split along the input concat
        "Wo_v": s * jax.random.normal(ks[3], (d_v, d_h), jnp.float32),
        "Wo_m": s * jax.random.normal(ks[4], (d_h, d_h), jnp.float32),
        "bo": s * jax.random.normal(ks[5], (1, d_h), jnp.float32),
        # RegressionFFN: Linear(d_h, d_h) -> ReLU -> Linear(d_h, output_dim)
        "W1": s * jax.random.normal(ks[6], (d_h, d_h), jnp.float32),
        "b1": s * jax.random.normal(ks[7], (1, d_h), jnp.float32),
        "W2": s * jax.random.normal(ks[8], (d_h, output_dim), jnp.float32),
        "b2": s * jax.random.normal(ks[9], (1, output_dim), jnp.float32),
    }


if __name__ == "__main__":
    # Small config consistent with ShapMPNN(d_e, d_v, output_dim, d_h=..., depth=3, undirected=True)
    d_v, d_e, d_h, output_dim, depth = 8, 8, 32, 4, 3
    n_mols, atoms_per_mol = 2, 8

    # Deterministic batched molecular graph: 2 molecules, each an 8-atom ring.
    # Forward/backward edges of every bond are consecutive (rev(e) = e ^ 1, chemprop layout).
    edges = []
    for m in range(n_mols):
        off = m * atoms_per_mol
        for i in range(atoms_per_mol):
            u, w = off + i, off + (i + 1) % atoms_per_mol
            edges.append((u, w))
            edges.append((w, u))
    edge_index = jnp.array(edges, dtype=jnp.int32).T            # (2, n_edges)
    n_edges = edge_index.shape[1]
    rev_edge_index = jnp.arange(n_edges, dtype=jnp.int32) ^ 1
    mol_batch = jnp.array([m for m in range(n_mols) for _ in range(atoms_per_mol)],
                          dtype=jnp.int32)
    n_nodes = n_mols * atoms_per_mol

    key = jax.random.PRNGKey(0)
    k_v, k_e, k_p = jax.random.split(key, 3)
    V = jax.random.normal(k_v, (n_nodes, d_v), jnp.float32)
    E = jax.random.normal(k_e, (n_edges, d_e), jnp.float32)
    params = init_params(k_p, d_v, d_e, d_h, output_dim)

    batch = {"batch_mol_graph": {"V": V, "E": E, "edge_index": edge_index,
                                 "rev_edge_index": rev_edge_index, "batch": mol_batch}}

    # Preprocess once per batch (incidence matrices are not rebuilt per forward call).
    graph = preprocess_graph(batch["batch_mol_graph"], n_mols=n_mols)
    padded = pad_params(params, d_v, d_e, d_h, output_dim)

    out = shap_mpnn_forward(graph, padded, depth=depth, output_dim=output_dim)
    out = jax.block_until_ready(out)
    assert out.shape == (n_mols, output_dim)

    ref = jax.block_until_ready(
        shap_mpnn_reference(batch, params, depth=depth, n_mols=n_mols))
    max_err = float(jnp.max(jnp.abs(out - ref)))
    assert max_err < 2e-2, f"kernel/reference mismatch: max |err| = {max_err:.3e}"
    print("KERNEL_OK")
</pallas_src>

<mosaic_0001>
module attributes {stable_mosaic.version = 11 : i64} {
  func.func @_shap_mpnn_kernel(%arg0: memref<128x128xbf16, #tpu.memory_space<vmem>>, %arg1: memref<256x128xbf16, #tpu.memory_space<vmem>>, %arg2: memref<256x128xbf16, #tpu.memory_space<vmem>>, %arg3: memref<128x256xbf16, #tpu.memory_space<any>>, %arg4: memref<8x128xbf16, #tpu.memory_space<any>>, %arg5: memref<128x128xbf16, #tpu.memory_space<vmem>>, %arg6: memref<128x128xbf16, #tpu.memory_space<vmem>>, %arg7: memref<128x128xbf16, #tpu.memory_space<vmem>>, %arg8: memref<128x128xbf16, #tpu.memory_space<vmem>>, %arg9: memref<128x128xbf16, #tpu.memory_space<vmem>>, %arg10: memref<1x128xf32, #tpu.memory_space<vmem>>, %arg11: memref<128x128xbf16, #tpu.memory_space<vmem>>, %arg12: memref<1x128xf32, #tpu.memory_space<vmem>>, %arg13: memref<128x128xbf16, #tpu.memory_space<vmem>>, %arg14: memref<1x128xf32, #tpu.memory_space<vmem>>, %arg15: memref<8x128xf32, #tpu.memory_space<vmem>>, %arg16: memref<128x256xbf16, #tpu.memory_space<vmem>>, %arg17: memref<8x128xbf16, #tpu.memory_space<vmem>>, %arg18: memref<2x!tpu.dma_semaphore, #tpu.memory_space<semaphore_mem>>) attributes {dimension_semantics = [], scalar_prefetch = 0 : i64, scratch_operands = 3 : i64, tpu.core_type = #tpu.core_type<tc>} {
    %c0_i32 = arith.constant 0 : i32
    %0 = tpu.memref_slice %arg18[%c0_i32] : memref<2x!tpu.dma_semaphore, #tpu.memory_space<semaphore_mem>> -> memref<1x!tpu.dma_semaphore, #tpu.memory_space<semaphore_mem>>
    %1 = tpu.memref_squeeze %0 : memref<1x!tpu.dma_semaphore, #tpu.memory_space<semaphore_mem>> -> memref<!tpu.dma_semaphore, #tpu.memory_space<semaphore_mem>>
    tpu.enqueue_dma source(%arg3 : memref<128x256xbf16, #tpu.memory_space<any>>) target(%arg16 : memref<128x256xbf16, #tpu.memory_space<vmem>>) target_semaphore(%1 : memref<!tpu.dma_semaphore, #tpu.memory_space<semaphore_mem>>)
    %c1_i32 = arith.constant 1 : i32
    %2 = tpu.memref_slice %arg18[%c1_i32] : memref<2x!tpu.dma_semaphore, #tpu.memory_space<semaphore_mem>> -> memref<1x!tpu.dma_semaphore, #tpu.memory_space<semaphore_mem>>
    %3 = tpu.memref_squeeze %2 : memref<1x!tpu.dma_semaphore, #tpu.memory_space<semaphore_mem>> -> memref<!tpu.dma_semaphore, #tpu.memory_space<semaphore_mem>>
    tpu.enqueue_dma source(%arg4 : memref<8x128xbf16, #tpu.memory_space<any>>) target(%arg17 : memref<8x128xbf16, #tpu.memory_space<vmem>>) target_semaphore(%3 : memref<!tpu.dma_semaphore, #tpu.memory_space<semaphore_mem>>)
    %c0 = arith.constant 0 : index
    %c0_0 = arith.constant 0 : index
    %4 = vector.load %arg0[%c0, %c0_0] : memref<128x128xbf16, #tpu.memory_space<vmem>>, vector<128x128xbf16>
    %c0_1 = arith.constant 0 : index
    %c0_2 = arith.constant 0 : index
    %5 = vector.load %arg1[%c0_1, %c0_2] : memref<256x128xbf16, #tpu.memory_space<vmem>>, vector<256x128xbf16>
    %c0_3 = arith.constant 0 : index
    %c0_4 = arith.constant 0 : index
    %6 = vector.load %arg2[%c0_3, %c0_4] : memref<256x128xbf16, #tpu.memory_space<vmem>>, vector<256x128xbf16>
    %c0_5 = arith.constant 0 : index
    %c0_6 = arith.constant 0 : index
    %7 = vector.load %arg5[%c0_5, %c0_6] : memref<128x128xbf16, #tpu.memory_space<vmem>>, vector<128x128xbf16>
    %c0_7 = arith.constant 0 : index
    %c0_8 = arith.constant 0 : index
    %8 = vector.load %arg6[%c0_7, %c0_8] : memref<128x128xbf16, #tpu.memory_space<vmem>>, vector<128x128xbf16>
    %c0_9 = arith.constant 0 : index
    %c0_10 = arith.constant 0 : index
    %9 = vector.load %arg7[%c0_9, %c0_10] : memref<128x128xbf16, #tpu.memory_space<vmem>>, vector<128x128xbf16>
    %c0_11 = arith.constant 0 : index
    %c0_12 = arith.constant 0 : index
    %10 = vector.load %arg8[%c0_11, %c0_12] : memref<128x128xbf16, #tpu.memory_space<vmem>>, vector<128x128xbf16>
    %c0_13 = arith.constant 0 : index
    %c0_14 = arith.constant 0 : index
    %11 = vector.load %arg9[%c0_13, %c0_14] : memref<128x128xbf16, #tpu.memory_space<vmem>>, vector<128x128xbf16>
    %c0_15 = arith.constant 0 : index
    %c0_16 = arith.constant 0 : index
    %12 = vector.load %arg11[%c0_15, %c0_16] : memref<128x128xbf16, #tpu.memory_space<vmem>>, vector<128x128xbf16>
    %c0_17 = arith.constant 0 : index
    %c0_18 = arith.constant 0 : index
    %13 = vector.load %arg13[%c0_17, %c0_18] : memref<128x128xbf16, #tpu.memory_space<vmem>>, vector<128x128xbf16>
    %cst = arith.constant dense<0.000000e+00> : vector<128x128xf32>
    %14 = tpu.matmul %4, %7, %cst {dimension_numbers = #tpu.dot_dimension_numbers<[1], [0], [0], [1], [0, 0, 1, 1], [], []>} : vector<128x128xbf16>, vector<128x128xbf16>, vector<128x128xf32> -> vector<128x128xf32>
    %15 = arith.truncf %14 : vector<128x128xf32> to vector<128x128xbf16>
    %cst_19 = arith.constant dense<0.000000e+00> : vector<256x128xf32>
    %16 = tpu.matmul %6, %15, %cst_19 {dimension_numbers = #tpu.dot_dimension_numbers<[1], [0], [0], [1], [0, 0, 1, 1], [], []>} : vector<256x128xbf16>, vector<128x128xbf16>, vector<256x128xf32> -> vector<256x128xf32>
    %cst_20 = arith.constant dense<0.000000e+00> : vector<256x128xf32>
    %17 = tpu.matmul %5, %8, %cst_20 {dimension_numbers = #tpu.dot_dimension_numbers<[1], [0], [0], [1], [0, 0, 1, 1], [], []>} : vector<256x128xbf16>, vector<128x128xbf16>, vector<256x128xf32> -> vector<256x128xf32>
    %18 = arith.addf %16, %17 : vector<256x128xf32>
    %19 = arith.truncf %18 : vector<256x128xf32> to vector<256x128xbf16>
    %cst_21 = arith.constant 0.000000e+00 : f32
    %20 = vector.broadcast %cst_21 : f32 to vector<256x128xf32>
    %21 = arith.maximumf %18, %20 : vector<256x128xf32>
    %c0_i32_22 = arith.constant 0 : i32
    %22 = tpu.memref_slice %arg18[%c0_i32_22] : memref<2x!tpu.dma_semaphore, #tpu.memory_space<semaphore_mem>> -> memref<1x!tpu.dma_semaphore, #tpu.memory_space<semaphore_mem>>
    %23 = tpu.memref_squeeze %22 : memref<1x!tpu.dma_semaphore, #tpu.memory_space<semaphore_mem>> -> memref<!tpu.dma_semaphore, #tpu.memory_space<semaphore_mem>>
    tpu.wait_dma2 semaphore(%23 : memref<!tpu.dma_semaphore, #tpu.memory_space<semaphore_mem>>) src(%arg3 : memref<128x256xbf16, #tpu.memory_space<any>>) dst(%arg16 : memref<128x256xbf16, #tpu.memory_space<vmem>>)
    %c0_23 = arith.constant 0 : index
    %c0_24 = arith.constant 0 : index
    %24 = vector.load %arg16[%c0_23, %c0_24] : memref<128x256xbf16, #tpu.memory_space<vmem>>, vector<128x256xbf16>
    %25 = vector.extract_strided_slice %24 {offsets = [0, 0], sizes = [128, 128], strides = [1, 1]} : vector<128x256xbf16> to vector<128x128xbf16>
    %26 = vector.extract_strided_slice %24 {offsets = [0, 128], sizes = [128, 128], strides = [1, 1]} : vector<128x256xbf16> to vector<128x128xbf16>
    %27 = arith.addf %25, %26 : vector<128x128xbf16>
    %28 = vector.extract_strided_slice %21 {offsets = [0, 0], sizes = [128, 128], strides = [1, 1]} : vector<256x128xf32> to vector<128x128xf32>
    %29 = vector.extract_strided_slice %21 {offsets = [128, 0], sizes = [128, 128], strides = [1, 1]} : vector<256x128xf32> to vector<128x128xf32>
    %30 = arith.addf %28, %29 : vector<128x128xf32>
    %cst_25 = arith.constant 5.000000e-01 : f32
    %31 = vector.broadcast %cst_25 : f32 to vector<128x128xf32>
    %32 = arith.mulf %31, %30 : vector<128x128xf32>
    %33 = tpu.concatenate %32, %32 in 0 : vector<128x128xf32>, vector<128x128xf32> -> vector<256x128xf32>
    %34 = arith.truncf %32 : vector<128x128xf32> to vector<128x128xbf16>
    %cst_26 = arith.constant dense<0.000000e+00> : vector<128x128xf32>
    %35 = tpu.matmul %27, %34, %cst_26 {dimension_numbers = #tpu.dot_dimension_numbers<[1], [0], [0], [1], [0, 0, 1, 1], [], []>} : vector<128x128xbf16>, vector<128x128xbf16>, vector<128x128xf32> -> vector<128x128xf32>
    %36 = arith.truncf %35 : vector<128x128xf32> to vector<128x128xbf16>
    %cst_27 = arith.constant dense<0.000000e+00> : vector<256x128xf32>
    %37 = tpu.matmul %6, %36, %cst_27 {dimension_numbers = #tpu.dot_dimension_numbers<[1], [0], [0], [1], [0, 0, 1, 1], [], []>} : vector<256x128xbf16>, vector<128x128xbf16>, vector<256x128xf32> -> vector<256x128xf32>
    %38 = arith.subf %37, %33 : vector<256x128xf32>
    %39 = arith.extf %19 : vector<256x128xbf16> to vector<256x128xf32>
    %40 = arith.truncf %38 : vector<256x128xf32> to vector<256x128xbf16>
    %cst_28 = arith.constant dense<0.000000e+00> : vector<256x128xf32>
    %41 = tpu.matmul %40, %9, %cst_28 {dimension_numbers = #tpu.dot_dimension_numbers<[1], [0], [0], [1], [0, 0, 1, 1], [], []>} : vector<256x128xbf16>, vector<128x128xbf16>, vector<256x128xf32> -> vector<256x128xf32>
    %42 = arith.addf %39, %41 : vector<256x128xf32>
    %cst_29 = arith.constant 0.000000e+00 : f32
    %43 = vector.broadcast %cst_29 : f32 to vector<256x128xf32>
    %44 = arith.maximumf %42, %43 : vector<256x128xf32>
    %45 = vector.extract_strided_slice %44 {offsets = [0, 0], sizes = [128, 128], strides = [1, 1]} : vector<256x128xf32> to vector<128x128xf32>
    %46 = vector.extract_strided_slice %44 {offsets = [128, 0], sizes = [128, 128], strides = [1, 1]} : vector<256x128xf32> to vector<128x128xf32>
    %47 = arith.addf %45, %46 : vector<128x128xf32>
    %cst_30 = arith.constant 5.000000e-01 : f32
    %48 = vector.broadcast %cst_30 : f32 to vector<128x128xf32>
    %49 = arith.mulf %48, %47 : vector<128x128xf32>
    %50 = tpu.concatenate %49, %49 in 0 : vector<128x128xf32>, vector<128x128xf32> -> vector<256x128xf32>
    %51 = arith.truncf %49 : vector<128x128xf32> to vector<128x128xbf16>
    %cst_31 = arith.constant dense<0.000000e+00> : vector<128x128xf32>
    %52 = tpu.matmul %27, %51, %cst_31 {dimension_numbers = #tpu.dot_dimension_numbers<[1], [0], [0], [1], [0, 0, 1, 1], [], []>} : vector<128x128xbf16>, vector<128x128xbf16>, vector<128x128xf32> -> vector<128x128xf32>
    %53 = arith.truncf %52 : vector<128x128xf32> to vector<128x128xbf16>
    %cst_32 = arith.constant dense<0.000000e+00> : vector<256x128xf32>
    %54 = tpu.matmul %6, %53, %cst_32 {dimension_numbers = #tpu.dot_dimension_numbers<[1], [0], [0], [1], [0, 0, 1, 1], [], []>} : vector<256x128xbf16>, vector<128x128xbf16>, vector<256x128xf32> -> vector<256x128xf32>
    %55 = arith.subf %54, %50 : vector<256x128xf32>
    %56 = arith.extf %19 : vector<256x128xbf16> to vector<256x128xf32>
    %57 = arith.truncf %55 : vector<256x128xf32> to vector<256x128xbf16>
    %cst_33 = arith.constant dense<0.000000e+00> : vector<256x128xf32>
    %58 = tpu.matmul %57, %9, %cst_33 {dimension_numbers = #tpu.dot_dimension_numbers<[1], [0], [0], [1], [0, 0, 1, 1], [], []>} : vector<256x128xbf16>, vector<128x128xbf16>, vector<256x128xf32> -> vector<256x128xf32>
    %59 = arith.addf %56, %58 : vector<256x128xf32>
    %cst_34 = arith.constant 0.000000e+00 : f32
    %60 = vector.broadcast %cst_34 : f32 to vector<256x128xf32>
    %61 = arith.maximumf %59, %60 : vector<256x128xf32>
    %62 = arith.truncf %61 : vector<256x128xf32> to vector<256x128xbf16>
    %cst_35 = arith.constant dense<0.000000e+00> : vector<128x128xf32>
    %63 = tpu.matmul %24, %62, %cst_35 {dimension_numbers = #tpu.dot_dimension_numbers<[1], [0], [0], [1], [0, 0, 1, 1], [], []>} : vector<128x256xbf16>, vector<256x128xbf16>, vector<128x128xf32> -> vector<128x128xf32>
    %cst_36 = arith.constant dense<0.000000e+00> : vector<128x128xf32>
    %64 = tpu.matmul %4, %10, %cst_36 {dimension_numbers = #tpu.dot_dimension_numbers<[1], [0], [0], [1], [0, 0, 1, 1], [], []>} : vector<128x128xbf16>, vector<128x128xbf16>, vector<128x128xf32> -> vector<128x128xf32>
    %65 = arith.truncf %63 : vector<128x128xf32> to vector<128x128xbf16>
    %cst_37 = arith.constant dense<0.000000e+00> : vector<128x128xf32>
    %66 = tpu.matmul %65, %11, %cst_37 {dimension_numbers = #tpu.dot_dimension_numbers<[1], [0], [0], [1], [0, 0, 1, 1], [], []>} : vector<128x128xbf16>, vector<128x128xbf16>, vector<128x128xf32> -> vector<128x128xf32>
    %67 = arith.addf %64, %66 : vector<128x128xf32>
    %c0_38 = arith.constant 0 : index
    %c0_39 = arith.constant 0 : index
    %68 = vector.load %arg10[%c0_38, %c0_39] : memref<1x128xf32, #tpu.memory_space<vmem>>, vector<1x128xf32>
    %69 = vector.broadcast %68 : vector<1x128xf32> to vector<128x128xf32>
    %70 = arith.addf %67, %69 : vector<128x128xf32>
    %cst_40 = arith.constant 0.000000e+00 : f32
    %71 = vector.broadcast %cst_40 : f32 to vector<128x128xf32>
    %72 = arith.maximumf %70, %71 : vector<128x128xf32>
    %c1_i32_41 = arith.constant 1 : i32
    %73 = tpu.memref_slice %arg18[%c1_i32_41] : memref<2x!tpu.dma_semaphore, #tpu.memory_space<semaphore_mem>> -> memref<1x!tpu.dma_semaphore, #tpu.memory_space<semaphore_mem>>
    %74 = tpu.memref_squeeze %73 : memref<1x!tpu.dma_semaphore, #tpu.memory_space<semaphore_mem>> -> memref<!tpu.dma_semaphore, #tpu.memory_space<semaphore_mem>>
    tpu.wait_dma2 semaphore(%74 : memref<!tpu.dma_semaphore, #tpu.memory_space<semaphore_mem>>) src(%arg4 : memref<8x128xbf16, #tpu.memory_space<any>>) dst(%arg17 : memref<8x128xbf16, #tpu.memory_space<vmem>>)
    %c0_42 = arith.constant 0 : index
    %c0_43 = arith.constant 0 : index
    %75 = vector.load %arg17[%c0_42, %c0_43] : memref<8x128xbf16, #tpu.memory_space<vmem>>, vector<8x128xbf16>
    %76 = arith.truncf %72 : vector<128x128xf32> to vector<128x128xbf16>
    %cst_44 = arith.constant dense<0.000000e+00> : vector<8x128xf32>
    %77 = tpu.matmul %75, %76, %cst_44 {dimension_numbers = #tpu.dot_dimension_numbers<[1], [0], [0], [1], [0, 0, 1, 1], [], []>} : vector<8x128xbf16>, vector<128x128xbf16>, vector<8x128xf32> -> vector<8x128xf32>
    %cst_45 = arith.constant 0.00999999977 : f32
    %78 = vector.broadcast %cst_45 : f32 to vector<8x128xf32>
    %79 = arith.mulf %77, %78 : vector<8x128xf32>
    %80 = arith.truncf %79 : vector<8x128xf32> to vector<8x128xbf16>
    %cst_46 = arith.constant dense<0.000000e+00> : vector<8x128xf32>
    %81 = tpu.matmul %80, %12, %cst_46 {dimension_numbers = #tpu.dot_dimension_numbers<[1], [0], [0], [1], [0, 0, 1, 1], [], []>} : vector<8x128xbf16>, vector<128x128xbf16>, vector<8x128xf32> -> vector<8x128xf32>
    %c0_47 = arith.constant 0 : index
    %c0_48 = arith.constant 0 : index
    %82 = vector.load %arg12[%c0_47, %c0_48] : memref<1x128xf32, #tpu.memory_space<vmem>>, vector<1x128xf32>
    %83 = vector.broadcast %82 : vector<1x128xf32> to vector<8x128xf32>
    %84 = arith.addf %81, %83 : vector<8x128xf32>
    %cst_49 = arith.constant 0.000000e+00 : f32
    %85 = vector.broadcast %cst_49 : f32 to vector<8x128xf32>
    %86 = arith.maximumf %84, %85 : vector<8x128xf32>
    %87 = arith.truncf %86 : vector<8x128xf32> to vector<8x128xbf16>
    %cst_50 = arith.constant dense<0.000000e+00> : vector<8x128xf32>
    %88 = tpu.matmul %87, %13, %cst_50 {dimension_numbers = #tpu.dot_dimension_numbers<[1], [0], [0], [1], [0, 0, 1, 1], [], []>} : vector<8x128xbf16>, vector<128x128xbf16>, vector<8x128xf32> -> vector<8x128xf32>
    %c0_51 = arith.constant 0 : index
    %c0_52 = arith.constant 0 : index
    %89 = vector.load %arg14[%c0_51, %c0_52] : memref<1x128xf32, #tpu.memory_space<vmem>>, vector<1x128xf32>
    %90 = vector.broadcast %89 : vector<1x128xf32> to vector<8x128xf32>
    %91 = arith.addf %88, %90 : vector<8x128xf32>
    %c0_53 = arith.constant 0 : index
    %c0_54 = arith.constant 0 : index
    %92 = vector.load %arg15[%c0_53, %c0_54] : memref<8x128xf32, #tpu.memory_space<vmem>>, vector<8x128xf32>
    tpu.vector_store %arg15[%c0_53, %c0_54], %91 {strides = array<i32>} : memref<8x128xf32, #tpu.memory_space<vmem>>, vector<8x128xf32>,
    return
  }
}

</mosaic_0001>

<bundles_post_ra>
// kernel: tpu_custom_call.1
= control target key start
LH: loop header
LB: loop body
LE: loop exit
PB: predicated region body
PF: predicated region fallthrough
CT: control target
= control target key end

     0   :  { %20 = vsyncpa [#allocation6], 0  ;;  %s4830_s0 = inlined_call_operand.hbm [shape: bf16[128,128], index: 0, kind: input, shape index: {}]   ;;  %s4831_s1 = inlined_call_operand.hbm [shape: bf16[256,128], index: 1, kind: input, shape index: {}]   ;;  %s4832_s2 = inlined_call_operand.hbm [shape: bf16[256,128], index: 2, kind: input, shape index: {}]   ;;  %s4833_s3 = inlined_call_operand.hbm [shape: bf16[128,256], index: 3, kind: input, shape index: {}]   ;;  %s4834_s4 = inlined_call_operand.hbm [shape: bf16[8,128], index: 4, kind: input, shape index: {}]   ;;  %s4835_s5 = inlined_call_operand.hbm [shape: bf16[128,128], index: 5, kind: input, shape index: {}]   ;;  %s4836_s6 = inlined_call_operand.hbm [shape: bf16[128,128], index: 6, kind: input, shape index: {}]   ;;  %s4837_s7 = inlined_call_operand.hbm [shape: bf16[128,128], index: 7, kind: input, shape index: {}]   ;;  %s4838_s8 = inlined_call_operand.hbm [shape: bf16[128,128], index: 8, kind: input, shape index: {}]   ;;  %s4839_s9 = inlined_call_operand.hbm [shape: bf16[128,128], index: 9, kind: input, shape index: {}]   ;;  %s4840_s10 = inlined_call_operand.vmem [shape: f32[1,128], index: 10, kind: input, shape index: {}]   ;;  %s4841_s11 = inlined_call_operand.hbm [shape: bf16[128,128], index: 11, kind: input, shape index: {}]   ;;  %s4842_s12 = inlined_call_operand.vmem [shape: f32[1,128], index: 12, kind: input, shape index: {}]   ;;  %s4843_s13 = inlined_call_operand.hbm [shape: bf16[128,128], index: 13, kind: input, shape index: {}]   ;;  %s4844_s14 = inlined_call_operand.vmem [shape: f32[1,128], index: 14, kind: input, shape index: {}]   ;;  %s4845_s15 = inlined_call_operand.hbm [shape: f32[8,128], index: 15, kind: output, shape index: {}]  }
   0x1   :  { %21 = vsyncpa [#allocation9], 0 }
   0x2   :  { %22 = vsyncpa [#allocation12], 0 }
   0x3   :  { %23 = vsyncpa [#allocation15], 0 }
   0x4   :  { %24 = vsyncpa [#allocation18], 0 }
   0x5   :  { %25 = vsyncpa [#allocation21], 0 }
   0x6   :  { %26 = vsyncpa [#allocation7], 0  ;;  %s44_s20 = sshll.u32 %s4831_s1, 4  ;;  %s3557_s21 = smov [#allocation8]   ;;  %s45_s20 = int_to_ptr.hbm [resolvable:$true] %s44_s20 }
   0x7   :  { %s46_s22 = sshll.u32 %s3557_s21, 4  ;;  %s70_s25 = sshll.u32 %s4835_s5, 4  ;;  %s47_s22 = int_to_ptr.vmem [resolvable:$true] %s46_s22  ;;  %s71_s25 = int_to_ptr.hbm [resolvable:$true] %s70_s25 }
   0x8   :  { %s3558_s26 = smov 64   ;;  %s3559_s27 = smov 4  }
   0x9   :  { %52 = dma.hbm_to_vmem [thread:$0]  %s45_s20, 2048, %s47_s22, [#allocation9], %s3558_s26, %s3558_s26, %s3559_s27  }
   0xa   :  { %s3560_s28 = smov [#allocation11]   ;;  %s96_s1 = sshll.u32 %s4837_s7, 4  ;;  %s97_s1 = int_to_ptr.hbm [resolvable:$true] %s96_s1 }
   0xb   :  { %s72_s29 = sshll.u32 %s3560_s28, 4  ;;  %s122_s18 = sshll.u32 %s4839_s9, 4  ;;  %s73_s29 = int_to_ptr.vmem [resolvable:$true] %s72_s29  ;;  %s123_s18 = int_to_ptr.hbm [resolvable:$true] %s122_s18 }
   0xc   :  { %78 = dma.hbm_to_vmem [thread:$0]  %s71_s25, 1024, %s73_s29, [#allocation12], %s3558_s26, %s3558_s26, %s3559_s27  }
   0xd   :  { %s3561_s19 = smov [#allocation14]   ;;  %s3562_s20 = smov [#allocation17]  }
   0xe   :  { %s98_s21 = sshll.u32 %s3561_s19, 4  ;;  %s124_s7 = sshll.u32 %s3562_s20, 4  ;;  %s99_s21 = int_to_ptr.vmem [resolvable:$true] %s98_s21  ;;  %s125_s7 = int_to_ptr.vmem [resolvable:$true] %s124_s7 }
   0xf   :  { %104 = dma.hbm_to_vmem [thread:$0]  %s97_s1, 1024, %s99_s21, [#allocation15], %s3558_s26, %s3558_s26, %s3559_s27  }
  0x10   :  { %s31_s24 = sshll.u32 %s4830_s0, 4  ;;  %s57_s28 = sshll.u32 %s4832_s2, 4  ;;  %s32_s24 = int_to_ptr.hbm [resolvable:$true] %s31_s24  ;;  %s58_s28 = int_to_ptr.hbm [resolvable:$true] %s57_s28 }
  0x11   :  { %130 = dma.hbm_to_vmem [thread:$0]  %s123_s18, 1024, %s125_s7, [#allocation18], %s3558_s26, %s3558_s26, %s3559_s27  }
  0x12   :  { %s3563_s29 = smov [#allocation5]   ;;  %s3564_s16 = smov [#allocation10]  }
  0x13   :  { %s33_s30 = sshll.u32 %s3563_s29, 4  ;;  %s59_s0 = sshll.u32 %s3564_s16, 4  ;;  %s34_s30 = int_to_ptr.vmem [resolvable:$true] %s33_s30  ;;  %s60_s0 = int_to_ptr.vmem [resolvable:$true] %s59_s0 }
  0x14   :  { %39 = dma.hbm_to_vmem [thread:$0]  %s32_s24, 1024, %s34_s30, [#allocation6], %s3558_s26, %s3558_s26, %s3559_s27  }
  0x15   :  { %s83_s17 = sshll.u32 %s4836_s6, 4  ;;  %s109_s19 = sshll.u32 %s4838_s8, 4  ;;  %s84_s17 = int_to_ptr.hbm [resolvable:$true] %s83_s17  ;;  %s110_s19 = int_to_ptr.hbm [resolvable:$true] %s109_s19 }
  0x16   :  { %65 = dma.hbm_to_vmem [thread:$0]  %s58_s28, 2048, %s60_s0, [#allocation9], %s3558_s26, %s3558_s26, %s3559_s27  }
  0x17   :  { %s3565_s21 = smov [#allocation13]   ;;  %s3566_s7 = smov [#allocation16]  }
  0x18   :  { %s85_s20 = sshll.u32 %s3565_s21, 4  ;;  %s111_s6 = sshll.u32 %s3566_s7, 4  ;;  %s86_s20 = int_to_ptr.vmem [resolvable:$true] %s85_s20  ;;  %s112_s6 = int_to_ptr.vmem [resolvable:$true] %s111_s6 }
  0x19   :  { %91 = dma.hbm_to_vmem [thread:$0]  %s84_s17, 1024, %s86_s20, [#allocation12], %s3558_s26, %s3558_s26, %s3559_s27  }
  0x1a   :  { %s137_s24 = sshll.u32 %s4841_s11, 4  ;;  %s152_s25 = sshll.u32 %s4843_s13, 4  ;;  %s138_s24 = int_to_ptr.hbm [resolvable:$true] %s137_s24  ;;  %s153_s25 = int_to_ptr.hbm [resolvable:$true] %s152_s25 }
  0x1b   :  { %117 = dma.hbm_to_vmem [thread:$0]  %s110_s19, 1024, %s112_s6, [#allocation15], %s3558_s26, %s3558_s26, %s3559_s27  }
  0x1c   :  { %s3567_s28 = smov [#allocation19]   ;;  %s3568_s30 = smov [#allocation20]  }
  0x1d   :  { %s139_s29 = sshll.u32 %s3567_s28, 4  ;;  %s154_s11 = sshll.u32 %s3568_s30, 4  ;;  %s140_s29 = int_to_ptr.vmem [resolvable:$true] %s139_s29  ;;  %s155_s11 = int_to_ptr.vmem [resolvable:$true] %s154_s11 }
  0x1e   :  { %145 = dma.hbm_to_vmem [thread:$0]  %s138_s24, 1024, %s140_s29, [#allocation18], %s3558_s26, %s3558_s26, %s3559_s27  }
  0x1f   :  { %160 = dma.hbm_to_vmem [thread:$0]  %s153_s25, 1024, %s155_s11, [#allocation21], %s3558_s26, %s3558_s26, %s3559_s27  }
  0x20   :  { %3539 = dma.done.wait [#allocation6], 1024  }
  0x21   :  { %3540 = vsyncadd [#allocation6], 4294966272 }
  0x22   :  { %3541 = dma.done.wait [#allocation9], 4096  }
  0x23   :  { %3542 = vsyncadd [#allocation9], 4294963200 }
  0x24   :  { %3543 = dma.done.wait [#allocation12], 2048  }
  0x25   :  { %3544 = vsyncadd [#allocation12], 4294965248 }
  0x26   :  { %3545 = dma.done.wait [#allocation15], 2048  }
  0x27   :  { %3546 = vsyncadd [#allocation15], 4294965248 }
  0x28   :  { %3547 = dma.done.wait [#allocation18], 2048  }
  0x29   :  { %3548 = vsyncadd [#allocation18], 4294965248 }
  0x2a   :  { %3549 = dma.done.wait [#allocation21], 1024  }
  0x2b   :  { %3550 = vsyncadd [#allocation21], 4294966272  ;;  %v3712_v0 = vld [vmem:[#allocation14] sm:$0xf]  ;;  %v3714_v1 = vld [vmem:[#allocation14] sm:$0xf0] }
  0x2c   :  { %4958 = vst [vmem:[#allocation38_spill] sm:$0xff] %v3712_v0  ;;  %v3716_v2 = vld [vmem:[#allocation14 + $0x8] sm:$0xf]  ;;  %v3718_v3 = vld [vmem:[#allocation14 + $0x8] sm:$0xf0]  ;;  %s210_s27 = sshll.u32 %s4833_s3, 4  ;;  %s211_s27 = int_to_ptr.hbm [resolvable:$true] %s210_s27 }
  0x2d   :  { %4959 = vst [vmem:[#allocation39_spill] sm:$0xff] %v3714_v1  ;;  %v3720_v4 = vld [vmem:[#allocation14 + $0x10] sm:$0xf]  ;;  %v3722_v5 = vld [vmem:[#allocation14 + $0x10] sm:$0xf0]  ;;  %s3569_s16 = smov [#allocation2]  }
  0x2e   :  { %4960 = vst [vmem:[#allocation40_spill] sm:$0xff] %v3716_v2  ;;  %v3724_v6 = vld [vmem:[#allocation14 + $0x18] sm:$0xf]  ;;  %v3726_v7 = vld [vmem:[#allocation14 + $0x18] sm:$0xf0]  ;;  %s212_s0 = sshll.u32 %s3569_s16, 4  ;;  %s213_s0 = int_to_ptr.vmem [resolvable:$true] %s212_s0 }
  0x2f   :  { %4961 = vst [vmem:[#allocation41_spill] sm:$0xff] %v3718_v3  ;;  %v3728_v8 = vld [vmem:[#allocation14 + $0x20] sm:$0xf]  ;;  %v3730_v9 = vld [vmem:[#allocation14 + $0x20] sm:$0xf0]  ;;  %s224_s17 = sshll.u32 %s4834_s4, 4  ;;  %s225_s17 = int_to_ptr.hbm [resolvable:$true] %s224_s17 }
  0x30   :  { %v3732_v10 = vld [vmem:[#allocation14 + $0x28] sm:$0xf]  ;;  %v3734_v11 = vld [vmem:[#allocation14 + $0x28] sm:$0xf0]  ;;  %v3736_v12 = vld [vmem:[#allocation14 + $0x30] sm:$0xf] }
  0x31   :  { %v3738_v13 = vld [vmem:[#allocation14 + $0x30] sm:$0xf0]  ;;  %v3740_v14 = vld [vmem:[#allocation14 + $0x38] sm:$0xf]  ;;  %v3742_v15 = vld [vmem:[#allocation14 + $0x38] sm:$0xf0] }
  0x32   :  { %v3744_v16 = vld [vmem:[#allocation16] sm:$0xf]  ;;  %v3746_v17 = vld [vmem:[#allocation16] sm:$0xf0]  ;;  %v3748_v18 = vld [vmem:[#allocation16 + $0x8] sm:$0xf] }
  0x33   :  { %4962 = vst [vmem:[#allocation42_spill] sm:$0xff] %v3744_v16  ;;  %v3750_v19 = vld [vmem:[#allocation16 + $0x8] sm:$0xf0]  ;;  %v3752_v20 = vld [vmem:[#allocation16 + $0x10] sm:$0xf]  ;;  %s3570_s2 = smov [#allocation3]  }
  0x34   :  { %4963 = vst [vmem:[#allocation43_spill] sm:$0xff] %v3746_v17  ;;  %v3754_v21 = vld [vmem:[#allocation16 + $0x10] sm:$0xf0]  ;;  %v3756_v22 = vld [vmem:[#allocation16 + $0x18] sm:$0xf]  ;;  %s226_s18 = sshll.u32 %s3570_s2, 4  ;;  %s227_s18 = int_to_ptr.vmem [resolvable:$true] %s226_s18 }
  0x35   :  { %4964 = vst [vmem:[#allocation44_spill] sm:$0xff] %v3748_v18  ;;  %v3758_v23 = vld [vmem:[#allocation16 + $0x18] sm:$0xf0]  ;;  %v3760_v24 = vld [vmem:[#allocation16 + $0x20] sm:$0xf] }
  0x36   :  { %4965 = vst [vmem:[#allocation45_spill] sm:$0xff] %v3750_v19  ;;  %v3762_v25 = vld [vmem:[#allocation16 + $0x20] sm:$0xf0]  ;;  %v3764_v26 = vld [vmem:[#allocation16 + $0x28] sm:$0xf] }
  0x37   :  { %4966 = vst [vmem:[#allocation46_spill] sm:$0xff] %v3752_v20  ;;  %v3766_v27 = vld [vmem:[#allocation16 + $0x28] sm:$0xf0]  ;;  %v3768_v28 = vld [vmem:[#allocation16 + $0x30] sm:$0xf]  ;;  %v3969_v20 = vld [vmem:[#allocation10 + $0x60] sm:$0xff] }
  0x38   :  { %4967 = vst [vmem:[#allocation47_spill] sm:$0xff] %v3754_v21  ;;  %v3770_v29 = vld [vmem:[#allocation16 + $0x30] sm:$0xf0]  ;;  %v3772_v30 = vld [vmem:[#allocation16 + $0x38] sm:$0xf] }
  0x39   :  { %4968 = vst [vmem:[#allocation48_spill] sm:$0xff] %v3756_v22  ;;  %v3774_v31 = vld [vmem:[#allocation16 + $0x38] sm:$0xf0]  ;;  %v3776_v32 = vld [vmem:[#allocation17] sm:$0xf]  ;;  %v3995_v22 = vld [vmem:[#allocation10 + $0x70] sm:$0xff] }
  0x3a   :  { %4969 = vst [vmem:[#allocation49_spill] sm:$0xff] %v3758_v23  ;;  %v3778_v33 = vld [vmem:[#allocation17] sm:$0xf0]  ;;  %v3780_v34 = vld [vmem:[#allocation17 + $0x8] sm:$0xf] }
  0x3b   :  { %4970 = vst [vmem:[#allocation50_spill] sm:$0xff] %v3760_v24  ;;  %v3782_v35 = vld [vmem:[#allocation17 + $0x8] sm:$0xf0]  ;;  %v3784_v36 = vld [vmem:[#allocation17 + $0x10] sm:$0xf] }
  0x3c   :  { %4971 = vst [vmem:[#allocation51_spill] sm:$0xff] %v3762_v25  ;;  %v3786_v37 = vld [vmem:[#allocation17 + $0x10] sm:$0xf0]  ;;  %v3788_v38 = vld [vmem:[#allocation17 + $0x18] sm:$0xf] }
  0x3d   :  { %4972 = vst [vmem:[#allocation52_spill] sm:$0xff] %v3764_v26  ;;  %v3790_v39 = vld [vmem:[#allocation17 + $0x18] sm:$0xf0]  ;;  %v3792_v40 = vld [vmem:[#allocation17 + $0x20] sm:$0xf] }
  0x3e   :  { %4973 = vst [vmem:[#allocation53_spill] sm:$0xff] %v3766_v27  ;;  %v3794_v41 = vld [vmem:[#allocation17 + $0x20] sm:$0xf0]  ;;  %v3796_v42 = vld [vmem:[#allocation17 + $0x28] sm:$0xf]  ;;  %v4008_v25 = vld [vmem:[#allocation10 + $0x78] sm:$0xff] }
  0x3f   :  { %4974 = vst [vmem:[#allocation54_spill] sm:$0xff] %v3768_v28  ;;  %v3798_v43 = vld [vmem:[#allocation17 + $0x28] sm:$0xf0]  ;;  %v3800_v44 = vld [vmem:[#allocation17 + $0x30] sm:$0xf] }
  0x40   :  { %4975 = vst [vmem:[#allocation55_spill] sm:$0xff] %v3770_v29  ;;  %v3802_v45 = vld [vmem:[#allocation17 + $0x30] sm:$0xf0]  ;;  %v3804_v46 = vld [vmem:[#allocation17 + $0x38] sm:$0xf] }
  0x41   :  { %4976 = vst [vmem:[#allocation56_spill] sm:$0xff] %v3772_v30  ;;  %v3806_v47 = vld [vmem:[#allocation17 + $0x38] sm:$0xf0]  ;;  %v3808_v48 = vld [vmem:[#allocation19] sm:$0xf] }
  0x42   :  { %4977 = vst [vmem:[#allocation57_spill] sm:$0xff] %v3774_v31  ;;  %v3810_v49 = vld [vmem:[#allocation19] sm:$0xf0]  ;;  %v3812_v50 = vld [vmem:[#allocation19 + $0x8] sm:$0xf] }
  0x43   :  { %4978 = vst [vmem:[#allocation58_spill] sm:$0xff] %v3776_v32  ;;  %v3814_v51 = vld [vmem:[#allocation19 + $0x8] sm:$0xf0]  ;;  %v3816_v52 = vld [vmem:[#allocation19 + $0x10] sm:$0xf] }
  0x44   :  { %4979 = vst [vmem:[#allocation59_spill] sm:$0xff] %v3778_v33  ;;  %v3818_v53 = vld [vmem:[#allocation19 + $0x10] sm:$0xf0]  ;;  %v3820_v54 = vld [vmem:[#allocation19 + $0x18] sm:$0xf] }
  0x45   :  { %4980 = vst [vmem:[#allocation60_spill] sm:$0xff] %v3780_v34  ;;  %v3822_v55 = vld [vmem:[#allocation19 + $0x18] sm:$0xf0]  ;;  %v3824_v56 = vld [vmem:[#allocation19 + $0x20] sm:$0xf] }
  0x46   :  { %4981 = vst [vmem:[#allocation61_spill] sm:$0xff] %v3782_v35  ;;  %v3826_v57 = vld [vmem:[#allocation19 + $0x20] sm:$0xf0]  ;;  %v3828_v58 = vld [vmem:[#allocation19 + $0x28] sm:$0xf]  ;;  %v3151_v35 = vld [vmem:[#allocation13 + $0x30] sm:$0xff] }
  0x47   :  { %4982 = vst [vmem:[#allocation62_spill] sm:$0xff] %v3784_v36  ;;  %v3830_v59 = vld [vmem:[#allocation19 + $0x28] sm:$0xf0]  ;;  %v3832_v60 = vld [vmem:[#allocation19 + $0x30] sm:$0xf] }
  0x48   :  { %4983 = vst [vmem:[#allocation63_spill] sm:$0xff] %v3786_v37  ;;  %v3834_v61 = vld [vmem:[#allocation19 + $0x30] sm:$0xf0]  ;;  %v3836_v62 = vld [vmem:[#allocation19 + $0x38] sm:$0xf]  ;;  %v3930_v36 = vld [vmem:[#allocation10 + $0x48] sm:$0xff] }
  0x49   :  { %4984 = vst [vmem:[#allocation64_spill] sm:$0xff] %v3788_v38  ;;  %v3838_v63 = vld [vmem:[#allocation19 + $0x38] sm:$0xf0]  ;;  %215 = dma.hbm_to_vmem [thread:$0]  %s211_s27, 2048, %s213_s0, [#allocation4] }
  0x4a   :  { %4985 = vst [vmem:[#allocation65_spill] sm:$0xff] %v3790_v39  ;;  %v3116_v39 = vld [vmem:[#allocation8 + $0x58] sm:$0xff]  ;;  %229 = dma.hbm_to_vmem [thread:$0]  %s225_s17, 64, %s227_s18, [#allocation4 + $0x1] }
  0x4b   :  { %4986 = vst [vmem:[#allocation66_spill] sm:$0xff] %v3792_v40 }
  0x4c   :  { %4987 = vst [vmem:[#allocation67_spill] sm:$0xff] %v3794_v41  ;;  %v3943_v41 = vld [vmem:[#allocation10 + $0x50] sm:$0xff] }
  0x4d   :  { %4988 = vst [vmem:[#allocation68_spill] sm:$0xff] %v3796_v42  ;;  %v3956_v42 = vld [vmem:[#allocation10 + $0x58] sm:$0xff] }
  0x4e   :  { %4989 = vst [vmem:[#allocation69_spill] sm:$0xff] %v3798_v43 }
  0x4f   :  { %4990 = vst [vmem:[#allocation70_spill] sm:$0xff] %v3800_v44 }
  0x50   :  { %4991 = vst [vmem:[#allocation71_spill] sm:$0xff] %v3802_v45 }
  0x51   :  { %4992 = vst [vmem:[#allocation72_spill] sm:$0xff] %v3804_v46 }
  0x52   :  { %4993 = vst [vmem:[#allocation73_spill] sm:$0xff] %v3806_v47  ;;  %v3982_v47 = vld [vmem:[#allocation10 + $0x68] sm:$0xff] }
  0x53   :  { %4994 = vst [vmem:[#allocation74_spill] sm:$0xff] %v3808_v48  ;;  %v3842_v48 = vld [vmem:[#allocation20] sm:$0xf0] }
  0x54   :  { %4995 = vst [vmem:[#allocation75_spill] sm:$0xff] %v3810_v49  ;;  %v3840_v49 = vld [vmem:[#allocation20] sm:$0xf] }
  0x55   :  { %4996 = vst [vmem:[#allocation76_spill] sm:$0xff] %v3812_v50  ;;  %v3846_v50 = vld [vmem:[#allocation20 + $0x8] sm:$0xf0] }
  0x56   :  { %4997 = vst [vmem:[#allocation77_spill] sm:$0xff] %v3814_v51  ;;  %v3844_v51 = vld [vmem:[#allocation20 + $0x8] sm:$0xf] }
  0x57   :  { %4998 = vst [vmem:[#allocation78_spill] sm:$0xff] %v3816_v52  ;;  %v3850_v52 = vld [vmem:[#allocation20 + $0x10] sm:$0xf0] }
  0x58   :  { %4999 = vst [vmem:[#allocation79_spill] sm:$0xff] %v3818_v53  ;;  %v3848_v53 = vld [vmem:[#allocation20 + $0x10] sm:$0xf] }
  0x59   :  { %5000 = vst [vmem:[#allocation80_spill] sm:$0xff] %v3820_v54  ;;  %v3854_v54 = vld [vmem:[#allocation20 + $0x18] sm:$0xf0] }
  0x5a   :  { %5001 = vst [vmem:[#allocation81_spill] sm:$0xff] %v3822_v55  ;;  %v3852_v55 = vld [vmem:[#allocation20 + $0x18] sm:$0xf] }
  0x5b   :  { %5002 = vst [vmem:[#allocation82_spill] sm:$0xff] %v3824_v56  ;;  %v3858_v56 = vld [vmem:[#allocation20 + $0x20] sm:$0xf0] }
  0x5c   :  { %5003 = vst [vmem:[#allocation83_spill] sm:$0xff] %v3826_v57  ;;  %v3856_v57 = vld [vmem:[#allocation20 + $0x20] sm:$0xf] }
  0x5d   :  { %5004 = vst [vmem:[#allocation84_spill] sm:$0xff] %v3828_v58 }
  0x5e   :  { %5005 = vst [vmem:[#allocation85_spill] sm:$0xff] %v3830_v59  ;;  %v3860_v59 = vld [vmem:[#allocation20 + $0x28] sm:$0xf] }
  0x5f   :  { %5006 = vst [vmem:[#allocation86_spill] sm:$0xff] %v3832_v60 }
  0x60   :  { %5007 = vst [vmem:[#allocation87_spill] sm:$0xff] %v3834_v61 }
  0x61   :  { %5008 = vst [vmem:[#allocation88_spill] sm:$0xff] %v3836_v62 }
  0x62   :  { %5009 = vst [vmem:[#allocation89_spill] sm:$0xff] %v3838_v63 }
  0x63   :  { %5010 = vst [vmem:[#allocation90_spill] sm:$0xff] %v3840_v49  ;;  %v3862_v49 = vld [vmem:[#allocation20 + $0x28] sm:$0xf0] }
  0x64   :  { %5011 = vst [vmem:[#allocation91_spill] sm:$0xff] %v3842_v48  ;;  %v3864_v48 = vld [vmem:[#allocation20 + $0x30] sm:$0xf] }
  0x65   :  { %5012 = vst [vmem:[#allocation92_spill] sm:$0xff] %v3844_v51  ;;  %v3866_v51 = vld [vmem:[#allocation20 + $0x30] sm:$0xf0] }
  0x66   :  { %5013 = vst [vmem:[#allocation93_spill] sm:$0xff] %v3846_v50  ;;  %v3868_v50 = vld [vmem:[#allocation20 + $0x38] sm:$0xf] }
  0x67   :  { %5014 = vst [vmem:[#allocation94_spill] sm:$0xff] %v3848_v53  ;;  %v3870_v53 = vld [vmem:[#allocation20 + $0x38] sm:$0xf0] }
  0x68   :  { %5015 = vst [vmem:[#allocation95_spill] sm:$0xff] %v3850_v52  ;;  %v3144_v52 = vld [vmem:[#allocation11 + $0x38] sm:$0xff] }
  0x69   :  { %5016 = vst [vmem:[#allocation96_spill] sm:$0xff] %v3852_v55  ;;  %518 = vmatpush.bf16.msra.mxu0 %v3144_v52  ;;  %v3143_v55 = vld [vmem:[#allocation11 + $0x30] sm:$0xff] }
  0x6a   :  { %5017 = vst [vmem:[#allocation97_spill] sm:$0xff] %v3854_v54  ;;  %v3142_v54 = vld [vmem:[#allocation11 + $0x28] sm:$0xff]  ;;  %v3878_v52 = vld [vmem:[#allocation5 + $0x10] sm:$0xff] }
  0x6b   :  { %5018 = vst [vmem:[#allocation98_spill] sm:$0xff] %v3856_v57  ;;  %v3141_v57 = vld [vmem:[#allocation11 + $0x20] sm:$0xff] }
  0x6c   :  { %5019 = vst [vmem:[#allocation99_spill] sm:$0xff] %v3858_v56  ;;  %v3140_v56 = vld [vmem:[#allocation11 + $0x18] sm:$0xff] }
  0x6d   :  { %5020 = vst [vmem:[#allocation100_spill] sm:$0xff] %v3860_v59  ;;  %519 = vmatpush.bf16.msra.mxu0 %v3143_v55  ;;  %v3139_v59 = vld [vmem:[#allocation11 + $0x10] sm:$0xff]  ;;  %v3884_v55 = vld [vmem:[#allocation5 + $0x20] sm:$0xff] }
  0x6e   :  { %5021 = vst [vmem:[#allocation101_spill] sm:$0xff] %v3862_v49  ;;  %v3138_v49 = vld [vmem:[#allocation11 + $0x8] sm:$0xff] }
  0x6f   :  { %5022 = vst [vmem:[#allocation102_spill] sm:$0xff] %v3864_v48  ;;  %v3137_v48 = vld [vmem:[#allocation11] sm:$0xff] }
  0x70   :  { %5023 = vst [vmem:[#allocation103_spill] sm:$0xff] %v3866_v51  ;;  %v3872_v51 = vld [vmem:[#allocation5] sm:$0xff] }
  0x71   :  { %5024 = vst [vmem:[#allocation104_spill] sm:$0xff] %v3868_v50  ;;  %520 = vmatpush.bf16.msra.mxu0 %v3142_v54  ;;  %v3881_v54 = vld [vmem:[#allocation5 + $0x18] sm:$0xff] }
  0x72   :  { %5025 = vst [vmem:[#allocation105_spill] sm:$0xff] %v3870_v53  ;;  %v3875_v53 = vld [vmem:[#allocation5 + $0x8] sm:$0xff] }
  0x73   :  { %5026 = vst [vmem:[#allocation106_spill] sm:$0xff] %v3872_v51 }
  0x74   :  { %5027 = vst [vmem:[#allocation107_spill] sm:$0xff] %v3875_v53 }
  0x75   :  { %521 = vmatpush.bf16.msra.mxu0 %v3141_v57  ;;  %5028 = vst [vmem:[#allocation108_spill] sm:$0xff] %v3878_v52 }
  0x76   :  { %5029 = vst [vmem:[#allocation109_spill] sm:$0xff] %v3881_v54 }
  0x77   :  { %5030 = vst [vmem:[#allocation110_spill] sm:$0xff] %v3884_v55 }
  0x78   :  { %5037 = vst [vmem:[#allocation117_spill] sm:$0xff] %v3930_v36 }
  0x79   :  { %522 = vmatpush.bf16.msra.mxu0 %v3140_v56  ;;  %v3893_v56 = vld [vmem:[#allocation5 + $0x38] sm:$0xff]  ;;  %5039 = vst [vmem:[#allocation119_spill] sm:$0xff] %v3943_v41 }
  0x7a   :  { %5033 = vst [vmem:[#allocation113_spill] sm:$0xff] %v3893_v56 }
  0x7b   :  { %5041 = vst [vmem:[#allocation121_spill] sm:$0xff] %v3956_v42 }
  0x7c   :  { %5044 = vst [vmem:[#allocation124_spill] sm:$0xff] %v3969_v20 }
  0x7d   :  { %523 = vmatpush.bf16.msra.mxu0 %v3139_v59  ;;  %5047 = vst [vmem:[#allocation127_spill] sm:$0xff] %v3982_v47 }
  0x7e   :  { %5050 = vst [vmem:[#allocation130_spill] sm:$0xff] %v3995_v22 }
  0x7f   :  { %5053 = vst [vmem:[#allocation133_spill] sm:$0xff] %v4008_v25 }
  0x81   :  { %524 = vmatpush.bf16.msra.mxu0 %v3138_v49  ;;  %v3887_v49 = vld [vmem:[#allocation5 + $0x28] sm:$0xff] }
  0x82   :  { %5031 = vst [vmem:[#allocation111_spill] sm:$0xff] %v3887_v49 }
  0x85   :  { %525 = vmatpush.bf16.msra.mxu0 %v3137_v48  ;;  %v3890_v48 = vld [vmem:[#allocation5 + $0x30] sm:$0xff] }
  0x86   :  { %5032 = vst [vmem:[#allocation112_spill] sm:$0xff] %v3890_v48 }
  0x88   :  { %526 = vmatmul.bf16.vlgmr.msra.gmra.mxu0 %v3872_v51 }
  0x98   :  { %531 = vmatmul.bf16.gmra.mxu0 %v3875_v53 }
  0xa8   :  { %536 = vmatmul.bf16.gmra.mxu0 %v3878_v52 }
  0xb8   :  { %541 = vmatmul.bf16.gmra.mxu0 %v3881_v54 }
  0xc8   :  { %546 = vmatmul.bf16.gmra.mxu0 %v3884_v55 }
  0xd8   :  { %551 = vmatmul.bf16.gmra.mxu0 %v3887_v49 }
  0xe8   :  { %556 = vmatmul.bf16.gmra.mxu0 %v3890_v48  ;;  %v3152_v48 = vld [vmem:[#allocation13 + $0x38] sm:$0xff] }
  0xe9   :  { %719 = vmatpush.bf16.msra.mxu1 %v3152_v48 }
  0xed   :  { %720 = vmatpush.bf16.msra.mxu1 %v3151_v35 }
  0xf8   :  { %561 = vmatmul.bf16.gmra.mxu0 %v3893_v56  ;;  %v3150_v56 = vld [vmem:[#allocation13 + $0x28] sm:$0xff] }
  0xf9   :  { %721 = vmatpush.bf16.msra.mxu1 %v3150_v56 }
 0x105   :  { %v527_v57 = vpop.f32.mrf.mxu0 }
 0x10d   :  { %v529_v59 = vpop.f32.mrf.mxu0 }
 0x10e   :  { %v567_v50 = vpack.c.bf16 %v529_v59, %v527_v57  ;;  %v3149_v57 = vld [vmem:[#allocation13 + $0x20] sm:$0xff] }
 0x10f   :  { %722 = vmatpush.bf16.msra.mxu1 %v3149_v57  ;;  %v3105_v59 = vld [vmem:[#allocation8] sm:$0xff]  ;;  %v3106_v57 = vld [vmem:[#allocation8 + $0x8] sm:$0xff] }
 0x115   :  { %v532_v58 = vpop.f32.mrf.mxu0 }
 0x11d   :  { %v534_v61 = vpop.f32.mrf.mxu0 }
 0x11e   :  { %v568_v60 = vpack.c.bf16 %v534_v61, %v532_v58  ;;  %v3148_v58 = vld [vmem:[#allocation13 + $0x18] sm:$0xff] }
 0x11f   :  { %723 = vmatpush.bf16.msra.mxu1 %v3148_v58  ;;  %v3107_v58 = vld [vmem:[#allocation8 + $0x10] sm:$0xff] }
 0x125   :  { %v537_v63 = vpop.f32.mrf.mxu0 }
 0x12d   :  { %v539_v62 = vpop.f32.mrf.mxu0 }
 0x12e   :  { %v569_v55 = vpack.c.bf16 %v539_v62, %v537_v63  ;;  %v3147_v62 = vld [vmem:[#allocation13 + $0x10] sm:$0xff]  ;;  %v3146_v63 = vld [vmem:[#allocation13 + $0x8] sm:$0xff] }
 0x12f   :  { %724 = vmatpush.bf16.msra.mxu1 %v3147_v62  ;;  %v3896_v62 = vld [vmem:[#allocation10] sm:$0xff] }
 0x133   :  { %725 = vmatpush.bf16.msra.mxu1 %v3146_v63  ;;  %v3899_v63 = vld [vmem:[#allocation10 + $0x8] sm:$0xff] }
 0x135   :  { %v542_v54 = vpop.f32.mrf.mxu0 }
 0x13d   :  { %v544_v52 = vpop.f32.mrf.mxu0 }
 0x13e   :  { %v570_v49 = vpack.c.bf16 %v544_v52, %v542_v54  ;;  %v3145_v54 = vld [vmem:[#allocation13] sm:$0xff] }
 0x13f   :  { %726 = vmatpush.bf16.msra.mxu1 %v3145_v54 }
 0x142   :  { %727 = vmatmul.bf16.vlgmr.msra.gmra.mxu1 %v3105_v59  ;;  %v3917_v59 = vld [vmem:[#allocation10 + $0x38] sm:$0xff] }
 0x143   :  { %5034 = vst [vmem:[#allocation114_spill] sm:$0xff] %v3917_v59 }
 0x145   :  { %v547_v33 = vpop.f32.mrf.mxu0 }
 0x14d   :  { %v549_v32 = vpop.f32.mrf.mxu0 }
 0x14e   :  { %v571_v16 = vpack.c.bf16 %v549_v32, %v547_v33  ;;  %v3902_v32 = vld [vmem:[#allocation10 + $0x10] sm:$0xff]  ;;  %v3905_v33 = vld [vmem:[#allocation10 + $0x18] sm:$0xff] }
 0x152   :  { %732 = vmatmul.bf16.gmra.mxu1 %v3106_v57  ;;  %v3920_v57 = vld [vmem:[#allocation10 + $0x40] sm:$0xff] }
 0x153   :  { %5035 = vst [vmem:[#allocation115_spill] sm:$0xff] %v3920_v57 }
 0x155   :  { %v552_v53 = vpop.f32.mrf.mxu0 }
 0x15d   :  { %v554_v51 = vpop.f32.mrf.mxu0 }
 0x15e   :  { %v572_v56 = vpack.c.bf16 %v554_v51, %v552_v53  ;;  %v3908_v51 = vld [vmem:[#allocation10 + $0x20] sm:$0xff]  ;;  %v3112_v53 = vld [vmem:[#allocation8 + $0x38] sm:$0xff] }
 0x162   :  { %737 = vmatmul.bf16.gmra.mxu1 %v3107_v58  ;;  %v3115_v58 = vld [vmem:[#allocation8 + $0x50] sm:$0xff] }
 0x165   :  { %v557_v34 = vpop.f32.mrf.mxu0 }
 0x16d   :  { %v559_v61 = vpop.f32.mrf.mxu0 }
 0x16e   :  { %v573_v35 = vpack.c.bf16 %v559_v61, %v557_v34  ;;  %v3109_v34 = vld [vmem:[#allocation8 + $0x20] sm:$0xff]  ;;  %v3914_v61 = vld [vmem:[#allocation10 + $0x30] sm:$0xff] }
 0x175   :  { %v562_v52 = vpop.f32.mrf.mxu0 }
 0x17d   :  { %v564_v17 = vpop.f32.mrf.mxu0 }
 0x17e   :  { %v574_v48 = vpack.c.bf16 %v564_v17, %v562_v52  ;;  %v3108_v17 = vld [vmem:[#allocation8 + $0x18] sm:$0xff] }
 0x17f   :  { %742 = vmatmul.bf16.gmra.mxu1 %v3108_v17 }
 0x180   :  { %904 = vmatpush.bf16.msra.mxu2 %v574_v48  ;;  %v3114_v48 = vld [vmem:[#allocation8 + $0x48] sm:$0xff] }
 0x184   :  { %905 = vmatpush.bf16.msra.mxu2 %v573_v35 }
 0x188   :  { %906 = vmatpush.bf16.msra.mxu2 %v572_v56 }
 0x18c   :  { %907 = vmatpush.bf16.msra.mxu2 %v571_v16  ;;  %v3110_v16 = vld [vmem:[#allocation8 + $0x28] sm:$0xff] }
 0x18f   :  { %747 = vmatmul.bf16.gmra.mxu1 %v3109_v34 }
 0x190   :  { %908 = vmatpush.bf16.msra.mxu2 %v570_v49 }
 0x194   :  { %909 = vmatpush.bf16.msra.mxu2 %v569_v55  ;;  %v3113_v55 = vld [vmem:[#allocation8 + $0x40] sm:$0xff] }
 0x198   :  { %910 = vmatpush.bf16.msra.mxu2 %v568_v60  ;;  %v3911_v60 = vld [vmem:[#allocation10 + $0x28] sm:$0xff] }
 0x19c   :  { %911 = vmatpush.bf16.msra.mxu2 %v567_v50  ;;  %v3111_v50 = vld [vmem:[#allocation8 + $0x30] sm:$0xff] }
 0x19f   :  { %912 = vmatmul.bf16.vlgmr.msra.gmra.mxu2 %v3896_v62  ;;  %752 = vmatmul.bf16.gmra.mxu1 %v3110_v16 }
 0x1af   :  { %917 = vmatmul.bf16.gmra.mxu2 %v3899_v63  ;;  %757 = vmatmul.bf16.gmra.mxu1 %v3111_v50 }
 0x1bf   :  { %922 = vmatmul.bf16.gmra.mxu2 %v3902_v32  ;;  %762 = vmatmul.bf16.gmra.mxu1 %v3112_v53  ;;  %v728_v49 = vpop.f32.mrf.mxu1 }
 0x1c7   :  { %v730_v52 = vpop.f32.mrf.mxu1 }
 0x1cf   :  { %927 = vmatmul.bf16.gmra.mxu2 %v3905_v33  ;;  %767 = vmatmul.bf16.gmra.mxu1 %v3113_v55  ;;  %v733_v54 = vpop.f32.mrf.mxu1 }
 0x1d7   :  { %v735_v35 = vpop.f32.mrf.mxu1 }
 0x1df   :  { %932 = vmatmul.bf16.gmra.mxu2 %v3908_v51  ;;  %772 = vmatmul.bf16.gmra.mxu1 %v3114_v48  ;;  %v738_v56 = vpop.f32.mrf.mxu1 }
 0x1e7   :  { %v740_v34 = vpop.f32.mrf.mxu1 }
 0x1ef   :  { %937 = vmatmul.bf16.gmra.mxu2 %v3911_v60  ;;  %777 = vmatmul.bf16.gmra.mxu1 %v3115_v58  ;;  %v3117_v58 = vld [vmem:[#allocation8 + $0x60] sm:$0xff] }
 0x1fc   :  { %v743_v48 = vpop.f32.mrf.mxu1 }
 0x1ff   :  { %942 = vmatmul.bf16.gmra.mxu2 %v3914_v61  ;;  %782 = vmatmul.bf16.gmra.mxu1 %v3116_v39  ;;  %v3118_v39 = vld [vmem:[#allocation8 + $0x68] sm:$0xff] }
 0x20f   :  { %947 = vmatmul.bf16.gmra.mxu2 %v3917_v59  ;;  %787 = vmatmul.bf16.gmra.mxu1 %v3117_v58  ;;  %v3119_v58 = vld [vmem:[#allocation8 + $0x70] sm:$0xff] }
 0x21f   :  { %952 = vmatmul.bf16.gmra.mxu2 %v3920_v57  ;;  %792 = vmatmul.bf16.gmra.mxu1 %v3118_v39  ;;  %v3120_v39 = vld [vmem:[#allocation8 + $0x78] sm:$0xff] }
 0x222   :  { %v913_v17 = vpop.f32.mrf.mxu2 }
 0x223   :  { %v3923_v16 = vadd.f32 %v913_v17, %v728_v49  ;;  %v745_v17 = vpop.f32.mrf.mxu1 }
 0x22a   :  { %v915_v55 = vpop.f32.mrf.mxu2 }
 0x22b   :  { %v3928_v37 = vadd.f32 %v915_v55, %v730_v52  ;;  %v748_v19 = vpop.f32.mrf.mxu1 }
 0x22d   :  { %5036 = vst [vmem:[#allocation116_spill] sm:$0xff] %v3928_v37 }
 0x22f   :  { %957 = vmatmul.bf16.gmra.mxu2 %v3930_v36  ;;  %797 = vmatmul.bf16.gmra.mxu1 %v3119_v58 }
 0x232   :  { %v918_v49 = vpop.f32.mrf.mxu2 }
 0x233   :  { %v3936_v50 = vadd.f32 %v918_v49, %v733_v54  ;;  %v750_v49 = vpop.f32.mrf.mxu1 }
 0x23a   :  { %v920_v55 = vpop.f32.mrf.mxu2 }
 0x23b   :  { %v3941_v18 = vadd.f32 %v920_v55, %v735_v35  ;;  %v753_v40 = vpop.f32.mrf.mxu1 }
 0x23d   :  { %5038 = vst [vmem:[#allocation118_spill] sm:$0xff] %v3941_v18 }
 0x23f   :  { %962 = vmatmul.bf16.gmra.mxu2 %v3943_v41  ;;  %802 = vmatmul.bf16.gmra.mxu1 %v3120_v39 }
 0x242   :  { %v923_v54 = vpop.f32.mrf.mxu2 }
 0x243   :  { %v3949_v53 = vadd.f32 %v923_v54, %v738_v56  ;;  %v755_v54 = vpop.f32.mrf.mxu1 }
 0x24a   :  { %v925_v55 = vpop.f32.mrf.mxu2 }
 0x24b   :  { %v3954_v43 = vadd.f32 %v925_v55, %v740_v34  ;;  %v758_v45 = vpop.f32.mrf.mxu1 }
 0x24d   :  { %5040 = vst [vmem:[#allocation120_spill] sm:$0xff] %v3954_v43 }
 0x24f   :  { %967 = vmatmul.bf16.gmra.mxu2 %v3956_v42 }
 0x252   :  { %v928_v56 = vpop.f32.mrf.mxu2 }
 0x253   :  { %v3962_v52 = vadd.f32 %v928_v56, %v743_v48 }
 0x255   :  { %5042 = vst [vmem:[#allocation122_spill] sm:$0xff] %v3962_v52 }
 0x25a   :  { %v930_v55 = vpop.f32.mrf.mxu2 }
 0x25b   :  { %v3967_v21 = vadd.f32 %v930_v55, %v745_v17  ;;  %v760_v55 = vpop.f32.mrf.mxu1 }
 0x25d   :  { %5043 = vst [vmem:[#allocation123_spill] sm:$0xff] %v3967_v21 }
 0x25f   :  { %972 = vmatmul.bf16.gmra.mxu2 %v3969_v20 }
 0x262   :  { %v933_v48 = vpop.f32.mrf.mxu2 }
 0x263   :  { %v3975_v56 = vadd.f32 %v933_v48, %v748_v19  ;;  %v763_v19 = vpop.f32.mrf.mxu1 }
 0x265   :  { %5045 = vst [vmem:[#allocation125_spill] sm:$0xff] %v3975_v56 }
 0x26a   :  { %v935_v34 = vpop.f32.mrf.mxu2 }
 0x26b   :  { %v3980_v44 = vadd.f32 %v935_v34, %v750_v49  ;;  %v765_v46 = vpop.f32.mrf.mxu1 }
 0x26d   :  { %5046 = vst [vmem:[#allocation126_spill] sm:$0xff] %v3980_v44 }
 0x26f   :  { %977 = vmatmul.bf16.gmra.mxu2 %v3982_v47 }
 0x272   :  { %v938_v48 = vpop.f32.mrf.mxu2 }
 0x273   :  { %v3988_v35 = vadd.f32 %v938_v48, %v753_v40  ;;  %v768_v38 = vpop.f32.mrf.mxu1 }
 0x275   :  { %5048 = vst [vmem:[#allocation128_spill] sm:$0xff] %v3988_v35 }
 0x27a   :  { %v940_v34 = vpop.f32.mrf.mxu2 }
 0x27b   :  { %v3993_v23 = vadd.f32 %v940_v34, %v755_v54  ;;  %v770_v24 = vpop.f32.mrf.mxu1 }
 0x27d   :  { %5049 = vst [vmem:[#allocation129_spill] sm:$0xff] %v3993_v23 }
 0x27f   :  { %982 = vmatmul.bf16.gmra.mxu2 %v3995_v22 }
 0x282   :  { %v943_v40 = vpop.f32.mrf.mxu2 }
 0x283   :  { %v4001_v48 = vadd.f32 %v943_v40, %v758_v45 }
 0x285   :  { %5051 = vst [vmem:[#allocation131_spill] sm:$0xff] %v4001_v48  ;;  %v5072_v0 = vmax.f32 %v4001_v48, 0.0 }
 0x28a   :  { %v945_v54 = vpop.f32.mrf.mxu2 }
 0x28b   :  { %v4006_v34 = vadd.f32 %v945_v54, %v760_v55  ;;  %v773_v55 = vpop.f32.mrf.mxu1 }
 0x28d   :  { %5052 = vst [vmem:[#allocation132_spill] sm:$0xff] %v4006_v34 }
 0x28f   :  { %987 = vmatmul.bf16.gmra.mxu2 %v4008_v25 }
 0x292   :  { %v948_v45 = vpop.f32.mrf.mxu2 }
 0x293   :  { %v4014_v40 = vadd.f32 %v948_v45, %v763_v19 }
 0x295   :  { %5054 = vst [vmem:[#allocation134_spill] sm:$0xff] %v4014_v40 }
 0x29a   :  { %v950_v54 = vpop.f32.mrf.mxu2 }
 0x29b   :  { %v4022_v39 = vadd.f32 %v950_v54, %v765_v46  ;;  %v775_v46 = vpop.f32.mrf.mxu1 }
 0x29d   :  { %5055 = vst [vmem:[#allocation135_spill] sm:$0xff] %v4022_v39 }
 0x2a2   :  { %v953_v17 = vpop.f32.mrf.mxu2 }
 0x2a3   :  { %v4030_v54 = vadd.f32 %v953_v17, %v768_v38  ;;  %v778_v27 = vpop.f32.mrf.mxu1 }
 0x2aa   :  { %v955_v49 = vpop.f32.mrf.mxu2 }
 0x2ab   :  { %v4035_v45 = vadd.f32 %v955_v49, %v770_v24  ;;  %v780_v58 = vpop.f32.mrf.mxu1 }
 0x2ad   :  { %5056 = vst [vmem:[#allocation136_spill] sm:$0xff] %v4035_v45 }
 0x2b2   :  { %v958_v28 = vpop.f32.mrf.mxu2 }
 0x2b3   :  { %v4040_v31 = vadd.f32 %v958_v28, %v773_v55  ;;  %v783_v26 = vpop.f32.mrf.mxu1 }
 0x2ba   :  { %v960_v30 = vpop.f32.mrf.mxu2 }
 0x2bb   :  { %v4045_v19 = vadd.f32 %v960_v30, %v775_v46  ;;  %v785_v17 = vpop.f32.mrf.mxu1 }
 0x2bd   :  { %5057 = vst [vmem:[#allocation137_spill] sm:$0xff] %v4045_v19 }
 0x2c2   :  { %v963_v25 = vpop.f32.mrf.mxu2 }
 0x2c3   :  { %v4050_v29 = vadd.f32 %v963_v25, %v778_v27  ;;  %v788_v47 = vpop.f32.mrf.mxu1 }
 0x2c5   :  { %5058 = vst [vmem:[#allocation138_spill] sm:$0xff] %v4050_v29 }
 0x2ca   :  { %v965_v38 = vpop.f32.mrf.mxu2 }
 0x2cb   :  { %v4055_v22 = vadd.f32 %v965_v38, %v780_v58  ;;  %v790_v30 = vpop.f32.mrf.mxu1 }
 0x2cd   :  { %5059 = vst [vmem:[#allocation139_spill] sm:$0xff] %v4055_v22 }
 0x2d2   :  { %v968_v24 = vpop.f32.mrf.mxu2 }
 0x2d3   :  { %v4060_v49 = vadd.f32 %v968_v24, %v783_v26  ;;  %v793_v25 = vpop.f32.mrf.mxu1 }
 0x2d5   :  { %5060 = vst [vmem:[#allocation140_spill] sm:$0xff] %v4060_v49 }
 0x2da   :  { %v970_v28 = vpop.f32.mrf.mxu2 }
 0x2db   :  { %v4065_v55 = vadd.f32 %v970_v28, %v785_v17  ;;  %v795_v58 = vpop.f32.mrf.mxu1 }
 0x2dd   :  { %5061 = vst [vmem:[#allocation141_spill] sm:$0xff] %v4065_v55 }
 0x2e2   :  { %v973_v20 = vpop.f32.mrf.mxu2 }
 0x2e3   :  { %v4070_v46 = vadd.f32 %v973_v20, %v788_v47  ;;  %v798_v36 = vpop.f32.mrf.mxu1 }
 0x2e5   :  { %5062 = vst [vmem:[#allocation142_spill] sm:$0xff] %v4070_v46  ;;  %v1049_v24 = vmax.f32 %v4070_v46, 0.0 }
 0x2ea   :  { %v975_v42 = vpop.f32.mrf.mxu2 }
 0x2eb   :  { %v4075_v27 = vadd.f32 %v975_v42, %v790_v30  ;;  %v800_v20 = vpop.f32.mrf.mxu1 }
 0x2ed   :  { %5063 = vst [vmem:[#allocation143_spill] sm:$0xff] %v4075_v27  ;;  %v1050_v28 = vmax.f32 %v4075_v27, 0.0 }
 0x2f2   :  { %v978_v38 = vpop.f32.mrf.mxu2 }
 0x2f3   :  { %v4080_v41 = vadd.f32 %v978_v38, %v793_v25  ;;  %v803_v42 = vpop.f32.mrf.mxu1 }
 0x2f5   :  { %5064 = vst [vmem:[#allocation144_spill] sm:$0xff] %v4080_v41  ;;  %v1051_v47 = vmax.f32 %v4080_v41, 0.0 }
 0x2fa   :  { %v980_v26 = vpop.f32.mrf.mxu2 }
 0x2fb   :  { %v4085_v46 = vadd.f32 %v980_v26, %v795_v58  ;;  %v805_v25 = vpop.f32.mrf.mxu1  ;;  %v5070_v58 = vmax.f32 %v4014_v40, 0.0 }
 0x2fd   :  { %5065 = vst [vmem:[#allocation145_spill] sm:$0xff] %v4085_v46  ;;  %v1052_v30 = vmax.f32 %v4085_v46, 0.0 }
 0x302   :  { %v983_v17 = vpop.f32.mrf.mxu2 }
 0x303   :  { %v4090_v27 = vadd.f32 %v983_v17, %v798_v36 }
 0x305   :  { %5066 = vst [vmem:[#allocation146_spill] sm:$0xff] %v4090_v27  ;;  %v1053_v38 = vmax.f32 %v4090_v27, 0.0 }
 0x307   :  { %v1193_v36 = vadd.f32 %v1053_v38, %v5072_v0 }
 0x30a   :  { %v985_v57 = vpop.f32.mrf.mxu2 }
 0x30b   :  { %v4095_v41 = vadd.f32 %v985_v57, %v800_v20 }
 0x30d   :  { %5067 = vst [vmem:[#allocation147_spill] sm:$0xff] %v4095_v41  ;;  %v1054_v26 = vmax.f32 %v4095_v41, 0.0 }
 0x312   :  { %v988_v59 = vpop.f32.mrf.mxu2 }
 0x313   :  { %v4100_v46 = vadd.f32 %v988_v59, %v803_v42  ;;  %v5071_v59 = vmax.f32 %v4022_v39, 0.0 }
 0x315   :  { %5068 = vst [vmem:[#allocation148_spill] sm:$0xff] %v4100_v46  ;;  %v1055_v17 = vmax.f32 %v4100_v46, 0.0  ;;  %v5073_v46 = vmax.f32 %v4006_v34, 0.0 }
 0x317   :  { %v1195_v41 = vadd.f32 %v1055_v17, %v5070_v58  ;;  %v1194_v3 = vadd.f32 %v1054_v26, %v5073_v46 }
 0x31a   :  { %v990_v27 = vpop.f32.mrf.mxu2 }
 0x31b   :  { %v4105_v1 = vadd.f32 %v990_v27, %v805_v25 }
 0x31d   :  { %5069 = vst [vmem:[#allocation149_spill] sm:$0xff] %v4105_v1  ;;  %v1056_v20 = vmax.f32 %v4105_v1, 0.0 }
 0x31f   :  { %v1196_v42 = vadd.f32 %v1056_v20, %v5071_v59 }
 0x320   :  { %3551 = dma.done.wait [#allocation4], 2048 }
 0x321   :  { %3552 = vsyncadd [#allocation4], 4294965248  ;;  %v5074_v27 = vmax.f32 %v3988_v35, 0.0  ;;  %v5075_v57 = vmax.f32 %v3993_v23, 0.0  ;;  %v4122_v2 = vmul.f32 0.5, %v1195_v41  ;;  %v4124_v58 = vmul.f32 0.5, %v1196_v42 }
 0x322   :  { %v4126_v17 = vmul.f32 0.5, %v1193_v36  ;;  %v4128_v20 = vmul.f32 0.5, %v1194_v3  ;;  %v5076_v46 = vmax.f32 %v3975_v56, 0.0  ;;  %v5077_v26 = vmax.f32 %v3980_v44, 0.0 }
 0x323   :  { %v1191_v25 = vadd.f32 %v1051_v47, %v5074_v27  ;;  %v1192_v1 = vadd.f32 %v1052_v30, %v5075_v57  ;;  %v1220_v0 = vpack.c.bf16 %v4124_v58, %v4122_v2  ;;  %v5080_v27 = vmax.f32 %v3967_v21, 0.0 }
 0x324   :  { %v1189_v38 = vadd.f32 %v1049_v24, %v5076_v46  ;;  %v1190_v47 = vadd.f32 %v1050_v28, %v5077_v26  ;;  %v1219_v41 = vpack.c.bf16 %v4128_v20, %v4126_v17  ;;  %v5078_v24 = vmax.f32 %v3962_v52, 0.0 }
 0x325   :  { %1221 = vmatpush.bf16.msra.mxu3 %v1220_v0  ;;  %v4138_v30 = vmul.f32 0.5, %v1191_v25  ;;  %v4140_v57 = vmul.f32 0.5, %v1192_v1  ;;  %v5079_v28 = vmax.f32 %v4060_v49, 0.0  ;;  %v5081_v25 = vmax.f32 %v4065_v55, 0.0 }
 0x326   :  { %v4142_v36 = vmul.f32 0.5, %v1189_v38  ;;  %v4144_v3 = vmul.f32 0.5, %v1190_v47  ;;  %v5082_v26 = vmax.f32 %v3949_v53, 0.0  ;;  %v5083_v47 = vmax.f32 %v4050_v29, 0.0 }
 0x327   :  { %v1218_v59 = vpack.c.bf16 %v4140_v57, %v4138_v30  ;;  %v1187_v42 = vadd.f32 %v5079_v28, %v5078_v24  ;;  %v1188_v0 = vadd.f32 %v5081_v25, %v5080_v27  ;;  %v5084_v24 = vmax.f32 %v3954_v43, 0.0 }
 0x328   :  { %v1217_v1 = vpack.c.bf16 %v4144_v3, %v4142_v36  ;;  %v5085_v28 = vmax.f32 %v4055_v22, 0.0  ;;  %v5086_v27 = vmax.f32 %v3936_v50, 0.0  ;;  %v5087_v25 = vmax.f32 %v4040_v31, 0.0  ;;  %v1061_v22 = vld [vmem:[#allocation2] sm:$0xff] }
 0x329   :  { %1222 = vmatpush.bf16.msra.mxu3 %v1219_v41  ;;  %v4158_v46 = vmul.f32 0.5, %v1187_v42  ;;  %v4160_v38 = vmul.f32 0.5, %v1188_v0  ;;  %v1185_v41 = vadd.f32 %v5083_v47, %v5082_v26  ;;  %v5088_v26 = vmax.f32 %v3941_v18, 0.0 }
 0x32a   :  { %v1186_v21 = vadd.f32 %v5085_v28, %v5084_v24  ;;  %v1183_v55 = vadd.f32 %v5087_v25, %v5086_v27  ;;  %v5089_v47 = vmax.f32 %v4045_v19, 0.0  ;;  %v1062_v24 = vld [vmem:[#allocation2 + $0x8] sm:$0xff]  ;;  %v5090_v28 = vmax.f32 %v3923_v16, 0.0 }
 0x32b   :  { %v4176_v42 = vmul.f32 0.5, %v1185_v41  ;;  %v5091_v44 = vmax.f32 %v4030_v54, 0.0  ;;  %v1110_v25 = vrot.slane %v1062_v24, 4  ;;  %v5092_v18 = vmax.f32 %v3928_v37, 0.0 }
 0x32c   :  { %v4178_v0 = vmul.f32 0.5, %v1186_v21  ;;  %v1184_v43 = vadd.f32 %v5089_v47, %v5088_v26  ;;  %v4190_v21 = vmul.f32 0.5, %v1183_v55  ;;  %v5093_v26 = vmax.f32 %v4035_v45, 0.0 }
 0x32d   :  { %1223 = vmatpush.bf16.msra.mxu3 %v1218_v59  ;;  %v1216_v59 = vpack.c.bf16 %v4160_v38, %v4158_v46  ;;  %v1181_v27 = vadd.f32 %v5091_v44, %v5090_v28  ;;  %v1077_v19 = vunpack.c.l.bf16 %v1061_v22  ;;  %v1078_v23 = vunpack.c.l.bf16 %v1062_v24 }
 0x32e   :  { %v1215_v41 = vpack.c.bf16 %v4178_v0, %v4176_v42  ;;  %v4192_v35 = vmul.f32 0.5, %v1184_v43  ;;  %v1182_v47 = vadd.f32 %v5093_v26, %v5092_v18  ;;  %v1142_v39 = vunpack.c.l.bf16 %v1110_v25  ;;  %v1063_v18 = vld [vmem:[#allocation2 + $0x10] sm:$0xff] }
 0x32f   :  { %v1111_v24 = vrot.slane %v1063_v18, 4  ;;  %v1079_v25 = vunpack.c.l.bf16 %v1063_v18 }
 0x330   :  { %v1214_v44 = vpack.c.bf16 %v4192_v35, %v4190_v21  ;;  %v4202_v28 = vmul.f32 0.5, %v1182_v47  ;;  %v1158_v43 = vadd.f32 %v1142_v39, %v1078_v23  ;;  %v1065_v39 = vld [vmem:[#allocation2 + $0x20] sm:$0xff] }
 0x331   :  { %1224 = vmatpush.bf16.msra.mxu3 %v1217_v1  ;;  %v1109_v1 = vrot.slane %v1061_v22, 4  ;;  %v1064_v22 = vld [vmem:[#allocation2 + $0x18] sm:$0xff] }
 0x333   :  { %v1141_v48 = vunpack.c.l.bf16 %v1109_v1  ;;  %v1112_v1 = vrot.slane %v1064_v22, 4 }
 0x335   :  { %1225 = vmatpush.bf16.msra.mxu3 %v1216_v59  ;;  %v4200_v59 = vmul.f32 0.5, %v1181_v27  ;;  %v1157_v55 = vadd.f32 %v1141_v48, %v1077_v19  ;;  %v1080_v27 = vunpack.c.l.bf16 %v1064_v22  ;;  %v1144_v26 = vunpack.c.l.bf16 %v1112_v1  ;;  %v1066_v19 = vld [vmem:[#allocation2 + $0x28] sm:$0xff]  ;;  %v1067_v22 = vld [vmem:[#allocation2 + $0x30] sm:$0xff] }
 0x336   :  { %v1115_v1 = vrot.slane %v1067_v22, 4 }
 0x337   :  { %v1213_v37 = vpack.c.bf16 %v4202_v28, %v4200_v59  ;;  %v4206_v45 = vpack.c.bf16 %v1158_v43, %v1157_v55  ;;  %v1160_v48 = vadd.f32 %v1144_v26, %v1080_v27  ;;  %v1081_v55 = vunpack.c.l.bf16 %v1065_v39 }
 0x338   :  { %v1082_v43 = vunpack.c.l.bf16 %v1066_v19  ;;  %v1083_v27 = vunpack.c.l.bf16 %v1067_v22  ;;  %v1147_v26 = vunpack.c.l.bf16 %v1115_v1  ;;  %v1072_v1 = vld [vmem:[#allocation2 + $0x58] sm:$0xff] }
 0x339   :  { %1226 = vmatpush.bf16.msra.mxu3 %v1215_v41  ;;  %5094 = vst [vmem:[#allocation150_spill] sm:$0xff] %v4206_v45  ;;  %v1143_v41 = vunpack.c.l.bf16 %v1111_v24  ;;  %v1068_v24 = vld [vmem:[#allocation2 + $0x38] sm:$0xff] }
 0x33b   :  { %v1159_v47 = vadd.f32 %v1143_v41, %v1079_v25  ;;  %v1116_v25 = vrot.slane %v1068_v24, 4  ;;  %v1084_v41 = vunpack.c.l.bf16 %v1068_v24  ;;  %v1071_v24 = vld [vmem:[#allocation2 + $0x50] sm:$0xff] }
 0x33d   :  { %1227 = vmatpush.bf16.msra.mxu3 %v1214_v44  ;;  %v4209_v23 = vpack.c.bf16 %v1160_v48, %v1159_v47  ;;  %v1113_v44 = vrot.slane %v1065_v39, 4  ;;  %v1148_v47 = vunpack.c.l.bf16 %v1116_v25  ;;  %v1163_v48 = vadd.f32 %v1147_v26, %v1083_v27 }
 0x33e   :  { %v1120_v25 = vrot.slane %v1072_v1, 4  ;;  %v1087_v27 = vunpack.c.l.bf16 %v1071_v24 }
 0x33f   :  { %5095 = vst [vmem:[#allocation151_spill] sm:$0xff] %v4209_v23  ;;  %v1145_v34 = vunpack.c.l.bf16 %v1113_v44  ;;  %v1070_v44 = vld [vmem:[#allocation2 + $0x48] sm:$0xff] }
 0x341   :  { %1228 = vmatpush.bf16.msra.mxu3 %v1213_v37  ;;  %v1114_v37 = vrot.slane %v1066_v19, 4  ;;  %v1161_v40 = vadd.f32 %v1145_v34, %v1081_v55  ;;  %v1069_v19 = vld [vmem:[#allocation2 + $0x40] sm:$0xff]  ;;  %v1118_v34 = vrot.slane %v1070_v44, 4 }
 0x343   :  { %v1150_v55 = vunpack.c.l.bf16 %v1118_v34 }
 0x344   :  { %1229 = vmatmul.bf16.vlgmr.msra.gmra.mxu3 %v4206_v45  ;;  %v1146_v45 = vunpack.c.l.bf16 %v1114_v37 }
 0x346   :  { %v1162_v56 = vadd.f32 %v1146_v45, %v1082_v43  ;;  %v1086_v45 = vunpack.c.l.bf16 %v1070_v44  ;;  %v1073_v44 = vld [vmem:[#allocation2 + $0x60] sm:$0xff] }
 0x348   :  { %v4212_v18 = vpack.c.bf16 %v1162_v56, %v1161_v40  ;;  %v1117_v56 = vrot.slane %v1069_v19, 4  ;;  %v1085_v40 = vunpack.c.l.bf16 %v1069_v19 }
 0x34a   :  { %5096 = vst [vmem:[#allocation152_spill] sm:$0xff] %v4212_v18  ;;  %v1149_v37 = vunpack.c.l.bf16 %v1117_v56  ;;  %v1074_v56 = vld [vmem:[#allocation2 + $0x68] sm:$0xff] }
 0x34b   :  { %v1122_v34 = vrot.slane %v1074_v56, 4 }
 0x34c   :  { %v1165_v43 = vadd.f32 %v1149_v37, %v1085_v40  ;;  %v1089_v40 = vunpack.c.l.bf16 %v1073_v44 }
 0x354   :  { %1234 = vmatmul.bf16.gmra.mxu3 %v4209_v23  ;;  %v1164_v23 = vadd.f32 %v1148_v47, %v1084_v41  ;;  %v1088_v41 = vunpack.c.l.bf16 %v1072_v1  ;;  %v1152_v47 = vunpack.c.l.bf16 %v1120_v25  ;;  %v1075_v1 = vld [vmem:[#allocation2 + $0x70] sm:$0xff] }
 0x356   :  { %v4215_v39 = vpack.c.bf16 %v1164_v23, %v1163_v48  ;;  %v1119_v23 = vrot.slane %v1071_v24, 4 }
 0x358   :  { %5097 = vst [vmem:[#allocation153_spill] sm:$0xff] %v4215_v39  ;;  %v1151_v26 = vunpack.c.l.bf16 %v1119_v23  ;;  %v1076_v23 = vld [vmem:[#allocation2 + $0x78] sm:$0xff] }
 0x359   :  { %v1124_v25 = vrot.slane %v1076_v23, 4 }
 0x35a   :  { %v1167_v48 = vadd.f32 %v1151_v26, %v1087_v27  ;;  %v1091_v27 = vunpack.c.l.bf16 %v1075_v1 }
 0x364   :  { %1239 = vmatmul.bf16.gmra.mxu3 %v4212_v18  ;;  %v1166_v18 = vadd.f32 %v1150_v55, %v1086_v45  ;;  %v1090_v45 = vunpack.c.l.bf16 %v1074_v56  ;;  %v1154_v55 = vunpack.c.l.bf16 %v1122_v34 }
 0x366   :  { %v4218_v22 = vpack.c.bf16 %v1166_v18, %v1165_v43  ;;  %v1121_v18 = vrot.slane %v1073_v44, 4 }
 0x368   :  { %5098 = vst [vmem:[#allocation154_spill] sm:$0xff] %v4218_v22  ;;  %v1153_v37 = vunpack.c.l.bf16 %v1121_v18 }
 0x36a   :  { %v1169_v43 = vadd.f32 %v1153_v37, %v1089_v40 }
 0x374   :  { %1244 = vmatmul.bf16.gmra.mxu3 %v4215_v39  ;;  %v1168_v39 = vadd.f32 %v1152_v47, %v1088_v41  ;;  %v1092_v41 = vunpack.c.l.bf16 %v1076_v23  ;;  %v1156_v47 = vunpack.c.l.bf16 %v1124_v25 }
 0x376   :  { %v4221_v19 = vpack.c.bf16 %v1168_v39, %v1167_v48  ;;  %v1123_v39 = vrot.slane %v1075_v1, 4 }
 0x378   :  { %5099 = vst [vmem:[#allocation155_spill] sm:$0xff] %v4221_v19  ;;  %v1155_v26 = vunpack.c.l.bf16 %v1123_v39 }
 0x37a   :  { %v1171_v48 = vadd.f32 %v1155_v26, %v1091_v27 }
 0x384   :  { %1249 = vmatmul.bf16.gmra.mxu3 %v4218_v22  ;;  %v1170_v22 = vadd.f32 %v1154_v55, %v1090_v45 }
 0x386   :  { %v4224_v24 = vpack.c.bf16 %v1170_v22, %v1169_v43 }
 0x388   :  { %5100 = vst [vmem:[#allocation156_spill] sm:$0xff] %v4224_v24 }
 0x394   :  { %1254 = vmatmul.bf16.gmra.mxu3 %v4221_v19  ;;  %v1172_v19 = vadd.f32 %v1156_v47, %v1092_v41 }
 0x396   :  { %v4227_v44 = vpack.c.bf16 %v1172_v19, %v1171_v48 }
 0x398   :  { %5101 = vst [vmem:[#allocation157_spill] sm:$0xff] %v4227_v44 }
 0x3a4   :  { %1259 = vmatmul.bf16.gmra.mxu3 %v4224_v24 }
 0x3b4   :  { %1264 = vmatmul.bf16.gmra.mxu3 %v4227_v44 }
 0x3c7   :  { %v1230_v56 = vpop.f32.mrf.mxu3 }
 0x3cf   :  { %v1232_v18 = vpop.f32.mrf.mxu3 }
 0x3d0   :  { %v1270_v29 = vpack.c.bf16 %v1232_v18, %v1230_v56 }
 0x3d7   :  { %v1235_v22 = vpop.f32.mrf.mxu3 }
 0x3df   :  { %v1237_v34 = vpop.f32.mrf.mxu3 }
 0x3e0   :  { %v1271_v52 = vpack.c.bf16 %v1237_v34, %v1235_v22  ;;  %v5108_v34 = vld [vmem:[#allocation117_spill] sm:$0xff] }
 0x3e7   :  { %v1240_v40 = vpop.f32.mrf.mxu3 }
 0x3ef   :  { %v1242_v45 = vpop.f32.mrf.mxu3 }
 0x3f0   :  { %v1272_v49 = vpack.c.bf16 %v1242_v45, %v1240_v40 }
 0x3f7   :  { %v1245_v37 = vpop.f32.mrf.mxu3 }
 0x3ff   :  { %v1247_v55 = vpop.f32.mrf.mxu3 }
 0x400   :  { %v1273_v44 = vpack.c.bf16 %v1247_v55, %v1245_v37 }
 0x407   :  { %v1250_v43 = vpop.f32.mrf.mxu3 }
 0x40f   :  { %v1252_v24 = vpop.f32.mrf.mxu3 }
 0x410   :  { %v1274_v48 = vpack.c.bf16 %v1252_v24, %v1250_v43  ;;  %v2902_v24 = vor.u32 %v3742_v15, %v3740_v14  ;;  %v2886_v14 = vor.u32 %v3726_v7, %v3724_v6  ;;  %v5106_v6 = vld [vmem:[#allocation114_spill] sm:$0xff] }
 0x412   :  { %1495 = vmatpush.bf16.msrb.mxu3 %v2902_v24 }
 0x417   :  { %v1255_v1 = vpop.f32.mrf.mxu3 }
 0x41f   :  { %v1257_v23 = vpop.f32.mrf.mxu3 }
 0x420   :  { %v1275_v47 = vpack.c.bf16 %v1257_v23, %v1255_v1  ;;  %v5109_v1 = vld [vmem:[#allocation119_spill] sm:$0xff] }
 0x427   :  { %v1260_v39 = vpop.f32.mrf.mxu3 }
 0x42f   :  { %v1262_v25 = vpop.f32.mrf.mxu3 }
 0x430   :  { %v1276_v26 = vpack.c.bf16 %v1262_v25, %v1260_v39 }
 0x437   :  { %v1265_v27 = vpop.f32.mrf.mxu3 }
 0x43f   :  { %v1267_v41 = vpop.f32.mrf.mxu3 }
 0x440   :  { %v1277_v19 = vpack.c.bf16 %v1267_v41, %v1265_v27 }
 0x442   :  { %1278 = vmatpush.bf16.msrb.mxu0 %v1277_v19  ;;  %v5110_v19 = vld [vmem:[#allocation121_spill] sm:$0xff] }
 0x446   :  { %1279 = vmatpush.bf16.msrb.mxu0 %v1276_v26 }
 0x44a   :  { %1280 = vmatpush.bf16.msrb.mxu0 %v1275_v47 }
 0x44e   :  { %1281 = vmatpush.bf16.msrb.mxu0 %v1274_v48 }
 0x452   :  { %1282 = vmatpush.bf16.msrb.mxu0 %v1273_v44  ;;  %v5107_v44 = vld [vmem:[#allocation115_spill] sm:$0xff] }
 0x456   :  { %1283 = vmatpush.bf16.msrb.mxu0 %v1272_v49  ;;  %v2898_v49 = vor.u32 %v3738_v13, %v3736_v12  ;;  %v2882_v12 = vor.u32 %v3722_v5, %v3720_v4 }
 0x458   :  { %1496 = vmatpush.bf16.msrb.mxu3 %v2898_v49 }
 0x45a   :  { %1284 = vmatpush.bf16.msrb.mxu0 %v1271_v52  ;;  %v2890_v52 = vor.u32 %v3730_v9, %v3728_v8  ;;  %v5104_v8 = vld [vmem:[#allocation38_spill] sm:$0xff]  ;;  %v5105_v9 = vld [vmem:[#allocation39_spill] sm:$0xff] }
 0x45b   :  { %v2874_v15 = vor.u32 %v5105_v9, %v5104_v8 }
 0x45e   :  { %1285 = vmatpush.bf16.msrb.mxu0 %v1270_v29  ;;  %v2894_v29 = vor.u32 %v3734_v11, %v3732_v10  ;;  %v5102_v10 = vld [vmem:[#allocation40_spill] sm:$0xff]  ;;  %v5103_v11 = vld [vmem:[#allocation41_spill] sm:$0xff] }
 0x45f   :  { %v2878_v13 = vor.u32 %v5103_v11, %v5102_v10 }
 0x460   :  { %1497 = vmatpush.bf16.msrb.mxu3 %v2894_v29 }
 0x461   :  { %1286 = vmatmul.bf16.vlgmr.msrb.gmra.mxu0 %v3896_v62 }
 0x462   :  { %1882 = vmatpush.bf16.msra.mxu0 %v2902_v24 }
 0x464   :  { %1498 = vmatpush.bf16.msrb.mxu3 %v2890_v52 }
 0x466   :  { %1883 = vmatpush.bf16.msra.mxu0 %v2898_v49 }
 0x468   :  { %1499 = vmatpush.bf16.msrb.mxu3 %v2886_v14 }
 0x46a   :  { %1884 = vmatpush.bf16.msra.mxu0 %v2894_v29  ;;  %v5111_v29 = vld [vmem:[#allocation124_spill] sm:$0xff] }
 0x46c   :  { %1500 = vmatpush.bf16.msrb.mxu3 %v2882_v12 }
 0x46e   :  { %1885 = vmatpush.bf16.msra.mxu0 %v2890_v52 }
 0x470   :  { %1501 = vmatpush.bf16.msrb.mxu3 %v2878_v13 }
 0x471   :  { %1291 = vmatmul.bf16.gmra.mxu0 %v3899_v63 }
 0x472   :  { %1886 = vmatpush.bf16.msra.mxu0 %v2886_v14 }
 0x474   :  { %1502 = vmatpush.bf16.msrb.mxu3 %v2874_v15 }
 0x476   :  { %1887 = vmatpush.bf16.msra.mxu0 %v2882_v12 }
 0x47a   :  { %1888 = vmatpush.bf16.msra.mxu0 %v2878_v13  ;;  %v5112_v13 = vld [vmem:[#allocation127_spill] sm:$0xff] }
 0x47e   :  { %1889 = vmatpush.bf16.msra.mxu0 %v2874_v15 }
 0x481   :  { %1296 = vmatmul.bf16.gmra.mxu0 %v3902_v32 }
 0x491   :  { %1301 = vmatmul.bf16.gmra.mxu0 %v3905_v33 }
 0x4a1   :  { %1306 = vmatmul.bf16.gmra.mxu0 %v3908_v51 }
 0x4b1   :  { %1311 = vmatmul.bf16.gmra.mxu0 %v3911_v60 }
 0x4c1   :  { %1316 = vmatmul.bf16.gmra.mxu0 %v3914_v61 }
 0x4d1   :  { %1321 = vmatmul.bf16.gmra.mxu0 %v5106_v6 }
 0x4de   :  { %v1287_v7 = vpop.f32.mrf.mxu0 }
 0x4df   :  { %v1367_v5 = vsub.f32 %v1287_v7, %v4200_v59 }
 0x4e1   :  { %1326 = vmatmul.bf16.gmra.mxu0 %v5107_v44 }
 0x4e6   :  { %v1289_v4 = vpop.f32.mrf.mxu0 }
 0x4e7   :  { %v1368_v56 = vsub.f32 %v1289_v4, %v4202_v28 }
 0x4e9   :  { %v1431_v18 = vpack.c.bf16 %v1368_v56, %v1367_v5  ;;  %v5113_v5 = vld [vmem:[#allocation130_spill] sm:$0xff] }
 0x4eb   :  { %1503 = vmatmul.bf16.vlgmr.msrb.gmra.mxu3 %v1431_v18 }
 0x4ee   :  { %v1292_v22 = vpop.f32.mrf.mxu0 }
 0x4ef   :  { %v1369_v45 = vsub.f32 %v1292_v22, %v4190_v21 }
 0x4f1   :  { %1331 = vmatmul.bf16.gmra.mxu0 %v5108_v34 }
 0x4f6   :  { %v1294_v40 = vpop.f32.mrf.mxu0 }
 0x4f7   :  { %v1370_v37 = vsub.f32 %v1294_v40, %v4192_v35 }
 0x4f9   :  { %v1432_v55 = vpack.c.bf16 %v1370_v37, %v1369_v45  ;;  %v5114_v37 = vld [vmem:[#allocation133_spill] sm:$0xff] }
 0x4fb   :  { %1508 = vmatmul.bf16.gmra.mxu3 %v1432_v55 }
 0x4fe   :  { %v1297_v43 = vpop.f32.mrf.mxu0 }
 0x4ff   :  { %v1371_v39 = vsub.f32 %v1297_v43, %v4176_v42 }
 0x501   :  { %1336 = vmatmul.bf16.gmra.mxu0 %v5109_v1 }
 0x506   :  { %v1299_v23 = vpop.f32.mrf.mxu0 }
 0x507   :  { %v1372_v25 = vsub.f32 %v1299_v23, %v4178_v0 }
 0x509   :  { %v1433_v27 = vpack.c.bf16 %v1372_v25, %v1371_v39 }
 0x50b   :  { %1513 = vmatmul.bf16.gmra.mxu3 %v1433_v27 }
 0x50e   :  { %v1302_v41 = vpop.f32.mrf.mxu0 }
 0x50f   :  { %v1373_v47 = vsub.f32 %v1302_v41, %v4158_v46 }
 0x511   :  { %1341 = vmatmul.bf16.gmra.mxu0 %v5110_v19 }
 0x516   :  { %v1304_v26 = vpop.f32.mrf.mxu0 }
 0x517   :  { %v1374_v48 = vsub.f32 %v1304_v26, %v4160_v38 }
 0x519   :  { %v1434_v24 = vpack.c.bf16 %v1374_v48, %v1373_v47 }
 0x51b   :  { %1518 = vmatmul.bf16.gmra.mxu3 %v1434_v24 }
 0x51e   :  { %v1307_v49 = vpop.f32.mrf.mxu0 }
 0x51f   :  { %v1375_v14 = vsub.f32 %v1307_v49, %v4142_v36 }
 0x521   :  { %1346 = vmatmul.bf16.gmra.mxu0 %v5111_v29 }
 0x526   :  { %v1309_v52 = vpop.f32.mrf.mxu0 }
 0x527   :  { %v1376_v12 = vsub.f32 %v1309_v52, %v4144_v3 }
 0x529   :  { %v1435_v10 = vpack.c.bf16 %v1376_v12, %v1375_v14 }
 0x52b   :  { %1523 = vmatmul.bf16.gmra.mxu3 %v1435_v10 }
 0x52e   :  { %v1312_v11 = vpop.f32.mrf.mxu0 }
 0x52f   :  { %v1377_v9 = vsub.f32 %v1312_v11, %v4138_v30 }
 0x531   :  { %1351 = vmatmul.bf16.gmra.mxu0 %v5112_v13 }
 0x536   :  { %v1314_v8 = vpop.f32.mrf.mxu0 }
 0x537   :  { %v1378_v15 = vsub.f32 %v1314_v8, %v4140_v57 }
 0x539   :  { %v1436_v7 = vpack.c.bf16 %v1378_v15, %v1377_v9 }
 0x53b   :  { %1528 = vmatmul.bf16.gmra.mxu3 %v1436_v7 }
 0x53e   :  { %v1317_v4 = vpop.f32.mrf.mxu0 }
 0x53f   :  { %v1379_v18 = vsub.f32 %v1317_v4, %v4126_v17 }
 0x541   :  { %1356 = vmatmul.bf16.gmra.mxu0 %v5113_v5 }
 0x546   :  { %v1319_v56 = vpop.f32.mrf.mxu0 }
 0x547   :  { %v1380_v22 = vsub.f32 %v1319_v56, %v4128_v20 }
 0x549   :  { %v1437_v40 = vpack.c.bf16 %v1380_v22, %v1379_v18 }
 0x54b   :  { %1533 = vmatmul.bf16.gmra.mxu3 %v1437_v40 }
 0x54e   :  { %v1322_v45 = vpop.f32.mrf.mxu0 }
 0x54f   :  { %v1381_v43 = vsub.f32 %v1322_v45, %v4122_v2 }
 0x551   :  { %1361 = vmatmul.bf16.gmra.mxu0 %v5114_v37 }
 0x556   :  { %v1324_v55 = vpop.f32.mrf.mxu0 }
 0x557   :  { %v1382_v23 = vsub.f32 %v1324_v55, %v4124_v58 }
 0x559   :  { %v1438_v39 = vpack.c.bf16 %v1382_v23, %v1381_v43 }
 0x55b   :  { %1538 = vmatmul.bf16.gmra.mxu3 %v1438_v39 }
 0x55e   :  { %v1327_v25 = vpop.f32.mrf.mxu0 }
 0x55f   :  { %v1383_v41 = vsub.f32 %v1327_v25, %v4200_v59 }
 0x566   :  { %v1329_v27 = vpop.f32.mrf.mxu0 }
 0x567   :  { %v1384_v26 = vsub.f32 %v1329_v27, %v4202_v28 }
 0x569   :  { %v1439_v47 = vpack.c.bf16 %v1384_v26, %v1383_v41 }
 0x56b   :  { %1543 = vmatmul.bf16.gmra.mxu3 %v1439_v47 }
 0x56e   :  { %v1332_v48 = vpop.f32.mrf.mxu0  ;;  %v1504_v24 = vpop.f32.mrf.mxu3 }
 0x56f   :  { %v1385_v14 = vsub.f32 %v1332_v48, %v4190_v21 }
 0x576   :  { %v1334_v49 = vpop.f32.mrf.mxu0  ;;  %v4280_v52 = vpop.f32.mrf.mxu3 }
 0x577   :  { %v1386_v12 = vsub.f32 %v1334_v49, %v4192_v35 }
 0x579   :  { %v1440_v10 = vpack.c.bf16 %v1386_v12, %v1385_v14 }
 0x57b   :  { %1548 = vmatmul.bf16.gmra.mxu3 %v1440_v10 }
 0x57e   :  { %v1337_v11 = vpop.f32.mrf.mxu0  ;;  %v1509_v8 = vpop.f32.mrf.mxu3 }
 0x57f   :  { %v1387_v59 = vsub.f32 %v1337_v11, %v4176_v42 }
 0x586   :  { %v1339_v9 = vpop.f32.mrf.mxu0  ;;  %v4284_v15 = vpop.f32.mrf.mxu3 }
 0x587   :  { %v1388_v28 = vsub.f32 %v1339_v9, %v4178_v0 }
 0x589   :  { %v1441_v7 = vpack.c.bf16 %v1388_v28, %v1387_v59 }
 0x58b   :  { %1553 = vmatmul.bf16.gmra.mxu3 %v1441_v7 }
 0x58e   :  { %v1342_v4 = vpop.f32.mrf.mxu0  ;;  %v1514_v56 = vpop.f32.mrf.mxu3 }
 0x58f   :  { %v1389_v35 = vsub.f32 %v1342_v4, %v4158_v46 }
 0x596   :  { %v1344_v18 = vpop.f32.mrf.mxu0  ;;  %v4288_v22 = vpop.f32.mrf.mxu3 }
 0x597   :  { %v1390_v21 = vsub.f32 %v1344_v18, %v4160_v38 }
 0x599   :  { %v1442_v40 = vpack.c.bf16 %v1390_v21, %v1389_v35  ;;  %v5116_v35 = vpack.c.bf16 %v4030_v54, %v4030_v54  ;;  %v5119_v54 = vpack.c.bf16 %v4040_v31, %v4040_v31 }
 0x59b   :  { %1558 = vmatmul.bf16.gmra.mxu3 %v1442_v40  ;;  %v4324_v21 = vunpack.c.l.bf16 %v5116_v35  ;;  %v5126_v35 = vld [vmem:[#allocation122_spill] sm:$0xff] }
 0x59d   :  { %5117 = vst [vmem:[#allocation40_spill] sm:$0xff] %v4324_v21 }
 0x59e   :  { %v1347_v45 = vpop.f32.mrf.mxu0  ;;  %v1519_v55 = vpop.f32.mrf.mxu3 }
 0x59f   :  { %v1391_v42 = vsub.f32 %v1347_v45, %v4142_v36 }
 0x5a6   :  { %v1349_v43 = vpop.f32.mrf.mxu0  ;;  %v4292_v23 = vpop.f32.mrf.mxu3 }
 0x5a7   :  { %v1392_v0 = vsub.f32 %v1349_v43, %v4144_v3 }
 0x5a9   :  { %v1443_v39 = vpack.c.bf16 %v1392_v0, %v1391_v42 }
 0x5ab   :  { %1563 = vmatmul.bf16.gmra.mxu3 %v1443_v39 }
 0x5ae   :  { %v1352_v25 = vpop.f32.mrf.mxu0  ;;  %v4296_v27 = vpop.f32.mrf.mxu3 }
 0x5af   :  { %v1393_v38 = vsub.f32 %v1352_v25, %v4138_v30  ;;  %v4340_v25 = vunpack.c.l.bf16 %v5119_v54 }
 0x5b1   :  { %5120 = vst [vmem:[#allocation41_spill] sm:$0xff] %v4340_v25 }
 0x5b6   :  { %v1354_v41 = vpop.f32.mrf.mxu0  ;;  %v4298_v46 = vpop.f32.mrf.mxu3 }
 0x5b7   :  { %v1394_v26 = vsub.f32 %v1354_v41, %v4140_v57 }
 0x5b9   :  { %v1444_v47 = vpack.c.bf16 %v1394_v26, %v1393_v38 }
 0x5bb   :  { %1568 = vmatmul.bf16.gmra.mxu3 %v1444_v47 }
 0x5be   :  { %v1357_v48 = vpop.f32.mrf.mxu0  ;;  %v4302_v49 = vpop.f32.mrf.mxu3 }
 0x5bf   :  { %v1395_v3 = vsub.f32 %v1357_v48, %v4126_v17  ;;  %v5115_v17 = vpack.c.bf16 %v3923_v16, %v3923_v16  ;;  %v5118_v16 = vpack.c.bf16 %v3936_v50, %v3936_v50  ;;  %v5121_v50 = vpack.c.bf16 %v3949_v53, %v3949_v53 }
 0x5c0   :  { %v5127_v53 = vpack.c.bf16 %v5126_v35, %v5126_v35 }
 0x5c1   :  { %v4335_v39 = vunpack.c.l.bf16 %v5118_v16 }
 0x5c6   :  { %v1359_v36 = vpop.f32.mrf.mxu0  ;;  %v4304_v14 = vpop.f32.mrf.mxu3 }
 0x5c7   :  { %v1396_v12 = vsub.f32 %v1359_v36, %v4128_v20  ;;  %v4319_v20 = vunpack.c.l.bf16 %v5115_v17 }
 0x5c9   :  { %v1445_v10 = vpack.c.bf16 %v1396_v12, %v1395_v3  ;;  %v1584_v40 = vadd.f32 %v1504_v24, %v4319_v20  ;;  %v1586_v24 = vadd.f32 %v1509_v8, %v4335_v39  ;;  %v4351_v3 = vunpack.c.l.bf16 %v5121_v50  ;;  %v5123_v12 = vld [vmem:[#allocation138_spill] sm:$0xff] }
 0x5ca   :  { %v5124_v31 = vpack.c.bf16 %v5123_v12, %v5123_v12  ;;  %v5135_v12 = vld [vmem:[#allocation142_spill] sm:$0xff] }
 0x5cb   :  { %1573 = vmatmul.bf16.gmra.mxu3 %v1445_v10  ;;  %v1616_v45 = vmax.f32 %v1584_v40, 0.0  ;;  %v1618_v26 = vmax.f32 %v1586_v24, 0.0  ;;  %5122 = vst [vmem:[#allocation38_spill] sm:$0xff] %v4351_v3  ;;  %v1588_v8 = vadd.f32 %v1514_v56, %v4351_v3  ;;  %v4367_v40 = vunpack.c.l.bf16 %v5127_v53 }
 0x5cc   :  { %v4356_v10 = vunpack.c.l.bf16 %v5124_v31  ;;  %v5136_v31 = vpack.c.bf16 %v5135_v12, %v5135_v12 }
 0x5cd   :  { %5128 = vst [vmem:[#allocation114_spill] sm:$0xff] %v4367_v40  ;;  %v1590_v56 = vadd.f32 %v1519_v55, %v4367_v40  ;;  %v5172_v40 = vld [vmem:[#allocation143_spill] sm:$0xff] }
 0x5ce   :  { %v1362_v11 = vpop.f32.mrf.mxu0  ;;  %v4308_v9 = vpop.f32.mrf.mxu3  ;;  %5125 = vst [vmem:[#allocation39_spill] sm:$0xff] %v4356_v10 }
 0x5cf   :  { %v1397_v57 = vsub.f32 %v1362_v11, %v4122_v2  ;;  %v1622_v54 = vmax.f32 %v1590_v56, 0.0 }
 0x5d6   :  { %v1364_v30 = vpop.f32.mrf.mxu0  ;;  %v4310_v59 = vpop.f32.mrf.mxu3 }
 0x5d7   :  { %v1398_v28 = vsub.f32 %v1364_v30, %v4124_v58 }
 0x5d9   :  { %v1446_v7 = vpack.c.bf16 %v1398_v28, %v1397_v57  ;;  %v1620_v57 = vmax.f32 %v1588_v8, 0.0  ;;  %v4388_v8 = vunpack.c.l.bf16 %v5136_v31  ;;  %v5144_v31 = vld [vmem:[#allocation147_spill] sm:$0xff] }
 0x5db   :  { %1578 = vmatmul.bf16.gmra.mxu3 %v1446_v7  ;;  %5137 = vst [vmem:[#allocation119_spill] sm:$0xff] %v4388_v8 }
 0x5de   :  { %v1539_v4 = vpop.f32.mrf.mxu3 }
 0x5e6   :  { %v4314_v18 = vpop.f32.mrf.mxu3 }
 0x5ee   :  { %v1544_v2 = vpop.f32.mrf.mxu3 }
 0x5ef   :  { %v1600_v58 = vadd.f32 %v1544_v2, %v4324_v21  ;;  %v5129_v2 = vld [vmem:[#allocation140_spill] sm:$0xff] }
 0x5f1   :  { %v1632_v43 = vmax.f32 %v1600_v58, 0.0  ;;  %v5130_v58 = vpack.c.bf16 %v5129_v2, %v5129_v2 }
 0x5f3   :  { %v4328_v42 = vadd.f32 %v1632_v43, %v1616_v45  ;;  %v4372_v45 = vunpack.c.l.bf16 %v5130_v58 }
 0x5f5   :  { %5131 = vst [vmem:[#allocation115_spill] sm:$0xff] %v4372_v45 }
 0x5f6   :  { %v4330_v0 = vpop.f32.mrf.mxu3 }
 0x5fe   :  { %v1549_v41 = vpop.f32.mrf.mxu3 }
 0x5ff   :  { %v1602_v38 = vadd.f32 %v1549_v41, %v4340_v25 }
 0x601   :  { %v1634_v47 = vmax.f32 %v1602_v38, 0.0 }
 0x603   :  { %v4344_v48 = vadd.f32 %v1634_v47, %v1618_v26  ;;  %v5132_v26 = vld [vmem:[#allocation125_spill] sm:$0xff] }
 0x604   :  { %v5133_v47 = vpack.c.bf16 %v5132_v26, %v5132_v26  ;;  %v5141_v26 = vld [vmem:[#allocation134_spill] sm:$0xff] }
 0x606   :  { %v4346_v36 = vpop.f32.mrf.mxu3  ;;  %v4383_v50 = vunpack.c.l.bf16 %v5133_v47 }
 0x608   :  { %5134 = vst [vmem:[#allocation117_spill] sm:$0xff] %v4383_v50  ;;  %v1592_v55 = vadd.f32 %v4296_v27, %v4383_v50  ;;  %v5142_v27 = vpack.c.bf16 %v5141_v26, %v5141_v26  ;;  %v5162_v50 = vld [vmem:[#allocation149_spill] sm:$0xff] }
 0x60a   :  { %v4403_v47 = vunpack.c.l.bf16 %v5142_v27 }
 0x60c   :  { %5143 = vst [vmem:[#allocation124_spill] sm:$0xff] %v4403_v47 }
 0x60e   :  { %v1554_v11 = vpop.f32.mrf.mxu3 }
 0x60f   :  { %v1604_v30 = vadd.f32 %v1554_v11, %v4356_v10 }
 0x611   :  { %v1636_v28 = vmax.f32 %v1604_v30, 0.0 }
 0x613   :  { %v4360_v7 = vadd.f32 %v1636_v28, %v1620_v57  ;;  %v1624_v57 = vmax.f32 %v1592_v55, 0.0  ;;  %v5145_v55 = vpack.c.bf16 %v5144_v31, %v5144_v31  ;;  %v5156_v31 = vld [vmem:[#allocation131_spill] sm:$0xff] }
 0x616   :  { %v4362_v17 = vpop.f32.mrf.mxu3 }
 0x61e   :  { %v1559_v43 = vpop.f32.mrf.mxu3 }
 0x61f   :  { %v1606_v16 = vadd.f32 %v1559_v43, %v4372_v45  ;;  %v5153_v45 = vld [vmem:[#allocation146_spill] sm:$0xff] }
 0x620   :  { %v5154_v26 = vpack.c.bf16 %v5153_v45, %v5153_v45  ;;  %v5163_v45 = vpack.c.bf16 %v5162_v50, %v5162_v50 }
 0x621   :  { %v1638_v24 = vmax.f32 %v1606_v16, 0.0  ;;  %v5138_v16 = vld [vmem:[#allocation148_spill] sm:$0xff] }
 0x622   :  { %v4423_v27 = vunpack.c.l.bf16 %v5154_v26  ;;  %v4441_v26 = vunpack.c.l.bf16 %v5163_v45 }
 0x623   :  { %v4376_v41 = vadd.f32 %v1638_v24, %v1622_v54  ;;  %v5139_v54 = vpack.c.bf16 %v5138_v16, %v5138_v16 }
 0x624   :  { %5155 = vst [vmem:[#allocation138_spill] sm:$0xff] %v4423_v27 }
 0x625   :  { %v4398_v24 = vunpack.c.l.bf16 %v5139_v54  ;;  %5164 = vst [vmem:[#allocation125_spill] sm:$0xff] %v4441_v26 }
 0x626   :  { %v4378_v38 = vpop.f32.mrf.mxu3 }
 0x627   :  { %5140 = vst [vmem:[#allocation121_spill] sm:$0xff] %v4398_v24 }
 0x62e   :  { %v1564_v11 = vpop.f32.mrf.mxu3 }
 0x62f   :  { %v1608_v30 = vadd.f32 %v1564_v11, %v4388_v8  ;;  %v4408_v11 = vunpack.c.l.bf16 %v5145_v55  ;;  %v5150_v8 = vld [vmem:[#allocation135_spill] sm:$0xff]  ;;  %v5157_v55 = vpack.c.bf16 %v5156_v31, %v5156_v31 }
 0x630   :  { %v5151_v16 = vpack.c.bf16 %v5150_v8, %v5150_v8 }
 0x631   :  { %v1640_v28 = vmax.f32 %v1608_v30, 0.0  ;;  %5146 = vst [vmem:[#allocation127_spill] sm:$0xff] %v4408_v11  ;;  %v5147_v30 = vld [vmem:[#allocation132_spill] sm:$0xff]  ;;  %v4429_v25 = vunpack.c.l.bf16 %v5157_v55 }
 0x632   :  { %v4418_v54 = vunpack.c.l.bf16 %v5151_v16 }
 0x633   :  { %v4393_v35 = vadd.f32 %v1640_v28, %v1624_v57  ;;  %v5148_v57 = vpack.c.bf16 %v5147_v30, %v5147_v30  ;;  %5158 = vst [vmem:[#allocation122_spill] sm:$0xff] %v4429_v25  ;;  %v1598_v30 = vadd.f32 %v1539_v4, %v4403_v47 }
 0x634   :  { %5152 = vst [vmem:[#allocation133_spill] sm:$0xff] %v4418_v54  ;;  %v1599_v55 = vadd.f32 %v4314_v18, %v4418_v54  ;;  %v5173_v18 = vpack.c.bf16 %v5172_v40, %v5172_v40 }
 0x635   :  { %v4413_v28 = vunpack.c.l.bf16 %v5148_v57  ;;  %v5159_v57 = vld [vmem:[#allocation145_spill] sm:$0xff] }
 0x636   :  { %v1566_v53 = vpop.f32.mrf.mxu3  ;;  %v5160_v21 = vpack.c.bf16 %v5159_v57, %v5159_v57  ;;  %v4468_v54 = vunpack.c.l.bf16 %v5173_v18 }
 0x637   :  { %5149 = vst [vmem:[#allocation130_spill] sm:$0xff] %v4413_v28  ;;  %v1597_v4 = vadd.f32 %v4310_v59, %v4413_v28  ;;  %v1630_v59 = vmax.f32 %v1598_v30, 0.0 }
 0x638   :  { %v4435_v8 = vunpack.c.l.bf16 %v5160_v21  ;;  %v5167_v21 = vld [vmem:[#allocation144_spill] sm:$0xff]  ;;  %5174 = vst [vmem:[#allocation148_spill] sm:$0xff] %v4468_v54 }
 0x639   :  { %v5168_v57 = vpack.c.bf16 %v5167_v21, %v5167_v21  ;;  %v1629_v30 = vmax.f32 %v1597_v4, 0.0 }
 0x63a   :  { %5161 = vst [vmem:[#allocation140_spill] sm:$0xff] %v4435_v8 }
 0x63e   :  { %v1569_v2 = vpop.f32.mrf.mxu3 }
 0x646   :  { %v1571_v58 = vpop.f32.mrf.mxu3 }
 0x647   :  { %v1611_v21 = vadd.f32 %v1571_v58, %v4435_v8 }
 0x64e   :  { %v1574_v56 = vpop.f32.mrf.mxu3 }
 0x64f   :  { %v1612_v50 = vadd.f32 %v1574_v56, %v4423_v27  ;;  %v5175_v56 = vld [vmem:[#allocation126_spill] sm:$0xff]  ;;  %v1631_v27 = vmax.f32 %v1599_v55, 0.0  ;;  %v5181_v55 = vld [vmem:[#allocation123_spill] sm:$0xff] }
 0x651   :  { %v1644_v40 = vmax.f32 %v1612_v50, 0.0 }
 0x656   :  { %v1576_v43 = vpop.f32.mrf.mxu3 }
 0x657   :  { %v1613_v16 = vadd.f32 %v1576_v43, %v4408_v11  ;;  %v4455_v43 = vunpack.c.l.bf16 %v5168_v57  ;;  %v5170_v11 = vld [vmem:[#allocation128_spill] sm:$0xff] }
 0x658   :  { %v5171_v47 = vpack.c.bf16 %v5170_v11, %v5170_v11  ;;  %v5176_v11 = vpack.c.bf16 %v5175_v56, %v5175_v56 }
 0x659   :  { %5169 = vst [vmem:[#allocation142_spill] sm:$0xff] %v4455_v43  ;;  %v1645_v57 = vmax.f32 %v1613_v16, 0.0 }
 0x65e   :  { %v1579_v12 = vpop.f32.mrf.mxu3 }
 0x65f   :  { %v1614_v10 = vadd.f32 %v1579_v12, %v4398_v24  ;;  %v5165_v12 = vld [vmem:[#allocation129_spill] sm:$0xff] }
 0x660   :  { %v5166_v24 = vpack.c.bf16 %v5165_v12, %v5165_v12  ;;  %v4461_v12 = vunpack.c.l.bf16 %v5171_v47  ;;  %v4475_v47 = vunpack.c.l.bf16 %v5176_v11  ;;  %v1609_v11 = vadd.f32 %v1566_v53, %v4468_v54  ;;  %v5183_v53 = vld [vmem:[#allocation139_spill] sm:$0xff] }
 0x661   :  { %v1646_v45 = vmax.f32 %v1614_v10, 0.0 }
 0x662   :  { %v4446_v31 = vunpack.c.l.bf16 %v5166_v24  ;;  %v1596_v24 = vadd.f32 %v4308_v9, %v4429_v25  ;;  %5177 = vst [vmem:[#allocation134_spill] sm:$0xff] %v4475_v47  ;;  %v1610_v25 = vadd.f32 %v1569_v2, %v4455_v43  ;;  %v1594_v58 = vadd.f32 %v4302_v49, %v4461_v12 }
 0x663   :  { %v1662_v18 = vadd.f32 %v1646_v45, %v1630_v59  ;;  %v5182_v2 = vpack.c.bf16 %v5181_v55, %v5181_v55  ;;  %v1593_v45 = vadd.f32 %v4298_v46, %v4475_v47 }
 0x664   :  { %v1595_v9 = vadd.f32 %v4304_v14, %v4446_v31  ;;  %v1628_v16 = vmax.f32 %v1596_v24, 0.0  ;;  %v1661_v14 = vadd.f32 %v1645_v57, %v1629_v30  ;;  %v1642_v24 = vmax.f32 %v1610_v25, 0.0  ;;  %v5186_v25 = vld [vmem:[#allocation120_spill] sm:$0xff] }
 0x665   :  { %v4491_v50 = vunpack.c.l.bf16 %v5182_v2  ;;  %v1641_v57 = vmax.f32 %v1609_v11, 0.0 }
 0x666   :  { %v1581_v28 = vpop.f32.mrf.mxu3  ;;  %v1627_v49 = vmax.f32 %v1595_v9, 0.0  ;;  %v1660_v59 = vadd.f32 %v1644_v40, %v1628_v16  ;;  %v4506_v55 = vmul.f32 0.5, %v1661_v14  ;;  %v5187_v9 = vpack.c.bf16 %v5186_v25, %v5186_v25 }
 0x667   :  { %v1615_v10 = vadd.f32 %v1581_v28, %v4441_v26  ;;  %v5178_v28 = vld [vmem:[#allocation141_spill] sm:$0xff]  ;;  %v1643_v26 = vmax.f32 %v1611_v21, 0.0  ;;  %v5184_v21 = vpack.c.bf16 %v5183_v53, %v5183_v53 }
 0x668   :  { %v5179_v8 = vpack.c.bf16 %v5178_v28, %v5178_v28  ;;  %v1626_v28 = vmax.f32 %v1594_v58, 0.0  ;;  %v4513_v40 = vunpack.c.l.bf16 %v5187_v9  ;;  %v1625_v58 = vmax.f32 %v1593_v45, 0.0  ;;  %v5191_v45 = vld [vmem:[#allocation118_spill] sm:$0xff] }
 0x669   :  { %v1647_v3 = vmax.f32 %v1615_v10, 0.0  ;;  %v4495_v10 = vmul.f32 0.5, %v1662_v18  ;;  %v1659_v30 = vadd.f32 %v1643_v26, %v1627_v49  ;;  %v1591_v18 = vadd.f32 %v4292_v23, %v4491_v50 }
 0x66a   :  { %v4485_v56 = vunpack.c.l.bf16 %v5179_v8  ;;  %v1658_v16 = vadd.f32 %v1642_v24, %v1626_v28  ;;  %v1657_v49 = vadd.f32 %v1641_v57, %v1625_v58  ;;  %v5192_v24 = vpack.c.bf16 %v5191_v45, %v5191_v45 }
 0x66b   :  { %v1663_v4 = vadd.f32 %v1647_v3, %v1631_v27  ;;  %v4502_v3 = vunpack.c.l.bf16 %v5184_v21  ;;  %v4526_v53 = vmul.f32 0.5, %v1659_v30  ;;  %v1589_v28 = vadd.f32 %v4288_v22, %v4513_v40  ;;  %v5196_v22 = vld [vmem:[#allocation116_spill] sm:$0xff] }
 0x66c   :  { %5180 = vst [vmem:[#allocation147_spill] sm:$0xff] %v4485_v56  ;;  %v1607_v27 = vadd.f32 %v4378_v38, %v4485_v56  ;;  %v5188_v38 = vld [vmem:[#allocation137_spill] sm:$0xff]  ;;  %v1623_v21 = vmax.f32 %v1591_v18, 0.0  ;;  %v4546_v58 = vmul.f32 0.5, %v1657_v49  ;;  %v5197_v18 = vpack.c.bf16 %v5196_v22, %v5196_v22 }
 0x66d   :  { %v4497_v8 = vmul.f32 0.5, %v1663_v4  ;;  %5185 = vst [vmem:[#allocation132_spill] sm:$0xff] %v4502_v3  ;;  %v4517_v4 = vmul.f32 0.5, %v1660_v59  ;;  %v5189_v26 = vpack.c.bf16 %v5188_v38, %v5188_v38  ;;  %v1605_v14 = vadd.f32 %v4362_v17, %v4502_v3  ;;  %v5193_v17 = vld [vmem:[#allocation136_spill] sm:$0xff] }
 0x66e   :  { %v1639_v2 = vmax.f32 %v1607_v27, 0.0  ;;  %v4533_v59 = vunpack.c.l.bf16 %v5192_v24  ;;  %v5194_v27 = vpack.c.bf16 %v5193_v17, %v5193_v17  ;;  %v4558_v45 = vmul.f32 0.5, %v4393_v35 }
 0x66f   :  { %v1687_v46 = vpack.c.bf16 %v4497_v8, %v4495_v10  ;;  %v4522_v11 = vunpack.c.l.bf16 %v5189_v26  ;;  %v1686_v23 = vpack.c.bf16 %v4506_v55, %v4517_v4  ;;  %v1637_v25 = vmax.f32 %v1605_v14, 0.0 }
 0x670   :  { %v4542_v57 = vunpack.c.l.bf16 %v5194_v27  ;;  %v1655_v9 = vadd.f32 %v1639_v2, %v1623_v21  ;;  %v1587_v26 = vadd.f32 %v4284_v15, %v4533_v59  ;;  %v1684_v24 = vpack.c.bf16 %v4546_v58, %v4558_v45 }
 0x671   :  { %1688 = vmatpush.bf16.msrb.mxu1 %v1687_v46  ;;  %5190 = vst [vmem:[#allocation135_spill] sm:$0xff] %v4522_v11  ;;  %v4537_v46 = vmul.f32 0.5, %v1658_v16  ;;  %v1603_v30 = vadd.f32 %v4346_v36, %v4522_v11  ;;  %v4553_v16 = vunpack.c.l.bf16 %v5197_v18  ;;  %v4569_v15 = vmul.f32 0.5, %v4376_v41 }
 0x672   :  { %5195 = vst [vmem:[#allocation146_spill] sm:$0xff] %v4542_v57  ;;  %v1601_v36 = vadd.f32 %v4330_v0, %v4542_v57  ;;  %v4562_v49 = vmul.f32 0.5, %v1655_v9  ;;  %v1619_v17 = vmax.f32 %v1587_v26, 0.0  ;;  %v4583_v41 = vmul.f32 0.5, %v4344_v48  ;;  %v5200_v48 = vld [vmem:[#allocation152_spill] sm:$0xff] }
 0x673   :  { %v1685_v38 = vpack.c.bf16 %v4526_v53, %v4537_v46  ;;  %v1635_v14 = vmax.f32 %v1603_v30, 0.0  ;;  %v1585_v21 = vadd.f32 %v4280_v52, %v4553_v16  ;;  %v4590_v26 = vmul.f32 0.5, %v4328_v42  ;;  %v5205_v42 = vld [vmem:[#allocation157_spill] sm:$0xff] }
 0x674   :  { %v1633_v35 = vmax.f32 %v1601_v36, 0.0  ;;  %v1683_v0 = vpack.c.bf16 %v4562_v49, %v4569_v15  ;;  %v5199_v36 = vld [vmem:[#allocation151_spill] sm:$0xff] }
 0x675   :  { %1689 = vmatpush.bf16.msrb.mxu1 %v1686_v23  ;;  %v1621_v23 = vmax.f32 %v1589_v28, 0.0  ;;  %v1651_v28 = vadd.f32 %v1635_v14, %v1619_v17  ;;  %v1617_v30 = vmax.f32 %v1585_v21, 0.0  ;;  %v5201_v14 = vld [vmem:[#allocation153_spill] sm:$0xff]  ;;  %v5204_v21 = vld [vmem:[#allocation156_spill] sm:$0xff] }
 0x677   :  { %v1653_v2 = vadd.f32 %v1637_v25, %v1621_v23  ;;  %v4576_v25 = vmul.f32 0.5, %v4360_v7  ;;  %v1649_v9 = vadd.f32 %v1633_v35, %v1617_v30  ;;  %v5198_v23 = vld [vmem:[#allocation150_spill] sm:$0xff] }
 0x679   :  { %1690 = vmatpush.bf16.msrb.mxu1 %v1685_v38  ;;  %v4571_v27 = vmul.f32 0.5, %v1653_v2  ;;  %v4578_v38 = vmul.f32 0.5, %v1651_v28  ;;  %v4585_v22 = vmul.f32 0.5, %v1649_v9  ;;  %v5202_v2 = vld [vmem:[#allocation154_spill] sm:$0xff] }
 0x67b   :  { %v1682_v52 = vpack.c.bf16 %v4571_v27, %v4576_v25  ;;  %v1681_v18 = vpack.c.bf16 %v4578_v38, %v4583_v41  ;;  %v1680_v7 = vpack.c.bf16 %v4585_v22, %v4590_v26 }
 0x67d   :  { %1691 = vmatpush.bf16.msrb.mxu1 %v1684_v24  ;;  %v5203_v24 = vld [vmem:[#allocation155_spill] sm:$0xff] }
 0x681   :  { %1692 = vmatpush.bf16.msrb.mxu1 %v1683_v0 }
 0x685   :  { %1693 = vmatpush.bf16.msrb.mxu1 %v1682_v52 }
 0x689   :  { %1694 = vmatpush.bf16.msrb.mxu1 %v1681_v18 }
 0x68d   :  { %1695 = vmatpush.bf16.msrb.mxu1 %v1680_v7 }
 0x690   :  { %1696 = vmatmul.bf16.vlgmr.msrb.gmra.mxu1 %v5198_v23 }
 0x6a0   :  { %1701 = vmatmul.bf16.gmra.mxu1 %v5199_v36 }
 0x6b0   :  { %1706 = vmatmul.bf16.gmra.mxu1 %v5200_v48 }
 0x6c0   :  { %1711 = vmatmul.bf16.gmra.mxu1 %v5201_v14 }
 0x6d0   :  { %1716 = vmatmul.bf16.gmra.mxu1 %v5202_v2 }
 0x6e0   :  { %1721 = vmatmul.bf16.gmra.mxu1 %v5203_v24 }
 0x6f0   :  { %1726 = vmatmul.bf16.gmra.mxu1 %v5204_v21 }
 0x700   :  { %1731 = vmatmul.bf16.gmra.mxu1 %v5205_v42 }
 0x70d   :  { %v1697_v17 = vpop.f32.mrf.mxu1 }
 0x715   :  { %v1699_v35 = vpop.f32.mrf.mxu1 }
 0x716   :  { %v1737_v47 = vpack.c.bf16 %v1699_v35, %v1697_v17 }
 0x71d   :  { %v1702_v28 = vpop.f32.mrf.mxu1 }
 0x725   :  { %v1704_v0 = vpop.f32.mrf.mxu1 }
 0x726   :  { %v1738_v57 = vpack.c.bf16 %v1704_v0, %v1702_v28 }
 0x72d   :  { %v1707_v30 = vpop.f32.mrf.mxu1 }
 0x735   :  { %v1709_v9 = vpop.f32.mrf.mxu1 }
 0x736   :  { %v1739_v11 = vpack.c.bf16 %v1709_v9, %v1707_v30 }
 0x73d   :  { %v1712_v52 = vpop.f32.mrf.mxu1 }
 0x745   :  { %v1714_v18 = vpop.f32.mrf.mxu1 }
 0x746   :  { %v1740_v3 = vpack.c.bf16 %v1714_v18, %v1712_v52 }
 0x74d   :  { %v1717_v7 = vpop.f32.mrf.mxu1 }
 0x755   :  { %v1719_v23 = vpop.f32.mrf.mxu1 }
 0x756   :  { %v1741_v56 = vpack.c.bf16 %v1719_v23, %v1717_v7 }
 0x75d   :  { %v1722_v36 = vpop.f32.mrf.mxu1 }
 0x765   :  { %v1724_v48 = vpop.f32.mrf.mxu1 }
 0x766   :  { %v1742_v42 = vpack.c.bf16 %v1724_v48, %v1722_v36 }
 0x76d   :  { %v1727_v14 = vpop.f32.mrf.mxu1 }
 0x775   :  { %v1729_v2 = vpop.f32.mrf.mxu1 }
 0x776   :  { %v1743_v21 = vpack.c.bf16 %v1729_v2, %v1727_v14 }
 0x77d   :  { %v1732_v54 = vpop.f32.mrf.mxu1 }
 0x785   :  { %v1734_v24 = vpop.f32.mrf.mxu1 }
 0x786   :  { %v1744_v43 = vpack.c.bf16 %v1734_v24, %v1732_v54 }
 0x788   :  { %1745 = vmatpush.bf16.msrb.mxu2 %v1744_v43 }
 0x78c   :  { %1746 = vmatpush.bf16.msrb.mxu2 %v1743_v21 }
 0x790   :  { %1747 = vmatpush.bf16.msrb.mxu2 %v1742_v42 }
 0x794   :  { %1748 = vmatpush.bf16.msrb.mxu2 %v1741_v56 }
 0x798   :  { %1749 = vmatpush.bf16.msrb.mxu2 %v1740_v3 }
 0x79c   :  { %1750 = vmatpush.bf16.msrb.mxu2 %v1739_v11 }
 0x7a0   :  { %1751 = vmatpush.bf16.msrb.mxu2 %v1738_v57 }
 0x7a4   :  { %1752 = vmatpush.bf16.msrb.mxu2 %v1737_v47 }
 0x7a7   :  { %1753 = vmatmul.bf16.vlgmr.msrb.gmra.mxu2 %v3896_v62 }
 0x7b7   :  { %1758 = vmatmul.bf16.gmra.mxu2 %v3899_v63 }
 0x7c7   :  { %1763 = vmatmul.bf16.gmra.mxu2 %v3902_v32 }
 0x7d7   :  { %1768 = vmatmul.bf16.gmra.mxu2 %v3905_v33 }
 0x7e7   :  { %1773 = vmatmul.bf16.gmra.mxu2 %v3908_v51 }
 0x7f7   :  { %1778 = vmatmul.bf16.gmra.mxu2 %v3911_v60 }
 0x807   :  { %1783 = vmatmul.bf16.gmra.mxu2 %v3914_v61 }
 0x817   :  { %1788 = vmatmul.bf16.gmra.mxu2 %v5106_v6 }
 0x827   :  { %1793 = vmatmul.bf16.gmra.mxu2 %v5107_v44 }
 0x82a   :  { %v1754_v54 = vpop.f32.mrf.mxu2 }
 0x82b   :  { %v1834_v62 = vsub.f32 %v1754_v54, %v4590_v26 }
 0x832   :  { %v1756_v43 = vpop.f32.mrf.mxu2 }
 0x833   :  { %v1835_v63 = vsub.f32 %v1756_v43, %v4585_v22 }
 0x835   :  { %v1866_v47 = vpack.c.bf16 %v1835_v63, %v1834_v62 }
 0x837   :  { %1798 = vmatmul.bf16.gmra.mxu2 %v5108_v34  ;;  %1890 = vmatmul.bf16.vlgmr.msra.gmra.mxu0 %v1866_v47 }
 0x83a   :  { %v1759_v32 = vpop.f32.mrf.mxu2 }
 0x83b   :  { %v1836_v51 = vsub.f32 %v1759_v32, %v4583_v41 }
 0x842   :  { %v1761_v33 = vpop.f32.mrf.mxu2 }
 0x843   :  { %v1837_v60 = vsub.f32 %v1761_v33, %v4578_v38 }
 0x845   :  { %v1867_v61 = vpack.c.bf16 %v1837_v60, %v1836_v51 }
 0x847   :  { %1803 = vmatmul.bf16.gmra.mxu2 %v5109_v1  ;;  %1895 = vmatmul.bf16.gmra.mxu0 %v1867_v61 }
 0x84a   :  { %v1764_v6 = vpop.f32.mrf.mxu2 }
 0x84b   :  { %v1838_v56 = vsub.f32 %v1764_v6, %v4576_v25 }
 0x852   :  { %v1766_v44 = vpop.f32.mrf.mxu2 }
 0x853   :  { %v1839_v3 = vsub.f32 %v1766_v44, %v4571_v27 }
 0x855   :  { %v1868_v11 = vpack.c.bf16 %v1839_v3, %v1838_v56 }
 0x857   :  { %1808 = vmatmul.bf16.gmra.mxu2 %v5110_v19  ;;  %1900 = vmatmul.bf16.gmra.mxu0 %v1868_v11 }
 0x85a   :  { %v1769_v34 = vpop.f32.mrf.mxu2 }
 0x85b   :  { %v1840_v17 = vsub.f32 %v1769_v34, %v4569_v15 }
 0x862   :  { %v1771_v57 = vpop.f32.mrf.mxu2 }
 0x863   :  { %v1841_v35 = vsub.f32 %v1771_v57, %v4562_v49 }
 0x865   :  { %v1869_v28 = vpack.c.bf16 %v1841_v35, %v1840_v17 }
 0x867   :  { %1813 = vmatmul.bf16.gmra.mxu2 %v5111_v29  ;;  %1905 = vmatmul.bf16.gmra.mxu0 %v1869_v28 }
 0x86a   :  { %v1774_v1 = vpop.f32.mrf.mxu2 }
 0x86b   :  { %v1842_v30 = vsub.f32 %v1774_v1, %v4558_v45 }
 0x872   :  { %v1776_v0 = vpop.f32.mrf.mxu2 }
 0x873   :  { %v1843_v9 = vsub.f32 %v1776_v0, %v4546_v58 }
 0x875   :  { %v1870_v52 = vpack.c.bf16 %v1843_v9, %v1842_v30 }
 0x877   :  { %1818 = vmatmul.bf16.gmra.mxu2 %v5112_v13  ;;  %1910 = vmatmul.bf16.gmra.mxu0 %v1870_v52 }
 0x87a   :  { %v1779_v19 = vpop.f32.mrf.mxu2 }
 0x87b   :  { %v1844_v7 = vsub.f32 %v1779_v19, %v4537_v46  ;;  %v5206_v19 = vld [vmem:[#allocation38_spill] sm:$0xff] }
 0x882   :  { %v1781_v18 = vpop.f32.mrf.mxu2 }
 0x883   :  { %v1845_v23 = vsub.f32 %v1781_v18, %v4526_v53 }
 0x885   :  { %v1871_v36 = vpack.c.bf16 %v1845_v23, %v1844_v7 }
 0x887   :  { %1823 = vmatmul.bf16.gmra.mxu2 %v5113_v5  ;;  %1915 = vmatmul.bf16.gmra.mxu0 %v1871_v36 }
 0x88a   :  { %v1784_v29 = vpop.f32.mrf.mxu2 }
 0x88b   :  { %v1846_v14 = vsub.f32 %v1784_v29, %v4517_v4 }
 0x892   :  { %v1786_v48 = vpop.f32.mrf.mxu2 }
 0x893   :  { %v1847_v2 = vsub.f32 %v1786_v48, %v4506_v55 }
 0x895   :  { %v1872_v24 = vpack.c.bf16 %v1847_v2, %v1846_v14 }
 0x897   :  { %1828 = vmatmul.bf16.gmra.mxu2 %v5114_v37  ;;  %1920 = vmatmul.bf16.gmra.mxu0 %v1872_v24  ;;  %v5207_v24 = vld [vmem:[#allocation114_spill] sm:$0xff] }
 0x89a   :  { %v1789_v13 = vpop.f32.mrf.mxu2 }
 0x89b   :  { %v1848_v42 = vsub.f32 %v1789_v13, %v4495_v10 }
 0x8a2   :  { %v1791_v21 = vpop.f32.mrf.mxu2 }
 0x8a3   :  { %v1849_v54 = vsub.f32 %v1791_v21, %v4497_v8 }
 0x8a5   :  { %v1873_v43 = vpack.c.bf16 %v1849_v54, %v1848_v42 }
 0x8a7   :  { %1925 = vmatmul.bf16.gmra.mxu0 %v1873_v43 }
 0x8aa   :  { %v1794_v5 = vpop.f32.mrf.mxu2 }
 0x8ab   :  { %v1850_v63 = vsub.f32 %v1794_v5, %v4590_v26 }
 0x8b2   :  { %v1796_v62 = vpop.f32.mrf.mxu2 }
 0x8b3   :  { %v1851_v47 = vsub.f32 %v1796_v62, %v4585_v22 }
 0x8b4   :  { %v1891_v32 = vpop.f32.mrf.mxu0 }
 0x8b5   :  { %v1874_v33 = vpack.c.bf16 %v1851_v47, %v1850_v63  ;;  %v1971_v37 = vadd.f32 %v1891_v32, %v4319_v20 }
 0x8b7   :  { %1930 = vmatmul.bf16.gmra.mxu0 %v1874_v33  ;;  %v2003_v6 = vmax.f32 %v1971_v37, 0.0 }
 0x8ba   :  { %v1799_v51 = vpop.f32.mrf.mxu2 }
 0x8bb   :  { %v1852_v11 = vsub.f32 %v1799_v51, %v4583_v41 }
 0x8bc   :  { %v1893_v60 = vpop.f32.mrf.mxu0 }
 0x8bd   :  { %v1972_v61 = vadd.f32 %v1893_v60, %v4553_v16 }
 0x8bf   :  { %v2004_v44 = vmax.f32 %v1972_v61, 0.0 }
 0x8c1   :  { %v4638_v56 = vpack.c.bf16 %v2004_v44, %v2003_v6 }
 0x8c2   :  { %v1801_v3 = vpop.f32.mrf.mxu2 }
 0x8c3   :  { %v1853_v26 = vsub.f32 %v1801_v3, %v4578_v38 }
 0x8c4   :  { %v1896_v34 = vpop.f32.mrf.mxu0 }
 0x8c5   :  { %v1875_v22 = vpack.c.bf16 %v1853_v26, %v1852_v11  ;;  %v1973_v17 = vadd.f32 %v1896_v34, %v4335_v39 }
 0x8c7   :  { %1935 = vmatmul.bf16.gmra.mxu0 %v1875_v22  ;;  %v2005_v28 = vmax.f32 %v1973_v17, 0.0 }
 0x8ca   :  { %v1804_v57 = vpop.f32.mrf.mxu2 }
 0x8cb   :  { %v1854_v30 = vsub.f32 %v1804_v57, %v4576_v25 }
 0x8cc   :  { %v1898_v35 = vpop.f32.mrf.mxu0 }
 0x8cd   :  { %v1974_v20 = vadd.f32 %v1898_v35, %v4533_v59  ;;  %v5208_v35 = vld [vmem:[#allocation124_spill] sm:$0xff] }
 0x8cf   :  { %v2006_v16 = vmax.f32 %v1974_v20, 0.0 }
 0x8d1   :  { %v4644_v1 = vpack.c.bf16 %v2006_v16, %v2005_v28  ;;  %v5209_v16 = vld [vmem:[#allocation130_spill] sm:$0xff] }
 0x8d2   :  { %v1806_v0 = vpop.f32.mrf.mxu2 }
 0x8d3   :  { %v1855_v41 = vsub.f32 %v1806_v0, %v4571_v27  ;;  %v5210_v0 = vld [vmem:[#allocation133_spill] sm:$0xff] }
 0x8d4   :  { %v1901_v9 = vpop.f32.mrf.mxu0 }
 0x8d5   :  { %v1876_v38 = vpack.c.bf16 %v1855_v41, %v1854_v30  ;;  %v1975_v18 = vadd.f32 %v1901_v9, %v5206_v19  ;;  %v5211_v30 = vld [vmem:[#allocation122_spill] sm:$0xff] }
 0x8d7   :  { %1940 = vmatmul.bf16.gmra.mxu0 %v1876_v38  ;;  %v2007_v23 = vmax.f32 %v1975_v18, 0.0 }
 0x8da   :  { %v1809_v52 = vpop.f32.mrf.mxu2 }
 0x8db   :  { %v1856_v48 = vsub.f32 %v1809_v52, %v4569_v15 }
 0x8dc   :  { %v1903_v7 = vpop.f32.mrf.mxu0 }
 0x8dd   :  { %v1976_v39 = vadd.f32 %v1903_v7, %v4513_v40 }
 0x8df   :  { %v2008_v59 = vmax.f32 %v1976_v39, 0.0  ;;  %v5212_v39 = vld [vmem:[#allocation134_spill] sm:$0xff] }
 0x8e1   :  { %v4650_v36 = vpack.c.bf16 %v2008_v59, %v2007_v23 }
 0x8e2   :  { %v1811_v29 = vpop.f32.mrf.mxu2 }
 0x8e3   :  { %v1857_v25 = vsub.f32 %v1811_v29, %v4562_v49 }
 0x8e4   :  { %v1906_v14 = vpop.f32.mrf.mxu0 }
 0x8e5   :  { %v1877_v27 = vpack.c.bf16 %v1857_v25, %v1856_v48  ;;  %v1977_v13 = vadd.f32 %v1906_v14, %v5207_v24  ;;  %v5213_v48 = vld [vmem:[#allocation117_spill] sm:$0xff] }
 0x8e7   :  { %1945 = vmatmul.bf16.gmra.mxu0 %v1877_v27  ;;  %v2009_v54 = vmax.f32 %v1977_v13, 0.0  ;;  %v5214_v13 = vld [vmem:[#allocation40_spill] sm:$0xff] }
 0x8ea   :  { %v1814_v2 = vpop.f32.mrf.mxu2 }
 0x8eb   :  { %v1858_v62 = vsub.f32 %v1814_v2, %v4558_v45 }
 0x8ec   :  { %v1908_v21 = vpop.f32.mrf.mxu0 }
 0x8ed   :  { %v1978_v42 = vadd.f32 %v1908_v21, %v4491_v50 }
 0x8ef   :  { %v2010_v40 = vmax.f32 %v1978_v42, 0.0  ;;  %v5215_v42 = vld [vmem:[#allocation146_spill] sm:$0xff] }
 0x8f1   :  { %v4656_v43 = vpack.c.bf16 %v2010_v40, %v2009_v54 }
 0x8f2   :  { %v1816_v5 = vpop.f32.mrf.mxu2 }
 0x8f3   :  { %v1859_v15 = vsub.f32 %v1816_v5, %v4546_v58 }
 0x8f4   :  { %v1911_v63 = vpop.f32.mrf.mxu0 }
 0x8f5   :  { %v1878_v49 = vpack.c.bf16 %v1859_v15, %v1858_v62  ;;  %v1979_v25 = vadd.f32 %v1911_v63, %v5213_v48  ;;  %v5216_v63 = vld [vmem:[#allocation41_spill] sm:$0xff] }
 0x8f6   :  { %v5227_v48 = vld [vmem:[#allocation57_spill] sm:$0xff] }
 0x8f7   :  { %1950 = vmatmul.bf16.gmra.mxu0 %v1878_v49  ;;  %v2011_v24 = vmax.f32 %v1979_v25, 0.0 }
 0x8fa   :  { %v1819_v47 = vpop.f32.mrf.mxu2 }
 0x8fb   :  { %v1860_v51 = vsub.f32 %v1819_v47, %v4537_v46 }
 0x8fc   :  { %v1913_v32 = vpop.f32.mrf.mxu0 }
 0x8fd   :  { %v1980_v23 = vadd.f32 %v1913_v32, %v5212_v39  ;;  %v5217_v32 = vld [vmem:[#allocation135_spill] sm:$0xff] }
 0x8ff   :  { %v2012_v27 = vmax.f32 %v1980_v23, 0.0 }
 0x901   :  { %v2039_v54 = vpack.c.bf16 %v2012_v27, %v2011_v24 }
 0x902   :  { %v1821_v33 = vpop.f32.mrf.mxu2 }
 0x903   :  { %v1861_v37 = vsub.f32 %v1821_v33, %v4526_v53 }
 0x904   :  { %v1916_v50 = vpop.f32.mrf.mxu0 }
 0x905   :  { %v1879_v60 = vpack.c.bf16 %v1861_v37, %v1860_v51 }
 0x907   :  { %1955 = vmatmul.bf16.gmra.mxu0 %v1879_v60 }
 0x90a   :  { %v1824_v61 = vpop.f32.mrf.mxu2 }
 0x90b   :  { %v1862_v45 = vsub.f32 %v1824_v61, %v4517_v4  ;;  %v5218_v61 = vld [vmem:[#allocation39_spill] sm:$0xff] }
 0x90c   :  { %v1918_v6 = vpop.f32.mrf.mxu0 }
 0x90d   :  { %v1982_v52 = vadd.f32 %v1918_v6, %v4446_v31 }
 0x90f   :  { %v2014_v59 = vmax.f32 %v1982_v52, 0.0  ;;  %v5224_v52 = vld [vmem:[#allocation125_spill] sm:$0xff] }
 0x912   :  { %v1826_v44 = vpop.f32.mrf.mxu2 }
 0x913   :  { %v1863_v58 = vsub.f32 %v1826_v44, %v4506_v55  ;;  %v5219_v44 = vld [vmem:[#allocation132_spill] sm:$0xff] }
 0x914   :  { %v1921_v3 = vpop.f32.mrf.mxu0 }
 0x915   :  { %v1880_v11 = vpack.c.bf16 %v1863_v58, %v1862_v45  ;;  %v1983_v41 = vadd.f32 %v1921_v3, %v5211_v30 }
 0x917   :  { %1960 = vmatmul.bf16.gmra.mxu0 %v1880_v11  ;;  %v2015_v18 = vmax.f32 %v1983_v41, 0.0 }
 0x91a   :  { %v1829_v26 = vpop.f32.mrf.mxu2 }
 0x91b   :  { %v1864_v46 = vsub.f32 %v1829_v26, %v4495_v10 }
 0x91c   :  { %v1923_v34 = vpop.f32.mrf.mxu0 }
 0x91d   :  { %v1984_v4 = vadd.f32 %v1923_v34, %v5209_v16 }
 0x91f   :  { %v2016_v19 = vmax.f32 %v1984_v4, 0.0 }
 0x921   :  { %v2041_v29 = vpack.c.bf16 %v2016_v19, %v2015_v18 }
 0x922   :  { %v1831_v22 = vpop.f32.mrf.mxu2 }
 0x923   :  { %v1865_v53 = vsub.f32 %v1831_v22, %v4497_v8  ;;  %v1981_v8 = vadd.f32 %v1916_v50, %v4461_v12  ;;  %v5221_v22 = vld [vmem:[#allocation147_spill] sm:$0xff] }
 0x924   :  { %v1926_v57 = vpop.f32.mrf.mxu0 }
 0x925   :  { %v1881_v17 = vpack.c.bf16 %v1865_v53, %v1864_v46  ;;  %v1985_v20 = vadd.f32 %v1926_v57, %v5208_v35  ;;  %v2013_v14 = vmax.f32 %v1981_v8, 0.0  ;;  %v3194_v8 = vld [vmem:[#allocation2 + $0x4] sm:$0xf0] }
 0x927   :  { %1965 = vmatmul.bf16.gmra.mxu0 %v1881_v17  ;;  %v2017_v9 = vmax.f32 %v1985_v20, 0.0  ;;  %v2040_v2 = vpack.c.bf16 %v2014_v59, %v2013_v14  ;;  %v5228_v14 = vld [vmem:[#allocation140_spill] sm:$0xff] }
 0x92c   :  { %v1928_v28 = vpop.f32.mrf.mxu0 }
 0x92d   :  { %v1986_v55 = vadd.f32 %v1928_v28, %v5210_v0 }
 0x92f   :  { %v2018_v38 = vmax.f32 %v1986_v55, 0.0  ;;  %v5222_v55 = vld [vmem:[#allocation121_spill] sm:$0xff] }
 0x931   :  { %v2042_v10 = vpack.c.bf16 %v2018_v38, %v2017_v9  ;;  %v5223_v9 = vld [vmem:[#allocation127_spill] sm:$0xff] }
 0x933   :  { %2115 = vmatpush.bf16.msra.mxu1 %v2042_v10  ;;  %v2905_v10 = vld [vmem:[#allocation2] sm:$0xf] }
 0x934   :  { %v1931_v7 = vpop.f32.mrf.mxu0  ;;  %v2906_v18 = vor.u32 %v3194_v8, %v2905_v10  ;;  %v3197_v10 = vld [vmem:[#allocation2 + $0x24] sm:$0xf]  ;;  %v2923_v8 = vld [vmem:[#allocation2 + $0x28] sm:$0xf0] }
 0x935   :  { %v1987_v31 = vadd.f32 %v1931_v7, %v5214_v13  ;;  %v5225_v7 = vld [vmem:[#allocation138_spill] sm:$0xff] }
 0x936   :  { %v5229_v13 = vld [vmem:[#allocation54_spill] sm:$0xff] }
 0x937   :  { %2116 = vmatpush.bf16.msra.mxu1 %v2041_v29  ;;  %v2019_v40 = vmax.f32 %v1987_v31, 0.0  ;;  %v5226_v29 = vld [vmem:[#allocation56_spill] sm:$0xff]  ;;  %v5230_v31 = vld [vmem:[#allocation55_spill] sm:$0xff] }
 0x938   :  { %v3030_v25 = vor.u32 %v5227_v48, %v5226_v29  ;;  %v5247_v29 = vld [vmem:[#allocation69_spill] sm:$0xff] }
 0x93a   :  { %2366 = vmatpush.bf16.msra.mxu2 %v3030_v25  ;;  %v3199_v25 = vld [vmem:[#allocation2 + $0x34] sm:$0xf] }
 0x93b   :  { %2117 = vmatpush.bf16.msra.mxu1 %v2040_v2 }
 0x93c   :  { %v1933_v21 = vpop.f32.mrf.mxu0 }
 0x93d   :  { %v1988_v12 = vadd.f32 %v1933_v21, %v5215_v42  ;;  %v3026_v21 = vor.u32 %v5230_v31, %v5229_v13  ;;  %v5231_v42 = vld [vmem:[#allocation142_spill] sm:$0xff] }
 0x93e   :  { %v5248_v31 = vld [vmem:[#allocation66_spill] sm:$0xff] }
 0x93f   :  { %v2020_v5 = vmax.f32 %v1988_v12, 0.0  ;;  %2118 = vmatpush.bf16.msra.mxu1 %v2039_v54  ;;  %2367 = vmatpush.bf16.msra.mxu2 %v3026_v21  ;;  %v5249_v21 = vld [vmem:[#allocation67_spill] sm:$0xff] }
 0x941   :  { %v4676_v62 = vpack.c.bf16 %v2020_v5, %v2019_v40  ;;  %v5232_v40 = vld [vmem:[#allocation148_spill] sm:$0xff] }
 0x943   :  { %2119 = vmatpush.bf16.msra.mxu1 %v4656_v43 }
 0x944   :  { %v1936_v15 = vpop.f32.mrf.mxu0 }
 0x945   :  { %v1989_v49 = vadd.f32 %v1936_v15, %v5216_v63 }
 0x947   :  { %2120 = vmatpush.bf16.msra.mxu1 %v4650_v36  ;;  %v2021_v51 = vmax.f32 %v1989_v49, 0.0  ;;  %v5233_v49 = vld [vmem:[#allocation52_spill] sm:$0xff] }
 0x94b   :  { %2121 = vmatpush.bf16.msra.mxu1 %v4644_v1  ;;  %v5220_v1 = vld [vmem:[#allocation115_spill] sm:$0xff] }
 0x94c   :  { %v1938_v47 = vpop.f32.mrf.mxu0 }
 0x94d   :  { %v1990_v33 = vadd.f32 %v1938_v47, %v5217_v32  ;;  %v5234_v47 = vld [vmem:[#allocation53_spill] sm:$0xff] }
 0x94e   :  { %v3022_v32 = vor.u32 %v5234_v47, %v5233_v49  ;;  %v3206_v49 = vld [vmem:[#allocation2 + $0x64] sm:$0xf0] }
 0x94f   :  { %v2022_v37 = vmax.f32 %v1990_v33, 0.0  ;;  %2122 = vmatpush.bf16.msra.mxu1 %v4638_v56  ;;  %v5235_v33 = vld [vmem:[#allocation119_spill] sm:$0xff] }
 0x950   :  { %2368 = vmatpush.bf16.msra.mxu2 %v3022_v32 }
 0x951   :  { %v4684_v50 = vpack.c.bf16 %v2022_v37, %v2021_v51 }
 0x952   :  { %2123 = vmatmul.bf16.vlgmr.msra.gmra.mxu1 %v2906_v18  ;;  %v2937_v18 = vld [vmem:[#allocation2 + $0x40] sm:$0xf] }
 0x954   :  { %v1941_v60 = vpop.f32.mrf.mxu0 }
 0x955   :  { %v1991_v6 = vadd.f32 %v1941_v60, %v5218_v61 }
 0x957   :  { %v2023_v36 = vmax.f32 %v1991_v6, 0.0  ;;  %v5236_v6 = vld [vmem:[#allocation50_spill] sm:$0xff] }
 0x95c   :  { %v1943_v43 = vpop.f32.mrf.mxu0 }
 0x95d   :  { %v1992_v45 = vadd.f32 %v1943_v43, %v5219_v44  ;;  %v5237_v43 = vld [vmem:[#allocation51_spill] sm:$0xff] }
 0x95e   :  { %v3018_v44 = vor.u32 %v5237_v43, %v5236_v6  ;;  %v2961_v6 = vld [vmem:[#allocation2 + $0x70] sm:$0xf]  ;;  %v3208_v43 = vld [vmem:[#allocation2 + $0x74] sm:$0xf0] }
 0x95f   :  { %v2024_v58 = vmax.f32 %v1992_v45, 0.0 }
 0x960   :  { %2369 = vmatpush.bf16.msra.mxu2 %v3018_v44 }
 0x961   :  { %v2045_v3 = vpack.c.bf16 %v2024_v58, %v2023_v36  ;;  %v2913_v58 = vld [vmem:[#allocation2 + $0x10] sm:$0xf] }
 0x964   :  { %v1946_v11 = vpop.f32.mrf.mxu0 }
 0x965   :  { %v1993_v26 = vadd.f32 %v1946_v11, %v5220_v1  ;;  %v3196_v11 = vld [vmem:[#allocation2 + $0x14] sm:$0xf0] }
 0x966   :  { %v2914_v1 = vor.u32 %v3196_v11, %v2913_v58  ;;  %v5255_v58 = vld [vmem:[#allocation63_spill] sm:$0xff] }
 0x967   :  { %v2025_v53 = vmax.f32 %v1993_v26, 0.0  ;;  %v5238_v26 = vld [vmem:[#allocation48_spill] sm:$0xff] }
 0x968   :  { %2128 = vmatmul.bf16.gmra.mxu1 %v2914_v1  ;;  %v5256_v1 = vld [vmem:[#allocation42_spill] sm:$0xff] }
 0x96c   :  { %v1948_v34 = vpop.f32.mrf.mxu0 }
 0x96d   :  { %v1994_v46 = vadd.f32 %v1948_v34, %v5221_v22  ;;  %v5239_v34 = vld [vmem:[#allocation49_spill] sm:$0xff] }
 0x96e   :  { %v3014_v22 = vor.u32 %v5239_v34, %v5238_v26  ;;  %v5257_v26 = vld [vmem:[#allocation43_spill] sm:$0xff] }
 0x96f   :  { %v2026_v57 = vmax.f32 %v1994_v46, 0.0  ;;  %v3193_v46 = vld [vmem:[#allocation2 + $0x4] sm:$0xf]  ;;  %v3002_v34 = vor.u32 %v5257_v26, %v5256_v1 }
 0x970   :  { %2370 = vmatpush.bf16.msra.mxu2 %v3014_v22  ;;  %v5258_v22 = vld [vmem:[#allocation60_spill] sm:$0xff] }
 0x971   :  { %v2046_v56 = vpack.c.bf16 %v2026_v57, %v2025_v53  ;;  %v2907_v53 = vld [vmem:[#allocation2 + $0x8] sm:$0xf0]  ;;  %v2921_v57 = vld [vmem:[#allocation2 + $0x20] sm:$0xf] }
 0x974   :  { %v1951_v17 = vpop.f32.mrf.mxu0 }
 0x975   :  { %v1995_v51 = vadd.f32 %v1951_v17, %v5235_v33  ;;  %v3198_v17 = vld [vmem:[#allocation2 + $0x24] sm:$0xf0]  ;;  %v5252_v33 = vld [vmem:[#allocation64_spill] sm:$0xff] }
 0x977   :  { %v2027_v45 = vmax.f32 %v1995_v51, 0.0  ;;  %v5253_v51 = vld [vmem:[#allocation65_spill] sm:$0xff] }
 0x97c   :  { %v1953_v35 = vpop.f32.mrf.mxu0 }
 0x97d   :  { %v1996_v5 = vadd.f32 %v1953_v35, %v5232_v40  ;;  %v2910_v35 = vor.u32 %v3193_v46, %v2907_v53  ;;  %v5259_v46 = vld [vmem:[#allocation61_spill] sm:$0xff] }
 0x97e   :  { %v2974_v53 = vor.u32 %v5259_v46, %v5258_v22 }
 0x97f   :  { %v2028_v60 = vmax.f32 %v1996_v5, 0.0  ;;  %v3201_v5 = vld [vmem:[#allocation2 + $0x44] sm:$0xf] }
 0x981   :  { %v2047_v36 = vpack.c.bf16 %v2028_v60, %v2027_v45  ;;  %v3203_v60 = vld [vmem:[#allocation2 + $0x54] sm:$0xf]  ;;  %v2962_v45 = vor.u32 %v3208_v43, %v2961_v6 }
 0x984   :  { %v1956_v20 = vpop.f32.mrf.mxu0 }
 0x985   :  { %v1997_v12 = vadd.f32 %v1956_v20, %v5231_v42  ;;  %v2922_v20 = vor.u32 %v3198_v17, %v2921_v57  ;;  %v2986_v42 = vor.u32 %v5249_v21, %v5248_v31  ;;  %v5260_v57 = vld [vmem:[#allocation106_spill] sm:$0xff]  ;;  %v3205_v17 = vld [vmem:[#allocation2 + $0x64] sm:$0xf] }
 0x987   :  { %v2029_v37 = vmax.f32 %v1997_v12, 0.0  ;;  %2133 = vmatmul.bf16.gmra.mxu1 %v2922_v20  ;;  %v5250_v12 = vld [vmem:[#allocation44_spill] sm:$0xff] }
 0x98c   :  { %v1958_v28 = vpop.f32.mrf.mxu0 }
 0x98d   :  { %v1998_v27 = vadd.f32 %v1958_v28, %v5228_v14  ;;  %v5240_v28 = vld [vmem:[#allocation72_spill] sm:$0xff] }
 0x98e   :  { %v2931_v14 = vld [vmem:[#allocation2 + $0x38] sm:$0xf0] }
 0x98f   :  { %v2030_v15 = vmax.f32 %v1998_v27, 0.0  ;;  %v2945_v27 = vld [vmem:[#allocation2 + $0x50] sm:$0xf] }
 0x991   :  { %v2048_v61 = vpack.c.bf16 %v2030_v15, %v2029_v37  ;;  %v2939_v15 = vld [vmem:[#allocation2 + $0x48] sm:$0xf0]  ;;  %v2982_v37 = vor.u32 %v5253_v51, %v5252_v33  ;;  %v5269_v51 = vld [vmem:[#allocation113_spill] sm:$0xff] }
 0x992   :  { %v2942_v47 = vor.u32 %v3201_v5, %v2939_v15  ;;  %v5268_v5 = vld [vmem:[#allocation112_spill] sm:$0xff] }
 0x994   :  { %v1961_v16 = vpop.f32.mrf.mxu0 }
 0x995   :  { %v1999_v39 = vadd.f32 %v1961_v16, %v5225_v7  ;;  %v5241_v16 = vld [vmem:[#allocation73_spill] sm:$0xff] }
 0x996   :  { %v3202_v7 = vld [vmem:[#allocation2 + $0x44] sm:$0xf0] }
 0x997   :  { %v2031_v54 = vmax.f32 %v1999_v39, 0.0  ;;  %v2926_v39 = vor.u32 %v3197_v10, %v2923_v8 }
 0x99c   :  { %v1963_v4 = vpop.f32.mrf.mxu0 }
 0x99d   :  { %v2000_v38 = vadd.f32 %v1963_v4, %v5223_v9  ;;  %v2998_v4 = vor.u32 %v5241_v16, %v5240_v28  ;;  %v5243_v9 = vld [vmem:[#allocation71_spill] sm:$0xff] }
 0x99e   :  { %v5261_v16 = vld [vmem:[#allocation107_spill] sm:$0xff] }
 0x99f   :  { %v2032_v2 = vmax.f32 %v2000_v38, 0.0  ;;  %2269 = vmatpush.bf16.msrb.mxu1 %v2998_v4  ;;  %v3207_v4 = vld [vmem:[#allocation2 + $0x74] sm:$0xf] }
 0x9a1   :  { %v2049_v63 = vpack.c.bf16 %v2032_v2, %v2031_v54  ;;  %v3204_v2 = vld [vmem:[#allocation2 + $0x54] sm:$0xf0]  ;;  %v5251_v54 = vld [vmem:[#allocation45_spill] sm:$0xff] }
 0x9a2   :  { %v2946_v13 = vor.u32 %v3204_v2, %v2945_v27  ;;  %v3006_v40 = vor.u32 %v5251_v54, %v5250_v12 }
 0x9a4   :  { %v1966_v0 = vpop.f32.mrf.mxu0 }
 0x9a5   :  { %v2001_v30 = vadd.f32 %v1966_v0, %v5222_v55  ;;  %v3195_v0 = vld [vmem:[#allocation2 + $0x14] sm:$0xf]  ;;  %v2929_v55 = vld [vmem:[#allocation2 + $0x30] sm:$0xf] }
 0x9a7   :  { %v2033_v23 = vmax.f32 %v2001_v30, 0.0 }
 0x9ac   :  { %v1968_v41 = vpop.f32.mrf.mxu0 }
 0x9ad   :  { %v2002_v19 = vadd.f32 %v1968_v41, %v5224_v52  ;;  %v5242_v41 = vld [vmem:[#allocation70_spill] sm:$0xff] }
 0x9ae   :  { %v2994_v38 = vor.u32 %v5243_v9, %v5242_v41  ;;  %v5244_v52 = vld [vmem:[#allocation46_spill] sm:$0xff]  ;;  %v5264_v41 = vld [vmem:[#allocation108_spill] sm:$0xff] }
 0x9af   :  { %v2034_v59 = vmax.f32 %v2002_v19, 0.0  ;;  %v5245_v19 = vld [vmem:[#allocation47_spill] sm:$0xff] }
 0x9b0   :  { %2270 = vmatpush.bf16.msrb.mxu1 %v2994_v38 }
 0x9b1   :  { %v2050_v24 = vpack.c.bf16 %v2034_v59, %v2033_v23  ;;  %v2938_v23 = vor.u32 %v3202_v7, %v2937_v18  ;;  %v5246_v59 = vld [vmem:[#allocation68_spill] sm:$0xff] }
 0x9b2   :  { %v2990_v48 = vor.u32 %v5247_v29, %v5246_v59 }
 0x9b3   :  { %2164 = vmatpush.bf16.msra.mxu3 %v2050_v24  ;;  %v2934_v24 = vor.u32 %v3199_v25, %v2931_v14 }
 0x9b4   :  { %2271 = vmatpush.bf16.msrb.mxu1 %v2990_v48 }
 0x9b7   :  { %2165 = vmatpush.bf16.msra.mxu3 %v2049_v63  ;;  %v2953_v63 = vld [vmem:[#allocation2 + $0x60] sm:$0xf] }
 0x9b8   :  { %2272 = vmatpush.bf16.msrb.mxu1 %v2986_v42  ;;  %v2954_v32 = vor.u32 %v3206_v49, %v2953_v63 }
 0x9bb   :  { %2166 = vmatpush.bf16.msra.mxu3 %v2048_v61  ;;  %v2947_v61 = vld [vmem:[#allocation2 + $0x58] sm:$0xf0] }
 0x9bc   :  { %2273 = vmatpush.bf16.msrb.mxu1 %v2982_v37  ;;  %v2950_v44 = vor.u32 %v3203_v60, %v2947_v61 }
 0x9bf   :  { %2167 = vmatpush.bf16.msra.mxu3 %v2047_v36  ;;  %v5254_v36 = vld [vmem:[#allocation62_spill] sm:$0xff] }
 0x9c0   :  { %v2978_v11 = vor.u32 %v5255_v58, %v5254_v36 }
 0x9c2   :  { %2274 = vmatpush.bf16.msrb.mxu1 %v2978_v11 }
 0x9c3   :  { %2168 = vmatpush.bf16.msra.mxu3 %v2046_v56  ;;  %v2915_v56 = vld [vmem:[#allocation2 + $0x18] sm:$0xf0] }
 0x9c4   :  { %v2918_v30 = vor.u32 %v3195_v0, %v2915_v56  ;;  %v2963_v0 = vld [vmem:[#allocation2 + $0x78] sm:$0xf0]  ;;  %v5262_v56 = vld [vmem:[#allocation58_spill] sm:$0xff] }
 0x9c6   :  { %2275 = vmatpush.bf16.msrb.mxu1 %v2974_v53 }
 0x9c7   :  { %2169 = vmatpush.bf16.msra.mxu3 %v2045_v3  ;;  %v3200_v3 = vld [vmem:[#allocation2 + $0x34] sm:$0xf0] }
 0x9cb   :  { %2170 = vmatpush.bf16.msra.mxu3 %v4684_v50  ;;  %v2930_v50 = vor.u32 %v3200_v3, %v2929_v55  ;;  %v5263_v55 = vld [vmem:[#allocation59_spill] sm:$0xff] }
 0x9cc   :  { %v2970_v3 = vor.u32 %v5263_v55, %v5262_v56 }
 0x9cd   :  { %2138 = vmatmul.bf16.gmra.mxu1 %v2930_v50 }
 0x9ce   :  { %2276 = vmatpush.bf16.msrb.mxu1 %v2970_v3 }
 0x9cf   :  { %2171 = vmatpush.bf16.msra.mxu3 %v4676_v62  ;;  %v3010_v62 = vor.u32 %v5245_v19, %v5244_v52  ;;  %v2124_v28 = vpop.f32.mrf.mxu1  ;;  %v5265_v19 = vld [vmem:[#allocation109_spill] sm:$0xff] }
 0x9d1   :  { %2371 = vmatpush.bf16.msra.mxu2 %v3010_v62 }
 0x9d2   :  { %2172 = vmatmul.bf16.vlgmr.msra.gmra.mxu3 %v2910_v35  ;;  %v2955_v35 = vld [vmem:[#allocation2 + $0x68] sm:$0xf0] }
 0x9d3   :  { %v2958_v20 = vor.u32 %v3205_v17, %v2955_v35 }
 0x9d5   :  { %2372 = vmatpush.bf16.msra.mxu2 %v3006_v40 }
 0x9d7   :  { %v2126_v50 = vpop.f32.mrf.mxu1 }
 0x9d9   :  { %2373 = vmatpush.bf16.msra.mxu2 %v3002_v34 }
 0x9dc   :  { %2374 = vmatmul.bf16.vlgmr.msra.gmra.mxu2 %v5260_v57 }
 0x9dd   :  { %2143 = vmatmul.bf16.gmra.mxu1 %v2938_v23  ;;  %v5266_v23 = vld [vmem:[#allocation110_spill] sm:$0xff] }
 0x9e2   :  { %2177 = vmatmul.bf16.gmra.mxu3 %v2918_v30  ;;  %v2966_v30 = vor.u32 %v3207_v4, %v2963_v0 }
 0x9e5   :  { %v2129_v9 = vpop.f32.mrf.mxu1 }
 0x9ec   :  { %2379 = vmatmul.bf16.gmra.mxu2 %v5261_v16 }
 0x9ed   :  { %2148 = vmatmul.bf16.gmra.mxu1 %v2946_v13  ;;  %v2131_v52 = vpop.f32.mrf.mxu1 }
 0x9f2   :  { %2182 = vmatmul.bf16.gmra.mxu3 %v2926_v39 }
 0x9fc   :  { %2384 = vmatmul.bf16.gmra.mxu2 %v5264_v41 }
 0x9fd   :  { %2153 = vmatmul.bf16.gmra.mxu1 %v2954_v32 }
 0xa02   :  { %2187 = vmatmul.bf16.gmra.mxu3 %v2934_v24  ;;  %v5267_v24 = vld [vmem:[#allocation111_spill] sm:$0xff] }
 0xa04   :  { %v2134_v18 = vpop.f32.mrf.mxu1 }
 0xa0c   :  { %2389 = vmatmul.bf16.gmra.mxu2 %v5265_v19  ;;  %v2136_v59 = vpop.f32.mrf.mxu1 }
 0xa0d   :  { %2158 = vmatmul.bf16.gmra.mxu1 %v2962_v45 }
 0xa12   :  { %2192 = vmatmul.bf16.gmra.mxu3 %v2942_v47 }
 0xa1c   :  { %2394 = vmatmul.bf16.gmra.mxu2 %v5266_v23 }
 0xa22   :  { %2197 = vmatmul.bf16.gmra.mxu3 %v2950_v44 }
 0xa2c   :  { %2399 = vmatmul.bf16.gmra.mxu2 %v5267_v24 }
 0xa32   :  { %2202 = vmatmul.bf16.gmra.mxu3 %v2958_v20 }
 0xa3c   :  { %2404 = vmatmul.bf16.gmra.mxu2 %v5268_v5 }
 0xa42   :  { %2207 = vmatmul.bf16.gmra.mxu3 %v2966_v30 }
 0xa4a   :  { %v2139_v27 = vpop.f32.mrf.mxu1 }
 0xa4c   :  { %2409 = vmatmul.bf16.gmra.mxu2 %v5269_v51 }
 0xa52   :  { %v2141_v31 = vpop.f32.mrf.mxu1 }
 0xa55   :  { %v2173_v38 = vpop.f32.mrf.mxu3 }
 0xa56   :  { %v2174_v10 = vadd.f32 %v2173_v38, %v2124_v28 }
 0xa5a   :  { %v2144_v40 = vpop.f32.mrf.mxu1 }
 0xa5d   :  { %v2175_v62 = vpop.f32.mrf.mxu3 }
 0xa5e   :  { %v2176_v8 = vadd.f32 %v2175_v62, %v2126_v50  ;;  %v4743_v50 = vld [vmem:[%s4840_s10] ss:$0 sm:$0xff] }
 0xa5f   :  { %v2375_v35 = vpop.f32.mrf.mxu2 }
 0xa60   :  { %v2213_v7 = vpack.c.bf16 %v2176_v8, %v2174_v10 }
 0xa62   :  { %2277 = vmatmul.bf16.vlgmr.msrb.gmra.mxu1 %v2213_v7  ;;  %v2146_v32 = vpop.f32.mrf.mxu1 }
 0xa65   :  { %v2178_v39 = vpop.f32.mrf.mxu3 }
 0xa66   :  { %v2179_v48 = vadd.f32 %v2178_v39, %v2129_v9 }
 0xa67   :  { %v2377_v16 = vpop.f32.mrf.mxu2 }
 0xa6a   :  { %v2149_v37 = vpop.f32.mrf.mxu1 }
 0xa6d   :  { %v2180_v29 = vpop.f32.mrf.mxu3 }
 0xa6e   :  { %v2181_v25 = vadd.f32 %v2180_v29, %v2131_v52 }
 0xa6f   :  { %v2380_v30 = vpop.f32.mrf.mxu2 }
 0xa70   :  { %v2214_v14 = vpack.c.bf16 %v2181_v25, %v2179_v48 }
 0xa72   :  { %2282 = vmatmul.bf16.gmra.mxu1 %v2214_v14  ;;  %v2151_v45 = vpop.f32.mrf.mxu1 }
 0xa75   :  { %v2183_v2 = vpop.f32.mrf.mxu3 }
 0xa76   :  { %v2184_v21 = vadd.f32 %v2183_v2, %v2134_v18 }
 0xa77   :  { %v2382_v9 = vpop.f32.mrf.mxu2 }
 0xa7a   :  { %v2154_v1 = vpop.f32.mrf.mxu1 }
 0xa7d   :  { %v2185_v13 = vpop.f32.mrf.mxu3 }
 0xa7e   :  { %v2186_v42 = vadd.f32 %v2185_v13, %v2136_v59 }
 0xa7f   :  { %v2385_v8 = vpop.f32.mrf.mxu2 }
 0xa80   :  { %v2215_v12 = vpack.c.bf16 %v2186_v42, %v2184_v21 }
 0xa82   :  { %2287 = vmatmul.bf16.gmra.mxu1 %v2215_v12  ;;  %v2156_v22 = vpop.f32.mrf.mxu1 }
 0xa85   :  { %v2188_v54 = vpop.f32.mrf.mxu3 }
 0xa86   :  { %v2189_v63 = vadd.f32 %v2188_v54, %v2139_v27 }
 0xa87   :  { %v2387_v29 = vpop.f32.mrf.mxu2 }
 0xa8a   :  { %v2159_v20 = vpop.f32.mrf.mxu1 }
 0xa8d   :  { %v2190_v15 = vpop.f32.mrf.mxu3 }
 0xa8e   :  { %v2191_v49 = vadd.f32 %v2190_v15, %v2141_v31 }
 0xa8f   :  { %v2390_v24 = vpop.f32.mrf.mxu2 }
 0xa90   :  { %v2216_v47 = vpack.c.bf16 %v2191_v49, %v2189_v63 }
 0xa92   :  { %2292 = vmatmul.bf16.gmra.mxu1 %v2216_v47  ;;  %v2161_v4 = vpop.f32.mrf.mxu1 }
 0xa95   :  { %v2193_v33 = vpop.f32.mrf.mxu3 }
 0xa96   :  { %v2194_v61 = vadd.f32 %v2193_v33, %v2144_v40 }
 0xa97   :  { %v2392_v54 = vpop.f32.mrf.mxu2 }
 0xa9d   :  { %v2195_v60 = vpop.f32.mrf.mxu3 }
 0xa9e   :  { %v2196_v6 = vadd.f32 %v2195_v60, %v2146_v32 }
 0xa9f   :  { %v2395_v47 = vpop.f32.mrf.mxu2 }
 0xaa0   :  { %v2217_v43 = vpack.c.bf16 %v2196_v6, %v2194_v61 }
 0xaa2   :  { %2297 = vmatmul.bf16.gmra.mxu1 %v2217_v43 }
 0xaa5   :  { %v2198_v44 = vpop.f32.mrf.mxu3 }
 0xaa6   :  { %v2199_v58 = vadd.f32 %v2198_v44, %v2149_v37 }
 0xaa7   :  { %v2397_v61 = vpop.f32.mrf.mxu2 }
 0xaad   :  { %v2200_v36 = vpop.f32.mrf.mxu3 }
 0xaae   :  { %v2201_v11 = vadd.f32 %v2200_v36, %v2151_v45 }
 0xab0   :  { %v2218_v26 = vpack.c.bf16 %v2201_v11, %v2199_v58  ;;  %v2400_v58 = vpop.f32.mrf.mxu2 }
 0xab2   :  { %2302 = vmatmul.bf16.gmra.mxu1 %v2218_v26 }
 0xab5   :  { %v2203_v34 = vpop.f32.mrf.mxu3 }
 0xab6   :  { %v2204_v53 = vadd.f32 %v2203_v34, %v2154_v1 }
 0xabd   :  { %v2205_v46 = vpop.f32.mrf.mxu3 }
 0xabe   :  { %v2206_v57 = vadd.f32 %v2205_v46, %v2156_v22  ;;  %v2402_v46 = vpop.f32.mrf.mxu2 }
 0xac0   :  { %v2219_v17 = vpack.c.bf16 %v2206_v57, %v2204_v53 }
 0xac2   :  { %2307 = vmatmul.bf16.gmra.mxu1 %v2219_v17 }
 0xac5   :  { %v2208_v28 = vpop.f32.mrf.mxu3 }
 0xac6   :  { %v2209_v56 = vadd.f32 %v2208_v28, %v2159_v20  ;;  %v2405_v28 = vpop.f32.mrf.mxu2 }
 0xacd   :  { %v2210_v0 = vpop.f32.mrf.mxu3 }
 0xace   :  { %v2211_v55 = vadd.f32 %v2210_v0, %v2161_v4 }
 0xad0   :  { %v2220_v3 = vpack.c.bf16 %v2211_v55, %v2209_v56 }
 0xad2   :  { %2312 = vmatmul.bf16.gmra.mxu1 %v2220_v3  ;;  %v2407_v3 = vpop.f32.mrf.mxu2 }
 0xadf   :  { %v2278_v41 = vpop.f32.mrf.mxu1 }
 0xae0   :  { %v2376_v38 = vadd.f32 %v2375_v35, %v2278_v41 }
 0xae2   :  { %v4746_v52 = vadd.f32 %v4743_v50, %v2376_v38 }
 0xae4   :  { %v2435_v19 = vmax.f32 %v4746_v52, 0.0 }
 0xae7   :  { %v2280_v62 = vpop.f32.mrf.mxu1 }
 0xae8   :  { %v2378_v10 = vadd.f32 %v2377_v16, %v2280_v62 }
 0xaea   :  { %v4750_v18 = vadd.f32 %v4743_v50, %v2378_v10  ;;  %v2410_v10 = vpop.f32.mrf.mxu2 }
 0xaec   :  { %v2436_v7 = vmax.f32 %v4750_v18, 0.0 }
 0xaef   :  { %v2283_v39 = vpop.f32.mrf.mxu1 }
 0xaf0   :  { %v2381_v23 = vadd.f32 %v2380_v30, %v2283_v39 }
 0xaf2   :  { %v4754_v59 = vadd.f32 %v4743_v50, %v2381_v23 }
 0xaf4   :  { %v2437_v48 = vmax.f32 %v4754_v59, 0.0 }
 0xaf7   :  { %v2285_v25 = vpop.f32.mrf.mxu1 }
 0xaf8   :  { %v2383_v14 = vadd.f32 %v2382_v9, %v2285_v25 }
 0xafa   :  { %v4758_v27 = vadd.f32 %v4743_v50, %v2383_v14  ;;  %v2412_v14 = vpop.f32.mrf.mxu2 }
 0xafc   :  { %v2438_v2 = vmax.f32 %v4758_v27, 0.0 }
 0xaff   :  { %v2288_v13 = vpop.f32.mrf.mxu1 }
 0xb00   :  { %v2386_v31 = vadd.f32 %v2385_v8, %v2288_v13 }
 0xb02   :  { %v4762_v21 = vadd.f32 %v4743_v50, %v2386_v31 }
 0xb04   :  { %v2439_v42 = vmax.f32 %v4762_v21, 0.0 }
 0xb07   :  { %v2290_v12 = vpop.f32.mrf.mxu1 }
 0xb08   :  { %v2388_v40 = vadd.f32 %v2387_v29, %v2290_v12 }
 0xb0a   :  { %v4766_v5 = vadd.f32 %v4743_v50, %v2388_v40 }
 0xb0c   :  { %v2440_v15 = vmax.f32 %v4766_v5, 0.0 }
 0xb0f   :  { %v2293_v63 = vpop.f32.mrf.mxu1 }
 0xb10   :  { %v2391_v49 = vadd.f32 %v2390_v24, %v2293_v63 }
 0xb12   :  { %v2425_v32 = vadd.f32 %v4743_v50, %v2391_v49 }
 0xb14   :  { %v2441_v33 = vmax.f32 %v2425_v32, 0.0 }
 0xb17   :  { %v2295_v51 = vpop.f32.mrf.mxu1 }
 0xb18   :  { %v2393_v37 = vadd.f32 %v2392_v54, %v2295_v51 }
 0xb1a   :  { %v2426_v60 = vadd.f32 %v4743_v50, %v2393_v37 }
 0xb1c   :  { %v2442_v6 = vmax.f32 %v2426_v60, 0.0 }
 0xb1f   :  { %v2298_v43 = vpop.f32.mrf.mxu1 }
 0xb20   :  { %v2396_v44 = vadd.f32 %v2395_v47, %v2298_v43 }
 0xb22   :  { %v2427_v45 = vadd.f32 %v4743_v50, %v2396_v44 }
 0xb24   :  { %v2443_v36 = vmax.f32 %v2427_v45, 0.0 }
 0xb27   :  { %v2300_v11 = vpop.f32.mrf.mxu1 }
 0xb28   :  { %v2398_v1 = vadd.f32 %v2397_v61, %v2300_v11 }
 0xb2a   :  { %v2428_v26 = vadd.f32 %v4743_v50, %v2398_v1 }
 0xb2c   :  { %v2444_v34 = vmax.f32 %v2428_v26, 0.0 }
 0xb2f   :  { %v2303_v22 = vpop.f32.mrf.mxu1 }
 0xb30   :  { %v2401_v53 = vadd.f32 %v2400_v58, %v2303_v22 }
 0xb32   :  { %v2429_v57 = vadd.f32 %v4743_v50, %v2401_v53 }
 0xb34   :  { %v2445_v17 = vmax.f32 %v2429_v57, 0.0 }
 0xb37   :  { %v2305_v35 = vpop.f32.mrf.mxu1 }
 0xb38   :  { %v2403_v20 = vadd.f32 %v2402_v46, %v2305_v35 }
 0xb3a   :  { %v2430_v16 = vadd.f32 %v4743_v50, %v2403_v20 }
 0xb3c   :  { %v2446_v4 = vmax.f32 %v2430_v16, 0.0 }
 0xb3f   :  { %v2308_v0 = vpop.f32.mrf.mxu1 }
 0xb40   :  { %v2406_v56 = vadd.f32 %v2405_v28, %v2308_v0 }
 0xb42   :  { %v2431_v55 = vadd.f32 %v4743_v50, %v2406_v56 }
 0xb44   :  { %v2447_v30 = vmax.f32 %v2431_v55, 0.0 }
 0xb47   :  { %v2310_v41 = vpop.f32.mrf.mxu1 }
 0xb48   :  { %v2408_v9 = vadd.f32 %v2407_v3, %v2310_v41 }
 0xb4a   :  { %v2432_v38 = vadd.f32 %v4743_v50, %v2408_v9 }
 0xb4c   :  { %v2448_v62 = vmax.f32 %v2432_v38, 0.0 }
 0xb4f   :  { %v2313_v8 = vpop.f32.mrf.mxu1 }
 0xb50   :  { %v2411_v39 = vadd.f32 %v2410_v10, %v2313_v8 }
 0xb52   :  { %v2433_v23 = vadd.f32 %v4743_v50, %v2411_v39 }
 0xb54   :  { %v2449_v29 = vmax.f32 %v2433_v23, 0.0 }
 0xb57   :  { %v2315_v25 = vpop.f32.mrf.mxu1 }
 0xb58   :  { %v2413_v24 = vadd.f32 %v2412_v14, %v2315_v25 }
 0xb5a   :  { %v2434_v13 = vadd.f32 %v4743_v50, %v2413_v24 }
 0xb5c   :  { %v2450_v31 = vmax.f32 %v2434_v13, 0.0 }
 0xb5e   :  { %v2463_v12 = vpack.c.bf16 %v2450_v31, %v2449_v29 }
 0xb5f   :  { %3553 = dma.done.wait [#allocation4 + $0x1], 64 }
 0xb60   :  { %3554 = vsyncadd [#allocation4 + $0x1], 4294967232  ;;  %2464 = vmatpush.bf16.msrb.mxu3 %v2463_v12  ;;  %v2462_v54 = vpack.c.bf16 %v2448_v62, %v2447_v30  ;;  %v2461_v40 = vpack.c.bf16 %v2446_v4, %v2445_v17  ;;  %v2460_v5 = vpack.c.bf16 %v2444_v34, %v2443_v36  ;;  %v2459_v63 = vpack.c.bf16 %v2442_v6, %v2441_v33  ;;  %v5270_v32 = vld [vmem:[#allocation88_spill] sm:$0xff]  ;;  %v5271_v51 = vld [vmem:[#allocation89_spill] sm:$0xff]  ;;  %s3571_s7 = smov [#allocation22]   ;;  %s2619_s24 = sshll.u32 %s4845_s15, 4  ;;  %s2620_s24 = int_to_ptr.hbm [resolvable:$true] %s2619_s24 }
 0xb61   :  { %v2458_v49 = vpack.c.bf16 %v2440_v15, %v2439_v42  ;;  %v2457_v50 = vpack.c.bf16 %v2438_v2, %v2437_v48  ;;  %v2456_v47 = vpack.c.bf16 %v2436_v7, %v2435_v19  ;;  %v3062_v37 = vor.u32 %v5271_v51, %v5270_v32  ;;  %v2455_v33 = vld [vmem:[#allocation3] sm:$0xf]  ;;  %v5272_v21 = vld [vmem:[#allocation86_spill] sm:$0xff]  ;;  %v5273_v42 = vld [vmem:[#allocation87_spill] sm:$0xff]  ;;  %s2617_s6 = sshll.u32 %s3571_s7, 4  ;;  %s2618_s6 = int_to_ptr.vmem [resolvable:$true] %s2617_s6 }
 0xb62   :  { %v3058_v15 = vor.u32 %v5273_v42, %v5272_v21  ;;  %v5274_v59 = vld [vmem:[#allocation84_spill] sm:$0xff]  ;;  %v5275_v27 = vld [vmem:[#allocation85_spill] sm:$0xff]  ;;  %v5276_v2 = vld [vmem:[#allocation82_spill] sm:$0xff] }
 0xb63   :  { %v3054_v48 = vor.u32 %v5275_v27, %v5274_v59  ;;  %v5277_v52 = vld [vmem:[#allocation83_spill] sm:$0xff]  ;;  %v5278_v19 = vld [vmem:[#allocation80_spill] sm:$0xff]  ;;  %v5279_v18 = vld [vmem:[#allocation81_spill] sm:$0xff] }
 0xb64   :  { %2465 = vmatpush.bf16.msrb.mxu3 %v2462_v54  ;;  %v3050_v60 = vor.u32 %v5277_v52, %v5276_v2  ;;  %v3046_v7 = vor.u32 %v5279_v18, %v5278_v19  ;;  %v5280_v61 = vld [vmem:[#allocation78_spill] sm:$0xff]  ;;  %v5281_v6 = vld [vmem:[#allocation79_spill] sm:$0xff]  ;;  %v5282_v44 = vld [vmem:[#allocation76_spill] sm:$0xff] }
 0xb65   :  { %v3042_v43 = vor.u32 %v5281_v6, %v5280_v61  ;;  %v5283_v45 = vld [vmem:[#allocation77_spill] sm:$0xff]  ;;  %v5284_v58 = vld [vmem:[#allocation74_spill] sm:$0xff]  ;;  %v5285_v11 = vld [vmem:[#allocation75_spill] sm:$0xff] }
 0xb66   :  { %v3038_v36 = vor.u32 %v5283_v45, %v5282_v44  ;;  %v3034_v1 = vor.u32 %v5285_v11, %v5284_v58  ;;  %v5286_v26 = vld [vmem:[#allocation104_spill] sm:$0xff]  ;;  %v5287_v34 = vld [vmem:[#allocation105_spill] sm:$0xff]  ;;  %v5288_v46 = vld [vmem:[#allocation102_spill] sm:$0xff] }
 0xb67   :  { %v3094_v22 = vor.u32 %v5287_v34, %v5286_v26  ;;  %v5289_v53 = vld [vmem:[#allocation103_spill] sm:$0xff]  ;;  %v5290_v17 = vld [vmem:[#allocation100_spill] sm:$0xff]  ;;  %v5291_v35 = vld [vmem:[#allocation101_spill] sm:$0xff] }
 0xb68   :  { %2466 = vmatpush.bf16.msrb.mxu3 %v2461_v40  ;;  %v3090_v57 = vor.u32 %v5289_v53, %v5288_v46  ;;  %v3086_v20 = vor.u32 %v5291_v35, %v5290_v17  ;;  %v5292_v28 = vld [vmem:[#allocation98_spill] sm:$0xff]  ;;  %v5293_v16 = vld [vmem:[#allocation99_spill] sm:$0xff]  ;;  %v5294_v0 = vld [vmem:[#allocation96_spill] sm:$0xff] }
 0xb69   :  { %v3082_v4 = vor.u32 %v5293_v16, %v5292_v28  ;;  %v5295_v56 = vld [vmem:[#allocation97_spill] sm:$0xff]  ;;  %v5296_v3 = vld [vmem:[#allocation94_spill] sm:$0xff]  ;;  %v5297_v30 = vld [vmem:[#allocation95_spill] sm:$0xff] }
 0xb6a   :  { %v3078_v55 = vor.u32 %v5295_v56, %v5294_v0  ;;  %v3074_v41 = vor.u32 %v5297_v30, %v5296_v3  ;;  %v5298_v8 = vld [vmem:[#allocation92_spill] sm:$0xff]  ;;  %v5299_v39 = vld [vmem:[#allocation93_spill] sm:$0xff]  ;;  %v5300_v29 = vld [vmem:[#allocation90_spill] sm:$0xff] }
 0xb6b   :  { %v3070_v23 = vor.u32 %v5299_v39, %v5298_v8  ;;  %v5301_v25 = vld [vmem:[#allocation91_spill] sm:$0xff]  ;;  %v3225_v24 = vld [vmem:[%s4842_s12] ss:$0 sm:$0xff] }
 0xb6c   :  { %2467 = vmatpush.bf16.msrb.mxu3 %v2460_v5  ;;  %v3066_v14 = vor.u32 %v5301_v25, %v5300_v29  ;;  %v3226_v5 = vld [vmem:[%s4844_s14] ss:$0 sm:$0xff] }
 0xb70   :  { %2468 = vmatpush.bf16.msrb.mxu3 %v2459_v63 }
 0xb74   :  { %2469 = vmatpush.bf16.msrb.mxu3 %v2458_v49 }
 0xb78   :  { %2470 = vmatpush.bf16.msrb.mxu3 %v2457_v50 }
 0xb7c   :  { %2471 = vmatpush.bf16.msrb.mxu3 %v2456_v47 }
 0xb7f   :  { %2472 = vmatmul.bf16.vlgmr.msrb.gmra.mxu3 %v2455_v33 }
 0xb80   :  { %2531 = vmatpush.bf16.msra.mxu3 %v3062_v37 }
 0xb84   :  { %2532 = vmatpush.bf16.msra.mxu3 %v3058_v15 }
 0xb88   :  { %2533 = vmatpush.bf16.msra.mxu3 %v3054_v48 }
 0xb8c   :  { %2534 = vmatpush.bf16.msra.mxu3 %v3050_v60 }
 0xb90   :  { %2535 = vmatpush.bf16.msra.mxu3 %v3046_v7 }
 0xb94   :  { %2536 = vmatpush.bf16.msra.mxu3 %v3042_v43 }
 0xb98   :  { %2537 = vmatpush.bf16.msra.mxu3 %v3038_v36 }
 0xb9c   :  { %2538 = vmatpush.bf16.msra.mxu3 %v3034_v1 }
 0xba0   :  { %2598 = vmatpush.bf16.msrb.mxu3 %v3094_v22 }
 0xba4   :  { %2599 = vmatpush.bf16.msrb.mxu3 %v3090_v57 }
 0xba8   :  { %2600 = vmatpush.bf16.msrb.mxu3 %v3086_v20 }
 0xbac   :  { %2601 = vmatpush.bf16.msrb.mxu3 %v3082_v4 }
 0xbb0   :  { %2602 = vmatpush.bf16.msrb.mxu3 %v3078_v55 }
 0xbb4   :  { %2603 = vmatpush.bf16.msrb.mxu3 %v3074_v41 }
 0xbb8   :  { %2604 = vmatpush.bf16.msrb.mxu3 %v3070_v23 }
 0xbbc   :  { %2605 = vmatpush.bf16.msrb.mxu3 %v3066_v14 }
 0xc02   :  { %v2473_v9 = vpop.f32.mrf.mxu3 }
 0xc03   :  { %v2477_v38 = vmul.f32 0.01, %v2473_v9 }
 0xc05   :  { %v2478_v62 = vpack.c.bf16 %v2477_v38, %v2477_v38 }
 0xc07   :  { %2539 = vmatmul.bf16.vlgmr.msra.gmra.mxu3 %v2478_v62 }
 0xc0a   :  { %v2475_v10 = vpop.f32.mrf.mxu3 }
 0xc8a   :  { %v2540_v13 = vpop.f32.mrf.mxu3 }
 0xc8b   :  { %v2541_v31 = vadd.f32 %v3225_v24, %v2540_v13 }
 0xc8d   :  { %v2544_v12 = vmax.f32 %v2541_v31, 0.0 }
 0xc8f   :  { %v2545_v54 = vpack.c.bf16 %v2544_v12, %v2544_v12 }
 0xc91   :  { %2606 = vmatmul.bf16.vlgmr.msrb.gmra.mxu3 %v2545_v54 }
 0xc92   :  { %v2542_v40 = vpop.f32.mrf.mxu3 }
 0xd14   :  { %v2607_v63 = vpop.f32.mrf.mxu3 }
 0xd15   :  { %v2608_v49 = vadd.f32 %v3226_v5, %v2607_v63 }
 0xd17   :  { %2611 = vst [vmem:[#allocation22] sm:$0xff] %v2608_v49 }
 0xd18   :  { %2622 = dma.vmem_to_hbm [thread:$0]  %s2618_s6, 128, %s2620_s24, [#allocation7]  }
 0xd1c   :  { %v2609_v50 = vpop.f32.mrf.mxu3 }
 0xd1d   :  { %3555 = dma.done.wait [#allocation7], 128  }
 0xd1e   :  { %3556 = vsyncadd [#allocation7], 4294967168 }
 0xd1f   :  { %2627 = vsyncpa [#allocation6], 1 }
 0xd20   :  { %2628 = vsyncpa [#allocation9], 1 }
 0xd21   :  { %2629 = vsyncpa [#allocation12], 1 }
 0xd22   :  { %2630 = vsyncpa [#allocation15], 1 }
 0xd23   :  { %2631 = vsyncpa [#allocation18], 1 }
 0xd24   :  { %2632 = vsyncpa [#allocation21], 1 }
 0xd25   :  { %2633 = vsyncpa [#allocation7], 1 }
 0xd26   :  { %2634 = vsyncmov [#allocation4] }
 0xd29   :  { %s2635_s12 = vpop.sfrf %2634 }
 0xd2a   :  { %p3095_p0 = scmp.ne.s32.totalorder %s2635_s12, 0 }
 0xd2c   :  { %2639 = shalt.err (%p3095_p0)  }
 0xd2d   :  { %2641 = vsyncmov [#allocation4 + $0x1] }
 0xd30   :  { %s2642_s14 = vpop.sfrf %2641 }
 0xd31   :  { %p3096_p1 = scmp.ne.s32.totalorder %s2642_s14, 0 }
 0xd33   :  { %2646 = shalt.err (%p3096_p1)  }

</bundles_post_ra>
